<compile_context>
chip_gen: v7x
topology: tpu7x:2x2x1
jax: 0.10.0
libtpu: 0.0.40
codegen_flags: <defaults>
</compile_context>

<pallas_src>
import functools
import math
from dataclasses import dataclass

import jax
import jax.numpy as jnp
from jax.experimental import pallas as pl
from jax.experimental.pallas import tpu as pltpu


# ------------------------------ in-kernel helpers ---------------------------

def _ln_f32(x, g, b, eps=1e-5):
    """Row-wise LayerNorm in fp32 (matches torch LayerNorm with fp32 upcast)."""
    mu = jnp.mean(x, axis=-1, keepdims=True)
    var = jnp.mean(jnp.square(x - mu), axis=-1, keepdims=True)
    return (x - mu) * jax.lax.rsqrt(var + eps) * g + b


# ------------------------------ fused kernels -------------------------------

def _embed_kernel(p_ref, w_ref, cls_ref, pc_ref, pt_ref, g_ref, b_ref, o_ref):
    """Patch matmul + CLS/pos add + ln_pre for Bt batch rows; single store."""
    Bt, GG, CPP = p_ref.shape
    W = w_ref.shape[1]
    tok = jnp.dot(p_ref[...].astype(jnp.bfloat16).reshape(Bt * GG, CPP),
                  w_ref[...], preferred_element_type=jnp.float32)      # (Bt*GG, W)
    tok = tok.reshape(Bt, GG, W) + pt_ref[...]                         # + pos (patch rows)
    cls_row = (cls_ref[...] + pc_ref[...]).reshape(1, 1, W)            # (1,1,W)
    cls_rows = cls_row + jnp.zeros((Bt, 1, W), jnp.float32)            # broadcast per row
    full = jnp.concatenate([cls_rows, tok], axis=1)                    # (Bt, S, W)
    o_ref[...] = _ln_f32(full, g_ref[...], b_ref[...]).astype(o_ref.dtype)


def _block_kernel(x_ref, ln1g, ln1b, wqkv, bqkv, wout, bout,
                  ln2g, ln2b, wfc, bfc, wprj, bprj, *rest,
                  heads, fuse_final_ln):
    """Fused pre-LN residual attention block (CLIP style, QuickGELU MLP)."""
    if fuse_final_ln:
        fing, finb, o_ref = rest
    else:
        (o_ref,) = rest

    Bt, S, W = x_ref.shape
    dh = W // heads
    scale = 1.0 / math.sqrt(dh)

    x = x_ref[...].astype(jnp.float32).reshape(Bt * S, W)              # (Bt*S, W)

    # ---- attention ----
    h = _ln_f32(x, ln1g[...], ln1b[...])
    qkv = jnp.dot(h.astype(jnp.bfloat16), wqkv[...],
                  preferred_element_type=jnp.float32) + bqkv[...]      # (Bt*S, 3W)
    qkv = qkv.astype(jnp.bfloat16)                                     # cast once

    head_outs = []
    for hd in range(heads):                                            # small static loop
        q = qkv[:, hd * dh:(hd + 1) * dh].reshape(Bt, S, dh)
        k = qkv[:, W + hd * dh:W + (hd + 1) * dh].reshape(Bt, S, dh)
        v = qkv[:, 2 * W + hd * dh:2 * W + (hd + 1) * dh].reshape(Bt, S, dh)
        s = jnp.einsum('bqd,bkd->bqk', q, k,
                       preferred_element_type=jnp.float32) * scale     # (Bt, S, S)
        s = s - jnp.max(s, axis=-1, keepdims=True)
        p = jnp.exp(s)
        p = p * pl.reciprocal(jnp.sum(p, axis=-1, keepdims=True), approx=False)
        oh = jnp.einsum('bqk,bkd->bqd', p.astype(jnp.bfloat16), v,
                        preferred_element_type=jnp.float32)            # (Bt, S, dh)
        head_outs.append(oh.astype(jnp.bfloat16))

    # single full-width output projection on the concatenated heads
    att = jnp.concatenate(head_outs, axis=-1).reshape(Bt * S, W)       # bf16
    att = jnp.dot(att, wout[...], preferred_element_type=jnp.float32) + bout[...]
    x = x + att                                                        # residual

    # ---- MLP ----
    h2 = _ln_f32(x, ln2g[...], ln2b[...])
    h2 = jnp.dot(h2.astype(jnp.bfloat16), wfc[...],
                 preferred_element_type=jnp.float32) + bfc[...]
    h2 = h2 * jax.nn.sigmoid(1.702 * h2)                               # QuickGELU
    h2 = jnp.dot(h2.astype(jnp.bfloat16), wprj[...],
                 preferred_element_type=jnp.float32) + bprj[...]
    y = x + h2                                                         # residual

    if fuse_final_ln:                                                  # fused epilogue
        y = _ln_f32(y, fing[...], finb[...])

    o_ref[...] = y.reshape(Bt, S, W).astype(o_ref.dtype)


def _tail_kernel(h_ref, lng, lnb, proj_ref, plng, plnb, pw_ref, pb_ref, o_ref):
    """ln_post -> @proj -> L2 normalize -> LayerNorm -> Linear (Dropout=identity)."""
    h = _ln_f32(h_ref[...].astype(jnp.float32), lng[...], lnb[...])
    y = jnp.dot(h.astype(jnp.bfloat16), proj_ref[...],
                preferred_element_type=jnp.float32)                    # (rows, E)
    y = y * jax.lax.rsqrt(jnp.sum(y * y, axis=-1, keepdims=True))      # x / ||x||
    y = _ln_f32(y, plng[...], plnb[...])
    o_ref[...] = (jnp.dot(y.astype(jnp.bfloat16), pw_ref[...],
                          preferred_element_type=jnp.float32)
                  + pb_ref[...]).astype(o_ref.dtype)


def _ln_rows_kernel(x_ref, g_ref, b_ref, o_ref):
    o_ref[...] = _ln_f32(x_ref[...].astype(jnp.float32),
                         g_ref[...], b_ref[...]).astype(o_ref.dtype)


# ------------------------------ tiling helpers -------------------------------

def _pick_bt(B, target=8):
    """Batch rows per grid step: as many as possible (<= target) while keeping
    >= 2 grid steps so v7x megacore can split the 'parallel' axis."""
    if B <= 1:
        return 1
    best = 1
    for bt in range(1, min(B, target) + 1):
        if B % bt == 0 and B // bt >= 2:
            best = bt
    return best


def _pick_row_tile(n):
    """Row tile for 2-D blocks: must be a multiple of 8 or the full extent."""
    return 8 if (n % 8 == 0 and n > 8) else n


def _block_vmem_bytes(Bt, S, W):
    wb = 2 * (W * 3 * W + W * W + W * 4 * W + 4 * W * W)   # bf16 weights
    pb = 4 * (16 * 4 * W)                                  # biases / LN params (loose)
    act = 2 * Bt * S * W * 2 * 2                           # bf16 in/out, double-buffered
    work = 4 * Bt * S * (3 * W + 4 * W + 4 * W)            # f32 intermediates (loose)
    return 2 * wb + pb + act + work


# ------------------------------ kernel wrappers ------------------------------

def fused_embed(patches, p):
    BF, GG, CPP = patches.shape
    W = p["conv_w"].shape[1]
    S = GG + 1
    Bt = _pick_bt(BF)
    wfull = lambda i: (0, 0)
    return pl.pallas_call(
        _embed_kernel,
        grid=(BF // Bt,),
        out_shape=jax.ShapeDtypeStruct((BF, S, W), jnp.bfloat16),
        in_specs=[
            pl.BlockSpec((Bt, GG, CPP), lambda i: (i, 0, 0)),
            pl.BlockSpec((CPP, W), wfull),
            pl.BlockSpec((1, W), wfull),
            pl.BlockSpec((1, W), wfull),
            pl.BlockSpec((GG, W), wfull),
            pl.BlockSpec((1, W), wfull),
            pl.BlockSpec((1, W), wfull),
        ],
        out_specs=pl.BlockSpec((Bt, S, W), lambda i: (i, 0, 0)),
        compiler_params=pltpu.CompilerParams(dimension_semantics=("parallel",)),
    )(patches, p["conv_w"], p["cls"], p["pos_cls"], p["pos_tok"],
      p["ln_pre_g"], p["ln_pre_b"])


def fused_block(x, p, heads, *, final_ln=None, out_dtype=jnp.bfloat16):
    B, S, W = x.shape
    Bt = _pick_bt(B)
    wfull = lambda i: (0, 0)

    in_specs = [
        pl.BlockSpec((Bt, S, W), lambda i: (i, 0, 0)),
        pl.BlockSpec((1, W), wfull), pl.BlockSpec((1, W), wfull),
        pl.BlockSpec((W, 3 * W), wfull), pl.BlockSpec((1, 3 * W), wfull),
        pl.BlockSpec((W, W), wfull), pl.BlockSpec((1, W), wfull),
        pl.BlockSpec((1, W), wfull), pl.BlockSpec((1, W), wfull),
        pl.BlockSpec((W, 4 * W), wfull), pl.BlockSpec((1, 4 * W), wfull),
        pl.BlockSpec((4 * W, W), wfull), pl.BlockSpec((1, W), wfull),
    ]
    args = [x,
            p["ln1_g"], p["ln1_b"],
            p["w_qkv"], p["b_qkv"],
            p["w_out"], p["b_out"],
            p["ln2_g"], p["ln2_b"],
            p["w_fc"], p["b_fc"],
            p["w_prj"], p["b_prj"]]
    if final_ln is not None:
        in_specs += [pl.BlockSpec((1, W), wfull), pl.BlockSpec((1, W), wfull)]
        args += [final_ln[0], final_ln[1]]

    flops = Bt * (2 * S * W * 3 * W            # qkv projection
                  + 2 * 2 * S * S * W          # q@k^T and p@v (all heads)
                  + 2 * S * W * W              # output projection
                  + 2 * 2 * S * W * 4 * W)     # MLP fc + proj
    transcendentals = Bt * S * (heads * S + 4 * W)
    bytes_accessed = (2 * 2 * Bt * S * W                          # bf16 activations in/out
                      + 2 * (3 * W * W + W * W + 8 * W * W)       # bf16 weights
                      + 4 * 15 * W)                               # biases / LN params

    vmem_limit = int(min(max(4 * _block_vmem_bytes(Bt, S, W), 8 << 20), 48 << 20))

    return pl.pallas_call(
        functools.partial(_block_kernel, heads=heads,
                          fuse_final_ln=final_ln is not None),
        grid=(B // Bt,),
        out_shape=jax.ShapeDtypeStruct((B, S, W), out_dtype),
        in_specs=in_specs,
        out_specs=pl.BlockSpec((Bt, S, W), lambda i: (i, 0, 0)),
        compiler_params=pltpu.CompilerParams(
            dimension_semantics=("parallel",),
            vmem_limit_bytes=vmem_limit),
        cost_estimate=pl.CostEstimate(flops=int(flops),
                                      transcendentals=int(transcendentals),
                                      bytes_accessed=int(bytes_accessed)),
    )(*args)


def fused_tail(h0, params):
    pv = params["vit"]
    BF, W = h0.shape
    E = pv["proj"].shape[1]
    HW = params["proj_w"].shape[1]
    rt = _pick_row_tile(BF)
    wfull = lambda i: (0, 0)
    return pl.pallas_call(
        _tail_kernel,
        grid=(BF // rt,),
        out_shape=jax.ShapeDtypeStruct((BF, HW), jnp.bfloat16),
        in_specs=[
            pl.BlockSpec((rt, W), lambda i: (i, 0)),
            pl.BlockSpec((1, W), wfull), pl.BlockSpec((1, W), wfull),
            pl.BlockSpec((W, E), wfull),
            pl.BlockSpec((1, E), wfull), pl.BlockSpec((1, E), wfull),
            pl.BlockSpec((E, HW), wfull), pl.BlockSpec((1, HW), wfull),
        ],
        out_specs=pl.BlockSpec((rt, HW), lambda i: (i, 0)),
        compiler_params=pltpu.CompilerParams(dimension_semantics=("parallel",)),
    )(h0, pv["ln_post_g"], pv["ln_post_b"], pv["proj"],
      params["proj_ln_g"], params["proj_ln_b"], params["proj_w"], params["proj_b"])


def pallas_layernorm_rows(x, g, b):
    """Standalone row LayerNorm (only used if the head has zero blocks)."""
    M, D = x.shape
    wfull = lambda i: (0, 0)
    return pl.pallas_call(
        _ln_rows_kernel,
        grid=(1,),
        out_shape=jax.ShapeDtypeStruct((M, D), jnp.float32),
        in_specs=[pl.BlockSpec((M, D), wfull),
                  pl.BlockSpec((1, D), wfull),
                  pl.BlockSpec((1, D), wfull)],
        out_specs=pl.BlockSpec((M, D), wfull),
    )(x, g, b)


# ------------------------------- model pieces --------------------------------

@dataclass(frozen=True)
class VisionCfg:
    width: int = 32
    heads: int = 4
    layers: int = 2
    patch_size: int = 8
    image_resolution: int = 16
    output_dim: int = 16


@dataclass(frozen=True)
class HeadCfg:
    width: int = 32
    heads: int = 4
    layers: int = 1


def vit_forward(x, p, cfg: VisionCfg):
    """x: (BF, 3, H, W) NCHW -> (BF, width) CLS features (pre ln_post)."""
    BF = x.shape[0]
    P = cfg.patch_size
    G = cfg.image_resolution // P
    # conv1 (stride == kernel) as patch extraction: flatten order (c, ph, pw)
    patches = x.reshape(BF, 3, G, P, G, P).transpose(0, 2, 4, 1, 3, 5)
    patches = patches.reshape(BF, G * G, 3 * P * P)
    h = fused_embed(patches, p)                     # (BF, S, W) bf16, after ln_pre
    for blk in p["blocks"]:
        h = fused_block(h, blk, cfg.heads)
    return h[:, 0, :]                               # CLS row; ln_post+proj are in the tail


def clip_transformer_forward(params, x, vcfg: VisionCfg, hcfg: HeadCfg):
    """x: (b, f, c, h, w) -> (b, f, head_width)."""
    b, f = x.shape[0], x.shape[1]
    x = x.reshape(b * f, *x.shape[2:])              # (b f) c h w
    h0 = vit_forward(x, params["vit"], vcfg)        # (b*f, width) bf16
    y = fused_tail(h0, params)                      # ln_post, proj, L2, LN, Linear -> bf16
    y = y.reshape(b, f, hcfg.width)
    # TODO(synk): TransformerHead definition not provided in the reference; assumed to be
    # a stack of pre-LN residual attention blocks over the frame axis + final LayerNorm.
    nblk = len(params["head_blocks"])
    for li, blk in enumerate(params["head_blocks"]):
        last = li == nblk - 1
        y = fused_block(
            y, blk, hcfg.heads,
            final_ln=(params["head_ln_g"], params["head_ln_b"]) if last else None,
            out_dtype=jnp.float32 if last else jnp.bfloat16)
    if nblk == 0:
        y = pallas_layernorm_rows(y.reshape(b * f, hcfg.width).astype(jnp.float32),
                                  params["head_ln_g"], params["head_ln_b"])
        y = y.reshape(b, f, hcfg.width)
    return y


# ------------------------------- init / main ---------------------------------

def init_params(key, vcfg: VisionCfg, hcfg: HeadCfg):
    keys = iter(jax.random.split(key, 256))
    bf16 = jnp.bfloat16

    def nrm(shape, scale, dtype=jnp.float32):
        return (scale * jax.random.normal(next(keys), shape, jnp.float32)).astype(dtype)

    def block_params(width):
        return dict(
            ln1_g=jnp.ones((1, width), jnp.float32), ln1_b=jnp.zeros((1, width), jnp.float32),
            w_qkv=nrm((width, 3 * width), width ** -0.5, bf16),
            b_qkv=jnp.zeros((1, 3 * width), jnp.float32),
            w_out=nrm((width, width), width ** -0.5, bf16),
            b_out=jnp.zeros((1, width), jnp.float32),
            ln2_g=jnp.ones((1, width), jnp.float32), ln2_b=jnp.zeros((1, width), jnp.float32),
            w_fc=nrm((width, 4 * width), width ** -0.5, bf16),
            b_fc=jnp.zeros((1, 4 * width), jnp.float32),
            w_prj=nrm((4 * width, width), (4 * width) ** -0.5, bf16),
            b_prj=jnp.zeros((1, width), jnp.float32),
        )

    W, P = vcfg.width, vcfg.patch_size
    G = vcfg.image_resolution // P
    GG = G * G
    sc = W ** -0.5
    pos = nrm((GG + 1, W), sc)
    vit = dict(
        conv_w=nrm((3 * P * P, W), (3 * P * P) ** -0.5, bf16),
        cls=nrm((1, W), sc),
        pos_cls=pos[0:1], pos_tok=pos[1:],
        ln_pre_g=jnp.ones((1, W), jnp.float32), ln_pre_b=jnp.zeros((1, W), jnp.float32),
        blocks=[block_params(W) for _ in range(vcfg.layers)],
        ln_post_g=jnp.ones((1, W), jnp.float32), ln_post_b=jnp.zeros((1, W), jnp.float32),
        proj=nrm((W, vcfg.output_dim), sc, bf16),
    )
    E, HW = vcfg.output_dim, hcfg.width
    return dict(
        vit=vit,
        proj_ln_g=jnp.ones((1, E), jnp.float32), proj_ln_b=jnp.zeros((1, E), jnp.float32),
        proj_w=nrm((E, HW), E ** -0.5, bf16), proj_b=jnp.zeros((1, HW), jnp.float32),
        head_blocks=[block_params(HW) for _ in range(hcfg.layers)],
        head_ln_g=jnp.ones((1, HW), jnp.float32), head_ln_b=jnp.zeros((1, HW), jnp.float32),
    )


if __name__ == "__main__":
    vcfg = VisionCfg(width=32, heads=4, layers=2, patch_size=8,
                     image_resolution=16, output_dim=16)
    hcfg = HeadCfg(width=32, heads=4, layers=1)
    b, f = 2, 2

    key = jax.random.PRNGKey(0)
    kp, kx = jax.random.split(key)
    params = init_params(kp, vcfg, hcfg)
    x = jax.random.normal(kx, (b, f, 3, vcfg.image_resolution, vcfg.image_resolution),
                          jnp.float32)

    fwd = jax.jit(functools.partial(clip_transformer_forward, vcfg=vcfg, hcfg=hcfg))
    out = fwd(params, x)
    jax.block_until_ready(out)
    assert out.shape == (b, f, hcfg.width), out.shape
    assert bool(jnp.all(jnp.isfinite(out.astype(jnp.float32))))
    print("KERNEL_OK")
</pallas_src>

<mosaic_0001>
module attributes {stable_mosaic.version = 11 : i64} {
  func.func @_embed_kernel(%arg0: i32, %arg1: memref<2x4x192xf32, #tpu.memory_space<vmem>>, %arg2: memref<192x32xbf16, #tpu.memory_space<vmem>>, %arg3: memref<1x32xf32, #tpu.memory_space<vmem>>, %arg4: memref<1x32xf32, #tpu.memory_space<vmem>>, %arg5: memref<4x32xf32, #tpu.memory_space<vmem>>, %arg6: memref<1x32xf32, #tpu.memory_space<vmem>>, %arg7: memref<1x32xf32, #tpu.memory_space<vmem>>, %arg8: memref<2x5x32xbf16, #tpu.memory_space<vmem>>) attributes {dimension_semantics = [#tpu.dimension_semantics<parallel>], iteration_bounds = array<i64: 2>, scalar_prefetch = 0 : i64, scratch_operands = 0 : i64, tpu.core_type = #tpu.core_type<tc>, window_params = [{transform_indices = @transform_0, window_bounds = array<i64: 2, 4, 192>}, {pipeline_mode = #tpu.pipeline_mode<synchronous>, transform_indices = @transform_1, window_bounds = array<i64: 192, 32>}, {pipeline_mode = #tpu.pipeline_mode<synchronous>, transform_indices = @transform_2, window_bounds = array<i64: 1, 32>}, {pipeline_mode = #tpu.pipeline_mode<synchronous>, transform_indices = @transform_3, window_bounds = array<i64: 1, 32>}, {pipeline_mode = #tpu.pipeline_mode<synchronous>, transform_indices = @transform_4, window_bounds = array<i64: 4, 32>}, {pipeline_mode = #tpu.pipeline_mode<synchronous>, transform_indices = @transform_5, window_bounds = array<i64: 1, 32>}, {pipeline_mode = #tpu.pipeline_mode<synchronous>, transform_indices = @transform_6, window_bounds = array<i64: 1, 32>}, {transform_indices = @transform_7, window_bounds = array<i64: 2, 5, 32>}]} {
    %c0 = arith.constant 0 : index
    %c0_0 = arith.constant 0 : index
    %c0_1 = arith.constant 0 : index
    %0 = vector.load %arg1[%c0, %c0_0, %c0_1] : memref<2x4x192xf32, #tpu.memory_space<vmem>>, vector<2x4x192xf32>
    %1 = arith.truncf %0 : vector<2x4x192xf32> to vector<2x4x192xbf16>
    %2 = vector.shape_cast %1 : vector<2x4x192xbf16> to vector<8x192xbf16>
    %c0_2 = arith.constant 0 : index
    %c0_3 = arith.constant 0 : index
    %3 = vector.load %arg2[%c0_2, %c0_3] : memref<192x32xbf16, #tpu.memory_space<vmem>>, vector<192x32xbf16>
    %cst = arith.constant dense<0.000000e+00> : vector<8x32xf32>
    %4 = tpu.matmul %2, %3, %cst {dimension_numbers = #tpu.dot_dimension_numbers<[1], [0], [0], [1], [0, 0, 1, 1], [], []>} : vector<8x192xbf16>, vector<192x32xbf16>, vector<8x32xf32> -> vector<8x32xf32>
    %5 = vector.shape_cast %4 : vector<8x32xf32> to vector<2x4x32xf32>
    %c0_4 = arith.constant 0 : index
    %c0_5 = arith.constant 0 : index
    %6 = vector.load %arg5[%c0_4, %c0_5] : memref<4x32xf32, #tpu.memory_space<vmem>>, vector<4x32xf32>
    %7 = vector.shape_cast %6 : vector<4x32xf32> to vector<1x4x32xf32>
    %8 = vector.broadcast %7 : vector<1x4x32xf32> to vector<2x4x32xf32>
    %9 = arith.addf %5, %8 : vector<2x4x32xf32>
    %c0_6 = arith.constant 0 : index
    %c0_7 = arith.constant 0 : index
    %10 = vector.load %arg3[%c0_6, %c0_7] : memref<1x32xf32, #tpu.memory_space<vmem>>, vector<1x32xf32>
    %c0_8 = arith.constant 0 : index
    %c0_9 = arith.constant 0 : index
    %11 = vector.load %arg4[%c0_8, %c0_9] : memref<1x32xf32, #tpu.memory_space<vmem>>, vector<1x32xf32>
    %12 = arith.addf %10, %11 : vector<1x32xf32>
    %13 = vector.shape_cast %12 : vector<1x32xf32> to vector<1x1x32xf32>
    %cst_10 = arith.constant 0.000000e+00 : f32
    %14 = vector.broadcast %cst_10 : f32 to vector<2x1x32xf32>
    %15 = vector.broadcast %13 : vector<1x1x32xf32> to vector<2x1x32xf32>
    %16 = arith.addf %15, %14 : vector<2x1x32xf32>
    %17 = tpu.concatenate %16, %9 in 1 : vector<2x1x32xf32>, vector<2x4x32xf32> -> vector<2x5x32xf32>
    %c0_11 = arith.constant 0 : index
    %c0_12 = arith.constant 0 : index
    %18 = vector.load %arg6[%c0_11, %c0_12] : memref<1x32xf32, #tpu.memory_space<vmem>>, vector<1x32xf32>
    %c0_13 = arith.constant 0 : index
    %c0_14 = arith.constant 0 : index
    %19 = vector.load %arg7[%c0_13, %c0_14] : memref<1x32xf32, #tpu.memory_space<vmem>>, vector<1x32xf32>
    %cst_15 = arith.constant dense<0.000000e+00> : vector<2x5xf32>
    %20 = vector.multi_reduction <add>, %17, %cst_15 [2] : vector<2x5x32xf32> to vector<2x5xf32>
    %21 = vector.shape_cast %20 : vector<2x5xf32> to vector<2x5x1xf32>
    %cst_16 = arith.constant 3.200000e+01 : f32
    %22 = vector.broadcast %cst_16 : f32 to vector<2x5x1xf32>
    %23 = arith.divf %21, %22 : vector<2x5x1xf32>
    %24 = vector.broadcast %23 : vector<2x5x1xf32> to vector<2x5x32xf32>
    %25 = arith.subf %17, %24 : vector<2x5x32xf32>
    %26 = arith.mulf %25, %25 : vector<2x5x32xf32>
    %cst_17 = arith.constant dense<0.000000e+00> : vector<2x5xf32>
    %27 = vector.multi_reduction <add>, %26, %cst_17 [2] : vector<2x5x32xf32> to vector<2x5xf32>
    %28 = vector.shape_cast %27 : vector<2x5xf32> to vector<2x5x1xf32>
    %cst_18 = arith.constant 3.200000e+01 : f32
    %29 = vector.broadcast %cst_18 : f32 to vector<2x5x1xf32>
    %30 = arith.divf %28, %29 : vector<2x5x1xf32>
    %31 = vector.broadcast %23 : vector<2x5x1xf32> to vector<2x5x32xf32>
    %32 = arith.subf %17, %31 : vector<2x5x32xf32>
    %cst_19 = arith.constant 9.99999974E-6 : f32
    %33 = vector.broadcast %cst_19 : f32 to vector<2x5x1xf32>
    %34 = arith.addf %30, %33 : vector<2x5x1xf32>
    %35 = math.rsqrt %34 : vector<2x5x1xf32>
    %36 = vector.broadcast %35 : vector<2x5x1xf32> to vector<2x5x32xf32>
    %37 = arith.mulf %32, %36 : vector<2x5x32xf32>
    %38 = vector.shape_cast %18 : vector<1x32xf32> to vector<1x1x32xf32>
    %39 = vector.broadcast %38 : vector<1x1x32xf32> to vector<2x5x32xf32>
    %40 = arith.mulf %37, %39 : vector<2x5x32xf32>
    %41 = vector.shape_cast %19 : vector<1x32xf32> to vector<1x1x32xf32>
    %42 = vector.broadcast %41 : vector<1x1x32xf32> to vector<2x5x32xf32>
    %43 = arith.addf %40, %42 : vector<2x5x32xf32>
    %44 = arith.truncf %43 : vector<2x5x32xf32> to vector<2x5x32xbf16>
    %c0_20 = arith.constant 0 : index
    %c0_21 = arith.constant 0 : index
    %c0_22 = arith.constant 0 : index
    %45 = vector.load %arg8[%c0_20, %c0_21, %c0_22] : memref<2x5x32xbf16, #tpu.memory_space<vmem>>, vector<2x5x32xbf16>
    tpu.vector_store %arg8[%c0_20, %c0_21, %c0_22], %44 {strides = array<i32>} : memref<2x5x32xbf16, #tpu.memory_space<vmem>>, vector<2x5x32xbf16>,
    return
  }
  func.func @transform_0(%arg0: i32) -> (i32, i32, i32) {
    %c0_i32 = arith.constant 0 : i32
    %c0_i32_0 = arith.constant 0 : i32
    %c0_i32_1 = arith.constant 0 : i32
    return %arg0, %c0_i32, %c0_i32_0 : i32, i32, i32
  }
  func.func @transform_1(%arg0: i32) -> (i32, i32) {
    %c0_i32 = arith.constant 0 : i32
    %c0_i32_0 = arith.constant 0 : i32
    %c0_i32_1 = arith.constant 0 : i32
    return %c0_i32, %c0_i32_0 : i32, i32
  }
  func.func @transform_2(%arg0: i32) -> (i32, i32) {
    %c0_i32 = arith.constant 0 : i32
    %c0_i32_0 = arith.constant 0 : i32
    %c0_i32_1 = arith.constant 0 : i32
    return %c0_i32, %c0_i32_0 : i32, i32
  }
  func.func @transform_3(%arg0: i32) -> (i32, i32) {
    %c0_i32 = arith.constant 0 : i32
    %c0_i32_0 = arith.constant 0 : i32
    %c0_i32_1 = arith.constant 0 : i32
    return %c0_i32, %c0_i32_0 : i32, i32
  }
  func.func @transform_4(%arg0: i32) -> (i32, i32) {
    %c0_i32 = arith.constant 0 : i32
    %c0_i32_0 = arith.constant 0 : i32
    %c0_i32_1 = arith.constant 0 : i32
    return %c0_i32, %c0_i32_0 : i32, i32
  }
  func.func @transform_5(%arg0: i32) -> (i32, i32) {
    %c0_i32 = arith.constant 0 : i32
    %c0_i32_0 = arith.constant 0 : i32
    %c0_i32_1 = arith.constant 0 : i32
    return %c0_i32, %c0_i32_0 : i32, i32
  }
  func.func @transform_6(%arg0: i32) -> (i32, i32) {
    %c0_i32 = arith.constant 0 : i32
    %c0_i32_0 = arith.constant 0 : i32
    %c0_i32_1 = arith.constant 0 : i32
    return %c0_i32, %c0_i32_0 : i32, i32
  }
  func.func @transform_7(%arg0: i32) -> (i32, i32, i32) {
    %c0_i32 = arith.constant 0 : i32
    %c0_i32_0 = arith.constant 0 : i32
    %c0_i32_1 = arith.constant 0 : i32
    return %arg0, %c0_i32, %c0_i32_0 : i32, i32, i32
  }
}

module attributes {stable_mosaic.version = 11 : i64} {
  func.func @_block_kernel(%arg0: i32, %arg1: memref<2x5x32xbf16, #tpu.memory_space<vmem>>, %arg2: memref<1x32xf32, #tpu.memory_space<vmem>>, %arg3: memref<1x32xf32, #tpu.memory_space<vmem>>, %arg4: memref<32x96xbf16, #tpu.memory_space<vmem>>, %arg5: memref<1x96xf32, #tpu.memory_space<vmem>>, %arg6: memref<32x32xbf16, #tpu.memory_space<vmem>>, %arg7: memref<1x32xf32, #tpu.memory_space<vmem>>, %arg8: memref<1x32xf32, #tpu.memory_space<vmem>>, %arg9: memref<1x32xf32, #tpu.memory_space<vmem>>, %arg10: memref<32x128xbf16, #tpu.memory_space<vmem>>, %arg11: memref<1x128xf32, #tpu.memory_space<vmem>>, %arg12: memref<128x32xbf16, #tpu.memory_space<vmem>>, %arg13: memref<1x32xf32, #tpu.memory_space<vmem>>, %arg14: memref<2x5x32xbf16, #tpu.memory_space<vmem>>) attributes {dimension_semantics = [#tpu.dimension_semantics<parallel>], iteration_bounds = array<i64: 2>, scalar_prefetch = 0 : i64, scratch_operands = 0 : i64, tpu.core_type = #tpu.core_type<tc>, window_params = [{transform_indices = @transform_0, window_bounds = array<i64: 2, 5, 32>}, {pipeline_mode = #tpu.pipeline_mode<synchronous>, transform_indices = @transform_1, window_bounds = array<i64: 1, 32>}, {pipeline_mode = #tpu.pipeline_mode<synchronous>, transform_indices = @transform_2, window_bounds = array<i64: 1, 32>}, {pipeline_mode = #tpu.pipeline_mode<synchronous>, transform_indices = @transform_3, window_bounds = array<i64: 32, 96>}, {pipeline_mode = #tpu.pipeline_mode<synchronous>, transform_indices = @transform_4, window_bounds = array<i64: 1, 96>}, {pipeline_mode = #tpu.pipeline_mode<synchronous>, transform_indices = @transform_5, window_bounds = array<i64: 32, 32>}, {pipeline_mode = #tpu.pipeline_mode<synchronous>, transform_indices = @transform_6, window_bounds = array<i64: 1, 32>}, {pipeline_mode = #tpu.pipeline_mode<synchronous>, transform_indices = @transform_7, window_bounds = array<i64: 1, 32>}, {pipeline_mode = #tpu.pipeline_mode<synchronous>, transform_indices = @transform_8, window_bounds = array<i64: 1, 32>}, {pipeline_mode = #tpu.pipeline_mode<synchronous>, transform_indices = @transform_9, window_bounds = array<i64: 32, 128>}, {pipeline_mode = #tpu.pipeline_mode<synchronous>, transform_indices = @transform_10, window_bounds = array<i64: 1, 128>}, {pipeline_mode = #tpu.pipeline_mode<synchronous>, transform_indices = @transform_11, window_bounds = array<i64: 128, 32>}, {pipeline_mode = #tpu.pipeline_mode<synchronous>, transform_indices = @transform_12, window_bounds = array<i64: 1, 32>}, {transform_indices = @transform_13, window_bounds = array<i64: 2, 5, 32>}]} {
    %c0 = arith.constant 0 : index
    %c0_0 = arith.constant 0 : index
    %c0_1 = arith.constant 0 : index
    %0 = vector.load %arg1[%c0, %c0_0, %c0_1] : memref<2x5x32xbf16, #tpu.memory_space<vmem>>, vector<2x5x32xbf16>
    %1 = arith.extf %0 : vector<2x5x32xbf16> to vector<2x5x32xf32>
    %2 = vector.shape_cast %1 : vector<2x5x32xf32> to vector<10x32xf32>
    %c0_2 = arith.constant 0 : index
    %c0_3 = arith.constant 0 : index
    %3 = vector.load %arg2[%c0_2, %c0_3] : memref<1x32xf32, #tpu.memory_space<vmem>>, vector<1x32xf32>
    %c0_4 = arith.constant 0 : index
    %c0_5 = arith.constant 0 : index
    %4 = vector.load %arg3[%c0_4, %c0_5] : memref<1x32xf32, #tpu.memory_space<vmem>>, vector<1x32xf32>
    %cst = arith.constant dense<0.000000e+00> : vector<10xf32>
    %5 = vector.multi_reduction <add>, %2, %cst [1] : vector<10x32xf32> to vector<10xf32>
    %6 = vector.shape_cast %5 : vector<10xf32> to vector<10x1xf32>
    %cst_6 = arith.constant 3.200000e+01 : f32
    %7 = vector.broadcast %cst_6 : f32 to vector<10x1xf32>
    %8 = arith.divf %6, %7 : vector<10x1xf32>
    %9 = vector.broadcast %8 : vector<10x1xf32> to vector<10x32xf32>
    %10 = arith.subf %2, %9 : vector<10x32xf32>
    %11 = arith.mulf %10, %10 : vector<10x32xf32>
    %cst_7 = arith.constant dense<0.000000e+00> : vector<10xf32>
    %12 = vector.multi_reduction <add>, %11, %cst_7 [1] : vector<10x32xf32> to vector<10xf32>
    %13 = vector.shape_cast %12 : vector<10xf32> to vector<10x1xf32>
    %cst_8 = arith.constant 3.200000e+01 : f32
    %14 = vector.broadcast %cst_8 : f32 to vector<10x1xf32>
    %15 = arith.divf %13, %14 : vector<10x1xf32>
    %16 = vector.broadcast %8 : vector<10x1xf32> to vector<10x32xf32>
    %17 = arith.subf %2, %16 : vector<10x32xf32>
    %cst_9 = arith.constant 9.99999974E-6 : f32
    %18 = vector.broadcast %cst_9 : f32 to vector<10x1xf32>
    %19 = arith.addf %15, %18 : vector<10x1xf32>
    %20 = math.rsqrt %19 : vector<10x1xf32>
    %21 = vector.broadcast %20 : vector<10x1xf32> to vector<10x32xf32>
    %22 = arith.mulf %17, %21 : vector<10x32xf32>
    %23 = vector.broadcast %3 : vector<1x32xf32> to vector<10x32xf32>
    %24 = arith.mulf %22, %23 : vector<10x32xf32>
    %25 = vector.broadcast %4 : vector<1x32xf32> to vector<10x32xf32>
    %26 = arith.addf %24, %25 : vector<10x32xf32>
    %27 = arith.truncf %26 : vector<10x32xf32> to vector<10x32xbf16>
    %c0_10 = arith.constant 0 : index
    %c0_11 = arith.constant 0 : index
    %28 = vector.load %arg4[%c0_10, %c0_11] : memref<32x96xbf16, #tpu.memory_space<vmem>>, vector<32x96xbf16>
    %cst_12 = arith.constant dense<0.000000e+00> : vector<10x96xf32>
    %29 = tpu.matmul %27, %28, %cst_12 {dimension_numbers = #tpu.dot_dimension_numbers<[1], [0], [0], [1], [0, 0, 1, 1], [], []>} : vector<10x32xbf16>, vector<32x96xbf16>, vector<10x96xf32> -> vector<10x96xf32>
    %c0_13 = arith.constant 0 : index
    %c0_14 = arith.constant 0 : index
    %30 = vector.load %arg5[%c0_13, %c0_14] : memref<1x96xf32, #tpu.memory_space<vmem>>, vector<1x96xf32>
    %31 = vector.broadcast %30 : vector<1x96xf32> to vector<10x96xf32>
    %32 = arith.addf %29, %31 : vector<10x96xf32>
    %33 = arith.truncf %32 : vector<10x96xf32> to vector<10x96xbf16>
    %34 = vector.extract_strided_slice %33 {offsets = [0, 0], sizes = [10, 8], strides = [1, 1]} : vector<10x96xbf16> to vector<10x8xbf16>
    %35 = vector.shape_cast %34 : vector<10x8xbf16> to vector<2x5x8xbf16>
    %36 = vector.extract_strided_slice %33 {offsets = [0, 32], sizes = [10, 8], strides = [1, 1]} : vector<10x96xbf16> to vector<10x8xbf16>
    %37 = vector.shape_cast %36 : vector<10x8xbf16> to vector<2x5x8xbf16>
    %38 = vector.extract_strided_slice %33 {offsets = [0, 64], sizes = [10, 8], strides = [1, 1]} : vector<10x96xbf16> to vector<10x8xbf16>
    %39 = vector.shape_cast %38 : vector<10x8xbf16> to vector<2x5x8xbf16>
    "tpu.trace_start"() <{level = 10 : i32, message = "bqd,bkd->bqk"}> : () -> ()
    %cst_15 = arith.constant dense<0.000000e+00> : vector<2x5x5xf32>
    %40 = tpu.matmul %35, %37, %cst_15 {dimension_numbers = #tpu.dot_dimension_numbers<[2], [2], [1], [1], [0, 0, 0, 1, 1, 1], [0], [0]>} : vector<2x5x8xbf16>, vector<2x5x8xbf16>, vector<2x5x5xf32> -> vector<2x5x5xf32>
    "tpu.trace_stop"() : () -> ()
    %cst_16 = arith.constant 0.353553385 : f32
    %41 = vector.broadcast %cst_16 : f32 to vector<2x5x5xf32>
    %42 = arith.mulf %40, %41 : vector<2x5x5xf32>
    %cst_17 = arith.constant dense<0xFF800000> : vector<2x5xf32>
    %43 = vector.multi_reduction <maximumf>, %42, %cst_17 [2] : vector<2x5x5xf32> to vector<2x5xf32>
    %44 = vector.shape_cast %43 : vector<2x5xf32> to vector<2x5x1xf32>
    %45 = vector.broadcast %44 : vector<2x5x1xf32> to vector<2x5x5xf32>
    %46 = arith.subf %42, %45 : vector<2x5x5xf32>
    %47 = math.exp %46 : vector<2x5x5xf32>
    %cst_18 = arith.constant dense<0.000000e+00> : vector<2x5xf32>
    %48 = vector.multi_reduction <add>, %47, %cst_18 [2] : vector<2x5x5xf32> to vector<2x5xf32>
    %49 = vector.shape_cast %48 : vector<2x5xf32> to vector<2x5x1xf32>
    %50 = tpu.reciprocal %49 : vector<2x5x1xf32> -> vector<2x5x1xf32>
    %51 = vector.broadcast %50 : vector<2x5x1xf32> to vector<2x5x5xf32>
    %52 = arith.mulf %47, %51 : vector<2x5x5xf32>
    %53 = arith.truncf %52 : vector<2x5x5xf32> to vector<2x5x5xbf16>
    "tpu.trace_start"() <{level = 10 : i32, message = "bqk,bkd->bqd"}> : () -> ()
    %cst_19 = arith.constant dense<0.000000e+00> : vector<2x5x8xf32>
    %54 = tpu.matmul %53, %39, %cst_19 {dimension_numbers = #tpu.dot_dimension_numbers<[2], [1], [1], [2], [0, 0, 0, 1, 1, 2], [0], [0]>} : vector<2x5x5xbf16>, vector<2x5x8xbf16>, vector<2x5x8xf32> -> vector<2x5x8xf32>
    "tpu.trace_stop"() : () -> ()
    %55 = arith.truncf %54 : vector<2x5x8xf32> to vector<2x5x8xbf16>
    %56 = vector.extract_strided_slice %33 {offsets = [0, 8], sizes = [10, 8], strides = [1, 1]} : vector<10x96xbf16> to vector<10x8xbf16>
    %57 = vector.shape_cast %56 : vector<10x8xbf16> to vector<2x5x8xbf16>
    %58 = vector.extract_strided_slice %33 {offsets = [0, 40], sizes = [10, 8], strides = [1, 1]} : vector<10x96xbf16> to vector<10x8xbf16>
    %59 = vector.shape_cast %58 : vector<10x8xbf16> to vector<2x5x8xbf16>
    %60 = vector.extract_strided_slice %33 {offsets = [0, 72], sizes = [10, 8], strides = [1, 1]} : vector<10x96xbf16> to vector<10x8xbf16>
    %61 = vector.shape_cast %60 : vector<10x8xbf16> to vector<2x5x8xbf16>
    "tpu.trace_start"() <{level = 10 : i32, message = "bqd,bkd->bqk"}> : () -> ()
    %cst_20 = arith.constant dense<0.000000e+00> : vector<2x5x5xf32>
    %62 = tpu.matmul %57, %59, %cst_20 {dimension_numbers = #tpu.dot_dimension_numbers<[2], [2], [1], [1], [0, 0, 0, 1, 1, 1], [0], [0]>} : vector<2x5x8xbf16>, vector<2x5x8xbf16>, vector<2x5x5xf32> -> vector<2x5x5xf32>
    "tpu.trace_stop"() : () -> ()
    %cst_21 = arith.constant 0.353553385 : f32
    %63 = vector.broadcast %cst_21 : f32 to vector<2x5x5xf32>
    %64 = arith.mulf %62, %63 : vector<2x5x5xf32>
    %cst_22 = arith.constant dense<0xFF800000> : vector<2x5xf32>
    %65 = vector.multi_reduction <maximumf>, %64, %cst_22 [2] : vector<2x5x5xf32> to vector<2x5xf32>
    %66 = vector.shape_cast %65 : vector<2x5xf32> to vector<2x5x1xf32>
    %67 = vector.broadcast %66 : vector<2x5x1xf32> to vector<2x5x5xf32>
    %68 = arith.subf %64, %67 : vector<2x5x5xf32>
    %69 = math.exp %68 : vector<2x5x5xf32>
    %cst_23 = arith.constant dense<0.000000e+00> : vector<2x5xf32>
    %70 = vector.multi_reduction <add>, %69, %cst_23 [2] : vector<2x5x5xf32> to vector<2x5xf32>
    %71 = vector.shape_cast %70 : vector<2x5xf32> to vector<2x5x1xf32>
    %72 = tpu.reciprocal %71 : vector<2x5x1xf32> -> vector<2x5x1xf32>
    %73 = vector.broadcast %72 : vector<2x5x1xf32> to vector<2x5x5xf32>
    %74 = arith.mulf %69, %73 : vector<2x5x5xf32>
    %75 = arith.truncf %74 : vector<2x5x5xf32> to vector<2x5x5xbf16>
    "tpu.trace_start"() <{level = 10 : i32, message = "bqk,bkd->bqd"}> : () -> ()
    %cst_24 = arith.constant dense<0.000000e+00> : vector<2x5x8xf32>
    %76 = tpu.matmul %75, %61, %cst_24 {dimension_numbers = #tpu.dot_dimension_numbers<[2], [1], [1], [2], [0, 0, 0, 1, 1, 2], [0], [0]>} : vector<2x5x5xbf16>, vector<2x5x8xbf16>, vector<2x5x8xf32> -> vector<2x5x8xf32>
    "tpu.trace_stop"() : () -> ()
    %77 = arith.truncf %76 : vector<2x5x8xf32> to vector<2x5x8xbf16>
    %78 = vector.extract_strided_slice %33 {offsets = [0, 16], sizes = [10, 8], strides = [1, 1]} : vector<10x96xbf16> to vector<10x8xbf16>
    %79 = vector.shape_cast %78 : vector<10x8xbf16> to vector<2x5x8xbf16>
    %80 = vector.extract_strided_slice %33 {offsets = [0, 48], sizes = [10, 8], strides = [1, 1]} : vector<10x96xbf16> to vector<10x8xbf16>
    %81 = vector.shape_cast %80 : vector<10x8xbf16> to vector<2x5x8xbf16>
    %82 = vector.extract_strided_slice %33 {offsets = [0, 80], sizes = [10, 8], strides = [1, 1]} : vector<10x96xbf16> to vector<10x8xbf16>
    %83 = vector.shape_cast %82 : vector<10x8xbf16> to vector<2x5x8xbf16>
    "tpu.trace_start"() <{level = 10 : i32, message = "bqd,bkd->bqk"}> : () -> ()
    %cst_25 = arith.constant dense<0.000000e+00> : vector<2x5x5xf32>
    %84 = tpu.matmul %79, %81, %cst_25 {dimension_numbers = #tpu.dot_dimension_numbers<[2], [2], [1], [1], [0, 0, 0, 1, 1, 1], [0], [0]>} : vector<2x5x8xbf16>, vector<2x5x8xbf16>, vector<2x5x5xf32> -> vector<2x5x5xf32>
    "tpu.trace_stop"() : () -> ()
    %cst_26 = arith.constant 0.353553385 : f32
    %85 = vector.broadcast %cst_26 : f32 to vector<2x5x5xf32>
    %86 = arith.mulf %84, %85 : vector<2x5x5xf32>
    %cst_27 = arith.constant dense<0xFF800000> : vector<2x5xf32>
    %87 = vector.multi_reduction <maximumf>, %86, %cst_27 [2] : vector<2x5x5xf32> to vector<2x5xf32>
    %88 = vector.shape_cast %87 : vector<2x5xf32> to vector<2x5x1xf32>
    %89 = vector.broadcast %88 : vector<2x5x1xf32> to vector<2x5x5xf32>
    %90 = arith.subf %86, %89 : vector<2x5x5xf32>
    %91 = math.exp %90 : vector<2x5x5xf32>
    %cst_28 = arith.constant dense<0.000000e+00> : vector<2x5xf32>
    %92 = vector.multi_reduction <add>, %91, %cst_28 [2] : vector<2x5x5xf32> to vector<2x5xf32>
    %93 = vector.shape_cast %92 : vector<2x5xf32> to vector<2x5x1xf32>
    %94 = tpu.reciprocal %93 : vector<2x5x1xf32> -> vector<2x5x1xf32>
    %95 = vector.broadcast %94 : vector<2x5x1xf32> to vector<2x5x5xf32>
    %96 = arith.mulf %91, %95 : vector<2x5x5xf32>
    %97 = arith.truncf %96 : vector<2x5x5xf32> to vector<2x5x5xbf16>
    "tpu.trace_start"() <{level = 10 : i32, message = "bqk,bkd->bqd"}> : () -> ()
    %cst_29 = arith.constant dense<0.000000e+00> : vector<2x5x8xf32>
    %98 = tpu.matmul %97, %83, %cst_29 {dimension_numbers = #tpu.dot_dimension_numbers<[2], [1], [1], [2], [0, 0, 0, 1, 1, 2], [0], [0]>} : vector<2x5x5xbf16>, vector<2x5x8xbf16>, vector<2x5x8xf32> -> vector<2x5x8xf32>
    "tpu.trace_stop"() : () -> ()
    %99 = arith.truncf %98 : vector<2x5x8xf32> to vector<2x5x8xbf16>
    %100 = vector.extract_strided_slice %33 {offsets = [0, 24], sizes = [10, 8], strides = [1, 1]} : vector<10x96xbf16> to vector<10x8xbf16>
    %101 = vector.shape_cast %100 : vector<10x8xbf16> to vector<2x5x8xbf16>
    %102 = vector.extract_strided_slice %33 {offsets = [0, 56], sizes = [10, 8], strides = [1, 1]} : vector<10x96xbf16> to vector<10x8xbf16>
    %103 = vector.shape_cast %102 : vector<10x8xbf16> to vector<2x5x8xbf16>
    %104 = vector.extract_strided_slice %33 {offsets = [0, 88], sizes = [10, 8], strides = [1, 1]} : vector<10x96xbf16> to vector<10x8xbf16>
    %105 = vector.shape_cast %104 : vector<10x8xbf16> to vector<2x5x8xbf16>
    "tpu.trace_start"() <{level = 10 : i32, message = "bqd,bkd->bqk"}> : () -> ()
    %cst_30 = arith.constant dense<0.000000e+00> : vector<2x5x5xf32>
    %106 = tpu.matmul %101, %103, %cst_30 {dimension_numbers = #tpu.dot_dimension_numbers<[2], [2], [1], [1], [0, 0, 0, 1, 1, 1], [0], [0]>} : vector<2x5x8xbf16>, vector<2x5x8xbf16>, vector<2x5x5xf32> -> vector<2x5x5xf32>
    "tpu.trace_stop"() : () -> ()
    %cst_31 = arith.constant 0.353553385 : f32
    %107 = vector.broadcast %cst_31 : f32 to vector<2x5x5xf32>
    %108 = arith.mulf %106, %107 : vector<2x5x5xf32>
    %cst_32 = arith.constant dense<0xFF800000> : vector<2x5xf32>
    %109 = vector.multi_reduction <maximumf>, %108, %cst_32 [2] : vector<2x5x5xf32> to vector<2x5xf32>
    %110 = vector.shape_cast %109 : vector<2x5xf32> to vector<2x5x1xf32>
    %111 = vector.broadcast %110 : vector<2x5x1xf32> to vector<2x5x5xf32>
    %112 = arith.subf %108, %111 : vector<2x5x5xf32>
    %113 = math.exp %112 : vector<2x5x5xf32>
    %cst_33 = arith.constant dense<0.000000e+00> : vector<2x5xf32>
    %114 = vector.multi_reduction <add>, %113, %cst_33 [2] : vector<2x5x5xf32> to vector<2x5xf32>
    %115 = vector.shape_cast %114 : vector<2x5xf32> to vector<2x5x1xf32>
    %116 = tpu.reciprocal %115 : vector<2x5x1xf32> -> vector<2x5x1xf32>
    %117 = vector.broadcast %116 : vector<2x5x1xf32> to vector<2x5x5xf32>
    %118 = arith.mulf %113, %117 : vector<2x5x5xf32>
    %119 = arith.truncf %118 : vector<2x5x5xf32> to vector<2x5x5xbf16>
    "tpu.trace_start"() <{level = 10 : i32, message = "bqk,bkd->bqd"}> : () -> ()
    %cst_34 = arith.constant dense<0.000000e+00> : vector<2x5x8xf32>
    %120 = tpu.matmul %119, %105, %cst_34 {dimension_numbers = #tpu.dot_dimension_numbers<[2], [1], [1], [2], [0, 0, 0, 1, 1, 2], [0], [0]>} : vector<2x5x5xbf16>, vector<2x5x8xbf16>, vector<2x5x8xf32> -> vector<2x5x8xf32>
    "tpu.trace_stop"() : () -> ()
    %121 = arith.truncf %120 : vector<2x5x8xf32> to vector<2x5x8xbf16>
    %122 = tpu.concatenate %55, %77, %99, %121 in 2 : vector<2x5x8xbf16>, vector<2x5x8xbf16>, vector<2x5x8xbf16>, vector<2x5x8xbf16> -> vector<2x5x32xbf16>
    %123 = vector.shape_cast %122 : vector<2x5x32xbf16> to vector<10x32xbf16>
    %c0_35 = arith.constant 0 : index
    %c0_36 = arith.constant 0 : index
    %124 = vector.load %arg6[%c0_35, %c0_36] : memref<32x32xbf16, #tpu.memory_space<vmem>>, vector<32x32xbf16>
    %cst_37 = arith.constant dense<0.000000e+00> : vector<10x32xf32>
    %125 = tpu.matmul %123, %124, %cst_37 {dimension_numbers = #tpu.dot_dimension_numbers<[1], [0], [0], [1], [0, 0, 1, 1], [], []>} : vector<10x32xbf16>, vector<32x32xbf16>, vector<10x32xf32> -> vector<10x32xf32>
    %c0_38 = arith.constant 0 : index
    %c0_39 = arith.constant 0 : index
    %126 = vector.load %arg7[%c0_38, %c0_39] : memref<1x32xf32, #tpu.memory_space<vmem>>, vector<1x32xf32>
    %127 = vector.broadcast %126 : vector<1x32xf32> to vector<10x32xf32>
    %128 = arith.addf %125, %127 : vector<10x32xf32>
    %129 = arith.addf %2, %128 : vector<10x32xf32>
    %c0_40 = arith.constant 0 : index
    %c0_41 = arith.constant 0 : index
    %130 = vector.load %arg8[%c0_40, %c0_41] : memref<1x32xf32, #tpu.memory_space<vmem>>, vector<1x32xf32>
    %c0_42 = arith.constant 0 : index
    %c0_43 = arith.constant 0 : index
    %131 = vector.load %arg9[%c0_42, %c0_43] : memref<1x32xf32, #tpu.memory_space<vmem>>, vector<1x32xf32>
    %cst_44 = arith.constant dense<0.000000e+00> : vector<10xf32>
    %132 = vector.multi_reduction <add>, %129, %cst_44 [1] : vector<10x32xf32> to vector<10xf32>
    %133 = vector.shape_cast %132 : vector<10xf32> to vector<10x1xf32>
    %cst_45 = arith.constant 3.200000e+01 : f32
    %134 = vector.broadcast %cst_45 : f32 to vector<10x1xf32>
    %135 = arith.divf %133, %134 : vector<10x1xf32>
    %136 = vector.broadcast %135 : vector<10x1xf32> to vector<10x32xf32>
    %137 = arith.subf %129, %136 : vector<10x32xf32>
    %138 = arith.mulf %137, %137 : vector<10x32xf32>
    %cst_46 = arith.constant dense<0.000000e+00> : vector<10xf32>
    %139 = vector.multi_reduction <add>, %138, %cst_46 [1] : vector<10x32xf32> to vector<10xf32>
    %140 = vector.shape_cast %139 : vector<10xf32> to vector<10x1xf32>
    %cst_47 = arith.constant 3.200000e+01 : f32
    %141 = vector.broadcast %cst_47 : f32 to vector<10x1xf32>
    %142 = arith.divf %140, %141 : vector<10x1xf32>
    %143 = vector.broadcast %135 : vector<10x1xf32> to vector<10x32xf32>
    %144 = arith.subf %129, %143 : vector<10x32xf32>
    %cst_48 = arith.constant 9.99999974E-6 : f32
    %145 = vector.broadcast %cst_48 : f32 to vector<10x1xf32>
    %146 = arith.addf %142, %145 : vector<10x1xf32>
    %147 = math.rsqrt %146 : vector<10x1xf32>
    %148 = vector.broadcast %147 : vector<10x1xf32> to vector<10x32xf32>
    %149 = arith.mulf %144, %148 : vector<10x32xf32>
    %150 = vector.broadcast %130 : vector<1x32xf32> to vector<10x32xf32>
    %151 = arith.mulf %149, %150 : vector<10x32xf32>
    %152 = vector.broadcast %131 : vector<1x32xf32> to vector<10x32xf32>
    %153 = arith.addf %151, %152 : vector<10x32xf32>
    %154 = arith.truncf %153 : vector<10x32xf32> to vector<10x32xbf16>
    %c0_49 = arith.constant 0 : index
    %c0_50 = arith.constant 0 : index
    %155 = vector.load %arg10[%c0_49, %c0_50] : memref<32x128xbf16, #tpu.memory_space<vmem>>, vector<32x128xbf16>
    %cst_51 = arith.constant dense<0.000000e+00> : vector<10x128xf32>
    %156 = tpu.matmul %154, %155, %cst_51 {dimension_numbers = #tpu.dot_dimension_numbers<[1], [0], [0], [1], [0, 0, 1, 1], [], []>} : vector<10x32xbf16>, vector<32x128xbf16>, vector<10x128xf32> -> vector<10x128xf32>
    %c0_52 = arith.constant 0 : index
    %c0_53 = arith.constant 0 : index
    %157 = vector.load %arg11[%c0_52, %c0_53] : memref<1x128xf32, #tpu.memory_space<vmem>>, vector<1x128xf32>
    %158 = vector.broadcast %157 : vector<1x128xf32> to vector<10x128xf32>
    %159 = arith.addf %156, %158 : vector<10x128xf32>
    %cst_54 = arith.constant 1.702000e+00 : f32
    %160 = vector.broadcast %cst_54 : f32 to vector<10x128xf32>
    %161 = arith.mulf %160, %159 : vector<10x128xf32>
    %162 = arith.negf %161 : vector<10x128xf32>
    %163 = math.exp %162 : vector<10x128xf32>
    %cst_55 = arith.constant 1.000000e+00 : f32
    %164 = vector.broadcast %cst_55 : f32 to vector<10x128xf32>
    %165 = arith.addf %164, %163 : vector<10x128xf32>
    %166 = arith.divf %164, %165 : vector<10x128xf32>
    %167 = arith.mulf %159, %166 : vector<10x128xf32>
    %168 = arith.truncf %167 : vector<10x128xf32> to vector<10x128xbf16>
    %c0_56 = arith.constant 0 : index
    %c0_57 = arith.constant 0 : index
    %169 = vector.load %arg12[%c0_56, %c0_57] : memref<128x32xbf16, #tpu.memory_space<vmem>>, vector<128x32xbf16>
    %cst_58 = arith.constant dense<0.000000e+00> : vector<10x32xf32>
    %170 = tpu.matmul %168, %169, %cst_58 {dimension_numbers = #tpu.dot_dimension_numbers<[1], [0], [0], [1], [0, 0, 1, 1], [], []>} : vector<10x128xbf16>, vector<128x32xbf16>, vector<10x32xf32> -> vector<10x32xf32>
    %c0_59 = arith.constant 0 : index
    %c0_60 = arith.constant 0 : index
    %171 = vector.load %arg13[%c0_59, %c0_60] : memref<1x32xf32, #tpu.memory_space<vmem>>, vector<1x32xf32>
    %172 = vector.broadcast %171 : vector<1x32xf32> to vector<10x32xf32>
    %173 = arith.addf %170, %172 : vector<10x32xf32>
    %174 = arith.addf %129, %173 : vector<10x32xf32>
    %175 = vector.shape_cast %174 : vector<10x32xf32> to vector<2x5x32xf32>
    %176 = arith.truncf %175 : vector<2x5x32xf32> to vector<2x5x32xbf16>
    %c0_61 = arith.constant 0 : index
    %c0_62 = arith.constant 0 : index
    %c0_63 = arith.constant 0 : index
    %177 = vector.load %arg14[%c0_61, %c0_62, %c0_63] : memref<2x5x32xbf16, #tpu.memory_space<vmem>>, vector<2x5x32xbf16>
    tpu.vector_store %arg14[%c0_61, %c0_62, %c0_63], %176 {strides = array<i32>} : memref<2x5x32xbf16, #tpu.memory_space<vmem>>, vector<2x5x32xbf16>,
    return
  }
  func.func @transform_0(%arg0: i32) -> (i32, i32, i32) {
    %c0_i32 = arith.constant 0 : i32
    %c0_i32_0 = arith.constant 0 : i32
    %c0_i32_1 = arith.constant 0 : i32
    return %arg0, %c0_i32, %c0_i32_0 : i32, i32, i32
  }
  func.func @transform_1(%arg0: i32) -> (i32, i32) {
    %c0_i32 = arith.constant 0 : i32
    %c0_i32_0 = arith.constant 0 : i32
    %c0_i32_1 = arith.constant 0 : i32
    return %c0_i32, %c0_i32_0 : i32, i32
  }
  func.func @transform_2(%arg0: i32) -> (i32, i32) {
    %c0_i32 = arith.constant 0 : i32
    %c0_i32_0 = arith.constant 0 : i32
    %c0_i32_1 = arith.constant 0 : i32
    return %c0_i32, %c0_i32_0 : i32, i32
  }
  func.func @transform_3(%arg0: i32) -> (i32, i32) {
    %c0_i32 = arith.constant 0 : i32
    %c0_i32_0 = arith.constant 0 : i32
    %c0_i32_1 = arith.constant 0 : i32
    return %c0_i32, %c0_i32_0 : i32, i32
  }
  func.func @transform_4(%arg0: i32) -> (i32, i32) {
    %c0_i32 = arith.constant 0 : i32
    %c0_i32_0 = arith.constant 0 : i32
    %c0_i32_1 = arith.constant 0 : i32
    return %c0_i32, %c0_i32_0 : i32, i32
  }
  func.func @transform_5(%arg0: i32) -> (i32, i32) {
    %c0_i32 = arith.constant 0 : i32
    %c0_i32_0 = arith.constant 0 : i32
    %c0_i32_1 = arith.constant 0 : i32
    return %c0_i32, %c0_i32_0 : i32, i32
  }
  func.func @transform_6(%arg0: i32) -> (i32, i32) {
    %c0_i32 = arith.constant 0 : i32
    %c0_i32_0 = arith.constant 0 : i32
    %c0_i32_1 = arith.constant 0 : i32
    return %c0_i32, %c0_i32_0 : i32, i32
  }
  func.func @transform_7(%arg0: i32) -> (i32, i32) {
    %c0_i32 = arith.constant 0 : i32
    %c0_i32_0 = arith.constant 0 : i32
    %c0_i32_1 = arith.constant 0 : i32
    return %c0_i32, %c0_i32_0 : i32, i32
  }
  func.func @transform_8(%arg0: i32) -> (i32, i32) {
    %c0_i32 = arith.constant 0 : i32
    %c0_i32_0 = arith.constant 0 : i32
    %c0_i32_1 = arith.constant 0 : i32
    return %c0_i32, %c0_i32_0 : i32, i32
  }
  func.func @transform_9(%arg0: i32) -> (i32, i32) {
    %c0_i32 = arith.constant 0 : i32
    %c0_i32_0 = arith.constant 0 : i32
    %c0_i32_1 = arith.constant 0 : i32
    return %c0_i32, %c0_i32_0 : i32, i32
  }
  func.func @transform_10(%arg0: i32) -> (i32, i32) {
    %c0_i32 = arith.constant 0 : i32
    %c0_i32_0 = arith.constant 0 : i32
    %c0_i32_1 = arith.constant 0 : i32
    return %c0_i32, %c0_i32_0 : i32, i32
  }
  func.func @transform_11(%arg0: i32) -> (i32, i32) {
    %c0_i32 = arith.constant 0 : i32
    %c0_i32_0 = arith.constant 0 : i32
    %c0_i32_1 = arith.constant 0 : i32
    return %c0_i32, %c0_i32_0 : i32, i32
  }
  func.func @transform_12(%arg0: i32) -> (i32, i32) {
    %c0_i32 = arith.constant 0 : i32
    %c0_i32_0 = arith.constant 0 : i32
    %c0_i32_1 = arith.constant 0 : i32
    return %c0_i32, %c0_i32_0 : i32, i32
  }
  func.func @transform_13(%arg0: i32) -> (i32, i32, i32) {
    %c0_i32 = arith.constant 0 : i32
    %c0_i32_0 = arith.constant 0 : i32
    %c0_i32_1 = arith.constant 0 : i32
    return %arg0, %c0_i32, %c0_i32_0 : i32, i32, i32
  }
}

module attributes {stable_mosaic.version = 11 : i64} {
  func.func @_tail_kernel(%arg0: i32, %arg1: memref<4x32xbf16, #tpu.memory_space<vmem>>, %arg2: memref<1x32xf32, #tpu.memory_space<vmem>>, %arg3: memref<1x32xf32, #tpu.memory_space<vmem>>, %arg4: memref<32x16xbf16, #tpu.memory_space<vmem>>, %arg5: memref<1x16xf32, #tpu.memory_space<vmem>>, %arg6: memref<1x16xf32, #tpu.memory_space<vmem>>, %arg7: memref<16x32xbf16, #tpu.memory_space<vmem>>, %arg8: memref<1x32xf32, #tpu.memory_space<vmem>>, %arg9: memref<4x32xbf16, #tpu.memory_space<vmem>>) attributes {dimension_semantics = [#tpu.dimension_semantics<parallel>], iteration_bounds = array<i64: 1>, scalar_prefetch = 0 : i64, scratch_operands = 0 : i64, tpu.core_type = #tpu.core_type<tc>, window_params = [{transform_indices = @transform_0, window_bounds = array<i64: 4, 32>}, {pipeline_mode = #tpu.pipeline_mode<synchronous>, transform_indices = @transform_1, window_bounds = array<i64: 1, 32>}, {pipeline_mode = #tpu.pipeline_mode<synchronous>, transform_indices = @transform_2, window_bounds = array<i64: 1, 32>}, {pipeline_mode = #tpu.pipeline_mode<synchronous>, transform_indices = @transform_3, window_bounds = array<i64: 32, 16>}, {pipeline_mode = #tpu.pipeline_mode<synchronous>, transform_indices = @transform_4, window_bounds = array<i64: 1, 16>}, {pipeline_mode = #tpu.pipeline_mode<synchronous>, transform_indices = @transform_5, window_bounds = array<i64: 1, 16>}, {pipeline_mode = #tpu.pipeline_mode<synchronous>, transform_indices = @transform_6, window_bounds = array<i64: 16, 32>}, {pipeline_mode = #tpu.pipeline_mode<synchronous>, transform_indices = @transform_7, window_bounds = array<i64: 1, 32>}, {transform_indices = @transform_8, window_bounds = array<i64: 4, 32>}]} {
    %c0 = arith.constant 0 : index
    %c0_0 = arith.constant 0 : index
    %0 = vector.load %arg1[%c0, %c0_0] : memref<4x32xbf16, #tpu.memory_space<vmem>>, vector<4x32xbf16>
    %1 = arith.extf %0 : vector<4x32xbf16> to vector<4x32xf32>
    %c0_1 = arith.constant 0 : index
    %c0_2 = arith.constant 0 : index
    %2 = vector.load %arg2[%c0_1, %c0_2] : memref<1x32xf32, #tpu.memory_space<vmem>>, vector<1x32xf32>
    %c0_3 = arith.constant 0 : index
    %c0_4 = arith.constant 0 : index
    %3 = vector.load %arg3[%c0_3, %c0_4] : memref<1x32xf32, #tpu.memory_space<vmem>>, vector<1x32xf32>
    %cst = arith.constant dense<0.000000e+00> : vector<4xf32>
    %4 = vector.multi_reduction <add>, %1, %cst [1] : vector<4x32xf32> to vector<4xf32>
    %5 = vector.shape_cast %4 : vector<4xf32> to vector<4x1xf32>
    %cst_5 = arith.constant 3.200000e+01 : f32
    %6 = vector.broadcast %cst_5 : f32 to vector<4x1xf32>
    %7 = arith.divf %5, %6 : vector<4x1xf32>
    %8 = vector.broadcast %7 : vector<4x1xf32> to vector<4x32xf32>
    %9 = arith.subf %1, %8 : vector<4x32xf32>
    %10 = arith.mulf %9, %9 : vector<4x32xf32>
    %cst_6 = arith.constant dense<0.000000e+00> : vector<4xf32>
    %11 = vector.multi_reduction <add>, %10, %cst_6 [1] : vector<4x32xf32> to vector<4xf32>
    %12 = vector.shape_cast %11 : vector<4xf32> to vector<4x1xf32>
    %cst_7 = arith.constant 3.200000e+01 : f32
    %13 = vector.broadcast %cst_7 : f32 to vector<4x1xf32>
    %14 = arith.divf %12, %13 : vector<4x1xf32>
    %15 = vector.broadcast %7 : vector<4x1xf32> to vector<4x32xf32>
    %16 = arith.subf %1, %15 : vector<4x32xf32>
    %cst_8 = arith.constant 9.99999974E-6 : f32
    %17 = vector.broadcast %cst_8 : f32 to vector<4x1xf32>
    %18 = arith.addf %14, %17 : vector<4x1xf32>
    %19 = math.rsqrt %18 : vector<4x1xf32>
    %20 = vector.broadcast %19 : vector<4x1xf32> to vector<4x32xf32>
    %21 = arith.mulf %16, %20 : vector<4x32xf32>
    %22 = vector.broadcast %2 : vector<1x32xf32> to vector<4x32xf32>
    %23 = arith.mulf %21, %22 : vector<4x32xf32>
    %24 = vector.broadcast %3 : vector<1x32xf32> to vector<4x32xf32>
    %25 = arith.addf %23, %24 : vector<4x32xf32>
    %26 = arith.truncf %25 : vector<4x32xf32> to vector<4x32xbf16>
    %c0_9 = arith.constant 0 : index
    %c0_10 = arith.constant 0 : index
    %27 = vector.load %arg4[%c0_9, %c0_10] : memref<32x16xbf16, #tpu.memory_space<vmem>>, vector<32x16xbf16>
    %cst_11 = arith.constant dense<0.000000e+00> : vector<4x16xf32>
    %28 = tpu.matmul %26, %27, %cst_11 {dimension_numbers = #tpu.dot_dimension_numbers<[1], [0], [0], [1], [0, 0, 1, 1], [], []>} : vector<4x32xbf16>, vector<32x16xbf16>, vector<4x16xf32> -> vector<4x16xf32>
    %29 = arith.mulf %28, %28 : vector<4x16xf32>
    %cst_12 = arith.constant dense<0.000000e+00> : vector<4xf32>
    %30 = vector.multi_reduction <add>, %29, %cst_12 [1] : vector<4x16xf32> to vector<4xf32>
    %31 = vector.shape_cast %30 : vector<4xf32> to vector<4x1xf32>
    %32 = math.rsqrt %31 : vector<4x1xf32>
    %33 = vector.broadcast %32 : vector<4x1xf32> to vector<4x16xf32>
    %34 = arith.mulf %28, %33 : vector<4x16xf32>
    %c0_13 = arith.constant 0 : index
    %c0_14 = arith.constant 0 : index
    %35 = vector.load %arg5[%c0_13, %c0_14] : memref<1x16xf32, #tpu.memory_space<vmem>>, vector<1x16xf32>
    %c0_15 = arith.constant 0 : index
    %c0_16 = arith.constant 0 : index
    %36 = vector.load %arg6[%c0_15, %c0_16] : memref<1x16xf32, #tpu.memory_space<vmem>>, vector<1x16xf32>
    %cst_17 = arith.constant dense<0.000000e+00> : vector<4xf32>
    %37 = vector.multi_reduction <add>, %34, %cst_17 [1] : vector<4x16xf32> to vector<4xf32>
    %38 = vector.shape_cast %37 : vector<4xf32> to vector<4x1xf32>
    %cst_18 = arith.constant 1.600000e+01 : f32
    %39 = vector.broadcast %cst_18 : f32 to vector<4x1xf32>
    %40 = arith.divf %38, %39 : vector<4x1xf32>
    %41 = vector.broadcast %40 : vector<4x1xf32> to vector<4x16xf32>
    %42 = arith.subf %34, %41 : vector<4x16xf32>
    %43 = arith.mulf %42, %42 : vector<4x16xf32>
    %cst_19 = arith.constant dense<0.000000e+00> : vector<4xf32>
    %44 = vector.multi_reduction <add>, %43, %cst_19 [1] : vector<4x16xf32> to vector<4xf32>
    %45 = vector.shape_cast %44 : vector<4xf32> to vector<4x1xf32>
    %cst_20 = arith.constant 1.600000e+01 : f32
    %46 = vector.broadcast %cst_20 : f32 to vector<4x1xf32>
    %47 = arith.divf %45, %46 : vector<4x1xf32>
    %48 = vector.broadcast %40 : vector<4x1xf32> to vector<4x16xf32>
    %49 = arith.subf %34, %48 : vector<4x16xf32>
    %cst_21 = arith.constant 9.99999974E-6 : f32
    %50 = vector.broadcast %cst_21 : f32 to vector<4x1xf32>
    %51 = arith.addf %47, %50 : vector<4x1xf32>
    %52 = math.rsqrt %51 : vector<4x1xf32>
    %53 = vector.broadcast %52 : vector<4x1xf32> to vector<4x16xf32>
    %54 = arith.mulf %49, %53 : vector<4x16xf32>
    %55 = vector.broadcast %35 : vector<1x16xf32> to vector<4x16xf32>
    %56 = arith.mulf %54, %55 : vector<4x16xf32>
    %57 = vector.broadcast %36 : vector<1x16xf32> to vector<4x16xf32>
    %58 = arith.addf %56, %57 : vector<4x16xf32>
    %59 = arith.truncf %58 : vector<4x16xf32> to vector<4x16xbf16>
    %c0_22 = arith.constant 0 : index
    %c0_23 = arith.constant 0 : index
    %60 = vector.load %arg7[%c0_22, %c0_23] : memref<16x32xbf16, #tpu.memory_space<vmem>>, vector<16x32xbf16>
    %cst_24 = arith.constant dense<0.000000e+00> : vector<4x32xf32>
    %61 = tpu.matmul %59, %60, %cst_24 {dimension_numbers = #tpu.dot_dimension_numbers<[1], [0], [0], [1], [0, 0, 1, 1], [], []>} : vector<4x16xbf16>, vector<16x32xbf16>, vector<4x32xf32> -> vector<4x32xf32>
    %c0_25 = arith.constant 0 : index
    %c0_26 = arith.constant 0 : index
    %62 = vector.load %arg8[%c0_25, %c0_26] : memref<1x32xf32, #tpu.memory_space<vmem>>, vector<1x32xf32>
    %63 = vector.broadcast %62 : vector<1x32xf32> to vector<4x32xf32>
    %64 = arith.addf %61, %63 : vector<4x32xf32>
    %65 = arith.truncf %64 : vector<4x32xf32> to vector<4x32xbf16>
    %c0_27 = arith.constant 0 : index
    %c0_28 = arith.constant 0 : index
    %66 = vector.load %arg9[%c0_27, %c0_28] : memref<4x32xbf16, #tpu.memory_space<vmem>>, vector<4x32xbf16>
    tpu.vector_store %arg9[%c0_27, %c0_28], %65 {strides = array<i32>} : memref<4x32xbf16, #tpu.memory_space<vmem>>, vector<4x32xbf16>,
    return
  }
  func.func @transform_0(%arg0: i32) -> (i32, i32) {
    %c0_i32 = arith.constant 0 : i32
    %c0_i32_0 = arith.constant 0 : i32
    return %arg0, %c0_i32 : i32, i32
  }
  func.func @transform_1(%arg0: i32) -> (i32, i32) {
    %c0_i32 = arith.constant 0 : i32
    %c0_i32_0 = arith.constant 0 : i32
    %c0_i32_1 = arith.constant 0 : i32
    return %c0_i32, %c0_i32_0 : i32, i32
  }
  func.func @transform_2(%arg0: i32) -> (i32, i32) {
    %c0_i32 = arith.constant 0 : i32
    %c0_i32_0 = arith.constant 0 : i32
    %c0_i32_1 = arith.constant 0 : i32
    return %c0_i32, %c0_i32_0 : i32, i32
  }
  func.func @transform_3(%arg0: i32) -> (i32, i32) {
    %c0_i32 = arith.constant 0 : i32
    %c0_i32_0 = arith.constant 0 : i32
    %c0_i32_1 = arith.constant 0 : i32
    return %c0_i32, %c0_i32_0 : i32, i32
  }
  func.func @transform_4(%arg0: i32) -> (i32, i32) {
    %c0_i32 = arith.constant 0 : i32
    %c0_i32_0 = arith.constant 0 : i32
    %c0_i32_1 = arith.constant 0 : i32
    return %c0_i32, %c0_i32_0 : i32, i32
  }
  func.func @transform_5(%arg0: i32) -> (i32, i32) {
    %c0_i32 = arith.constant 0 : i32
    %c0_i32_0 = arith.constant 0 : i32
    %c0_i32_1 = arith.constant 0 : i32
    return %c0_i32, %c0_i32_0 : i32, i32
  }
  func.func @transform_6(%arg0: i32) -> (i32, i32) {
    %c0_i32 = arith.constant 0 : i32
    %c0_i32_0 = arith.constant 0 : i32
    %c0_i32_1 = arith.constant 0 : i32
    return %c0_i32, %c0_i32_0 : i32, i32
  }
  func.func @transform_7(%arg0: i32) -> (i32, i32) {
    %c0_i32 = arith.constant 0 : i32
    %c0_i32_0 = arith.constant 0 : i32
    %c0_i32_1 = arith.constant 0 : i32
    return %c0_i32, %c0_i32_0 : i32, i32
  }
  func.func @transform_8(%arg0: i32) -> (i32, i32) {
    %c0_i32 = arith.constant 0 : i32
    %c0_i32_0 = arith.constant 0 : i32
    return %arg0, %c0_i32 : i32, i32
  }
}

module attributes {stable_mosaic.version = 11 : i64} {
  func.func @_block_kernel(%arg0: i32, %arg1: memref<1x2x32xbf16, #tpu.memory_space<vmem>>, %arg2: memref<1x32xf32, #tpu.memory_space<vmem>>, %arg3: memref<1x32xf32, #tpu.memory_space<vmem>>, %arg4: memref<32x96xbf16, #tpu.memory_space<vmem>>, %arg5: memref<1x96xf32, #tpu.memory_space<vmem>>, %arg6: memref<32x32xbf16, #tpu.memory_space<vmem>>, %arg7: memref<1x32xf32, #tpu.memory_space<vmem>>, %arg8: memref<1x32xf32, #tpu.memory_space<vmem>>, %arg9: memref<1x32xf32, #tpu.memory_space<vmem>>, %arg10: memref<32x128xbf16, #tpu.memory_space<vmem>>, %arg11: memref<1x128xf32, #tpu.memory_space<vmem>>, %arg12: memref<128x32xbf16, #tpu.memory_space<vmem>>, %arg13: memref<1x32xf32, #tpu.memory_space<vmem>>, %arg14: memref<1x32xf32, #tpu.memory_space<vmem>>, %arg15: memref<1x32xf32, #tpu.memory_space<vmem>>, %arg16: memref<1x2x32xf32, #tpu.memory_space<vmem>>) attributes {dimension_semantics = [#tpu.dimension_semantics<parallel>], iteration_bounds = array<i64: 2>, scalar_prefetch = 0 : i64, scratch_operands = 0 : i64, tpu.core_type = #tpu.core_type<tc>, window_params = [{transform_indices = @transform_0, window_bounds = array<i64: 1, 2, 32>}, {pipeline_mode = #tpu.pipeline_mode<synchronous>, transform_indices = @transform_1, window_bounds = array<i64: 1, 32>}, {pipeline_mode = #tpu.pipeline_mode<synchronous>, transform_indices = @transform_2, window_bounds = array<i64: 1, 32>}, {pipeline_mode = #tpu.pipeline_mode<synchronous>, transform_indices = @transform_3, window_bounds = array<i64: 32, 96>}, {pipeline_mode = #tpu.pipeline_mode<synchronous>, transform_indices = @transform_4, window_bounds = array<i64: 1, 96>}, {pipeline_mode = #tpu.pipeline_mode<synchronous>, transform_indices = @transform_5, window_bounds = array<i64: 32, 32>}, {pipeline_mode = #tpu.pipeline_mode<synchronous>, transform_indices = @transform_6, window_bounds = array<i64: 1, 32>}, {pipeline_mode = #tpu.pipeline_mode<synchronous>, transform_indices = @transform_7, window_bounds = array<i64: 1, 32>}, {pipeline_mode = #tpu.pipeline_mode<synchronous>, transform_indices = @transform_8, window_bounds = array<i64: 1, 32>}, {pipeline_mode = #tpu.pipeline_mode<synchronous>, transform_indices = @transform_9, window_bounds = array<i64: 32, 128>}, {pipeline_mode = #tpu.pipeline_mode<synchronous>, transform_indices = @transform_10, window_bounds = array<i64: 1, 128>}, {pipeline_mode = #tpu.pipeline_mode<synchronous>, transform_indices = @transform_11, window_bounds = array<i64: 128, 32>}, {pipeline_mode = #tpu.pipeline_mode<synchronous>, transform_indices = @transform_12, window_bounds = array<i64: 1, 32>}, {pipeline_mode = #tpu.pipeline_mode<synchronous>, transform_indices = @transform_13, window_bounds = array<i64: 1, 32>}, {pipeline_mode = #tpu.pipeline_mode<synchronous>, transform_indices = @transform_14, window_bounds = array<i64: 1, 32>}, {transform_indices = @transform_15, window_bounds = array<i64: 1, 2, 32>}]} {
    %c0 = arith.constant 0 : index
    %c0_0 = arith.constant 0 : index
    %c0_1 = arith.constant 0 : index
    %0 = vector.load %arg1[%c0, %c0_0, %c0_1] : memref<1x2x32xbf16, #tpu.memory_space<vmem>>, vector<1x2x32xbf16>
    %1 = arith.extf %0 : vector<1x2x32xbf16> to vector<1x2x32xf32>
    %2 = vector.shape_cast %1 : vector<1x2x32xf32> to vector<2x32xf32>
    %c0_2 = arith.constant 0 : index
    %c0_3 = arith.constant 0 : index
    %3 = vector.load %arg2[%c0_2, %c0_3] : memref<1x32xf32, #tpu.memory_space<vmem>>, vector<1x32xf32>
    %c0_4 = arith.constant 0 : index
    %c0_5 = arith.constant 0 : index
    %4 = vector.load %arg3[%c0_4, %c0_5] : memref<1x32xf32, #tpu.memory_space<vmem>>, vector<1x32xf32>
    %cst = arith.constant dense<0.000000e+00> : vector<2xf32>
    %5 = vector.multi_reduction <add>, %2, %cst [1] : vector<2x32xf32> to vector<2xf32>
    %6 = vector.shape_cast %5 : vector<2xf32> to vector<2x1xf32>
    %cst_6 = arith.constant 3.200000e+01 : f32
    %7 = vector.broadcast %cst_6 : f32 to vector<2x1xf32>
    %8 = arith.divf %6, %7 : vector<2x1xf32>
    %9 = vector.broadcast %8 : vector<2x1xf32> to vector<2x32xf32>
    %10 = arith.subf %2, %9 : vector<2x32xf32>
    %11 = arith.mulf %10, %10 : vector<2x32xf32>
    %cst_7 = arith.constant dense<0.000000e+00> : vector<2xf32>
    %12 = vector.multi_reduction <add>, %11, %cst_7 [1] : vector<2x32xf32> to vector<2xf32>
    %13 = vector.shape_cast %12 : vector<2xf32> to vector<2x1xf32>
    %cst_8 = arith.constant 3.200000e+01 : f32
    %14 = vector.broadcast %cst_8 : f32 to vector<2x1xf32>
    %15 = arith.divf %13, %14 : vector<2x1xf32>
    %16 = vector.broadcast %8 : vector<2x1xf32> to vector<2x32xf32>
    %17 = arith.subf %2, %16 : vector<2x32xf32>
    %cst_9 = arith.constant 9.99999974E-6 : f32
    %18 = vector.broadcast %cst_9 : f32 to vector<2x1xf32>
    %19 = arith.addf %15, %18 : vector<2x1xf32>
    %20 = math.rsqrt %19 : vector<2x1xf32>
    %21 = vector.broadcast %20 : vector<2x1xf32> to vector<2x32xf32>
    %22 = arith.mulf %17, %21 : vector<2x32xf32>
    %23 = vector.broadcast %3 : vector<1x32xf32> to vector<2x32xf32>
    %24 = arith.mulf %22, %23 : vector<2x32xf32>
    %25 = vector.broadcast %4 : vector<1x32xf32> to vector<2x32xf32>
    %26 = arith.addf %24, %25 : vector<2x32xf32>
    %27 = arith.truncf %26 : vector<2x32xf32> to vector<2x32xbf16>
    %c0_10 = arith.constant 0 : index
    %c0_11 = arith.constant 0 : index
    %28 = vector.load %arg4[%c0_10, %c0_11] : memref<32x96xbf16, #tpu.memory_space<vmem>>, vector<32x96xbf16>
    %cst_12 = arith.constant dense<0.000000e+00> : vector<2x96xf32>
    %29 = tpu.matmul %27, %28, %cst_12 {dimension_numbers = #tpu.dot_dimension_numbers<[1], [0], [0], [1], [0, 0, 1, 1], [], []>} : vector<2x32xbf16>, vector<32x96xbf16>, vector<2x96xf32> -> vector<2x96xf32>
    %c0_13 = arith.constant 0 : index
    %c0_14 = arith.constant 0 : index
    %30 = vector.load %arg5[%c0_13, %c0_14] : memref<1x96xf32, #tpu.memory_space<vmem>>, vector<1x96xf32>
    %31 = vector.broadcast %30 : vector<1x96xf32> to vector<2x96xf32>
    %32 = arith.addf %29, %31 : vector<2x96xf32>
    %33 = arith.truncf %32 : vector<2x96xf32> to vector<2x96xbf16>
    %34 = vector.extract_strided_slice %33 {offsets = [0, 0], sizes = [2, 8], strides = [1, 1]} : vector<2x96xbf16> to vector<2x8xbf16>
    %35 = vector.shape_cast %34 : vector<2x8xbf16> to vector<1x2x8xbf16>
    %36 = vector.extract_strided_slice %33 {offsets = [0, 32], sizes = [2, 8], strides = [1, 1]} : vector<2x96xbf16> to vector<2x8xbf16>
    %37 = vector.shape_cast %36 : vector<2x8xbf16> to vector<1x2x8xbf16>
    %38 = vector.extract_strided_slice %33 {offsets = [0, 64], sizes = [2, 8], strides = [1, 1]} : vector<2x96xbf16> to vector<2x8xbf16>
    %39 = vector.shape_cast %38 : vector<2x8xbf16> to vector<1x2x8xbf16>
    "tpu.trace_start"() <{level = 10 : i32, message = "bqd,bkd->bqk"}> : () -> ()
    %cst_15 = arith.constant dense<0.000000e+00> : vector<1x2x2xf32>
    %40 = tpu.matmul %35, %37, %cst_15 {dimension_numbers = #tpu.dot_dimension_numbers<[2], [2], [1], [1], [0, 0, 0, 1, 1, 1], [0], [0]>} : vector<1x2x8xbf16>, vector<1x2x8xbf16>, vector<1x2x2xf32> -> vector<1x2x2xf32>
    "tpu.trace_stop"() : () -> ()
    %cst_16 = arith.constant 0.353553385 : f32
    %41 = vector.broadcast %cst_16 : f32 to vector<1x2x2xf32>
    %42 = arith.mulf %40, %41 : vector<1x2x2xf32>
    %cst_17 = arith.constant dense<0xFF800000> : vector<1x2xf32>
    %43 = vector.multi_reduction <maximumf>, %42, %cst_17 [2] : vector<1x2x2xf32> to vector<1x2xf32>
    %44 = vector.shape_cast %43 : vector<1x2xf32> to vector<1x2x1xf32>
    %45 = vector.broadcast %44 : vector<1x2x1xf32> to vector<1x2x2xf32>
    %46 = arith.subf %42, %45 : vector<1x2x2xf32>
    %47 = math.exp %46 : vector<1x2x2xf32>
    %cst_18 = arith.constant dense<0.000000e+00> : vector<1x2xf32>
    %48 = vector.multi_reduction <add>, %47, %cst_18 [2] : vector<1x2x2xf32> to vector<1x2xf32>
    %49 = vector.shape_cast %48 : vector<1x2xf32> to vector<1x2x1xf32>
    %50 = tpu.reciprocal %49 : vector<1x2x1xf32> -> vector<1x2x1xf32>
    %51 = vector.broadcast %50 : vector<1x2x1xf32> to vector<1x2x2xf32>
    %52 = arith.mulf %47, %51 : vector<1x2x2xf32>
    %53 = arith.truncf %52 : vector<1x2x2xf32> to vector<1x2x2xbf16>
    "tpu.trace_start"() <{level = 10 : i32, message = "bqk,bkd->bqd"}> : () -> ()
    %cst_19 = arith.constant dense<0.000000e+00> : vector<1x2x8xf32>
    %54 = tpu.matmul %53, %39, %cst_19 {dimension_numbers = #tpu.dot_dimension_numbers<[2], [1], [1], [2], [0, 0, 0, 1, 1, 2], [0], [0]>} : vector<1x2x2xbf16>, vector<1x2x8xbf16>, vector<1x2x8xf32> -> vector<1x2x8xf32>
    "tpu.trace_stop"() : () -> ()
    %55 = arith.truncf %54 : vector<1x2x8xf32> to vector<1x2x8xbf16>
    %56 = vector.extract_strided_slice %33 {offsets = [0, 8], sizes = [2, 8], strides = [1, 1]} : vector<2x96xbf16> to vector<2x8xbf16>
    %57 = vector.shape_cast %56 : vector<2x8xbf16> to vector<1x2x8xbf16>
    %58 = vector.extract_strided_slice %33 {offsets = [0, 40], sizes = [2, 8], strides = [1, 1]} : vector<2x96xbf16> to vector<2x8xbf16>
    %59 = vector.shape_cast %58 : vector<2x8xbf16> to vector<1x2x8xbf16>
    %60 = vector.extract_strided_slice %33 {offsets = [0, 72], sizes = [2, 8], strides = [1, 1]} : vector<2x96xbf16> to vector<2x8xbf16>
    %61 = vector.shape_cast %60 : vector<2x8xbf16> to vector<1x2x8xbf16>
    "tpu.trace_start"() <{level = 10 : i32, message = "bqd,bkd->bqk"}> : () -> ()
    %cst_20 = arith.constant dense<0.000000e+00> : vector<1x2x2xf32>
    %62 = tpu.matmul %57, %59, %cst_20 {dimension_numbers = #tpu.dot_dimension_numbers<[2], [2], [1], [1], [0, 0, 0, 1, 1, 1], [0], [0]>} : vector<1x2x8xbf16>, vector<1x2x8xbf16>, vector<1x2x2xf32> -> vector<1x2x2xf32>
    "tpu.trace_stop"() : () -> ()
    %cst_21 = arith.constant 0.353553385 : f32
    %63 = vector.broadcast %cst_21 : f32 to vector<1x2x2xf32>
    %64 = arith.mulf %62, %63 : vector<1x2x2xf32>
    %cst_22 = arith.constant dense<0xFF800000> : vector<1x2xf32>
    %65 = vector.multi_reduction <maximumf>, %64, %cst_22 [2] : vector<1x2x2xf32> to vector<1x2xf32>
    %66 = vector.shape_cast %65 : vector<1x2xf32> to vector<1x2x1xf32>
    %67 = vector.broadcast %66 : vector<1x2x1xf32> to vector<1x2x2xf32>
    %68 = arith.subf %64, %67 : vector<1x2x2xf32>
    %69 = math.exp %68 : vector<1x2x2xf32>
    %cst_23 = arith.constant dense<0.000000e+00> : vector<1x2xf32>
    %70 = vector.multi_reduction <add>, %69, %cst_23 [2] : vector<1x2x2xf32> to vector<1x2xf32>
    %71 = vector.shape_cast %70 : vector<1x2xf32> to vector<1x2x1xf32>
    %72 = tpu.reciprocal %71 : vector<1x2x1xf32> -> vector<1x2x1xf32>
    %73 = vector.broadcast %72 : vector<1x2x1xf32> to vector<1x2x2xf32>
    %74 = arith.mulf %69, %73 : vector<1x2x2xf32>
    %75 = arith.truncf %74 : vector<1x2x2xf32> to vector<1x2x2xbf16>
    "tpu.trace_start"() <{level = 10 : i32, message = "bqk,bkd->bqd"}> : () -> ()
    %cst_24 = arith.constant dense<0.000000e+00> : vector<1x2x8xf32>
    %76 = tpu.matmul %75, %61, %cst_24 {dimension_numbers = #tpu.dot_dimension_numbers<[2], [1], [1], [2], [0, 0, 0, 1, 1, 2], [0], [0]>} : vector<1x2x2xbf16>, vector<1x2x8xbf16>, vector<1x2x8xf32> -> vector<1x2x8xf32>
    "tpu.trace_stop"() : () -> ()
    %77 = arith.truncf %76 : vector<1x2x8xf32> to vector<1x2x8xbf16>
    %78 = vector.extract_strided_slice %33 {offsets = [0, 16], sizes = [2, 8], strides = [1, 1]} : vector<2x96xbf16> to vector<2x8xbf16>
    %79 = vector.shape_cast %78 : vector<2x8xbf16> to vector<1x2x8xbf16>
    %80 = vector.extract_strided_slice %33 {offsets = [0, 48], sizes = [2, 8], strides = [1, 1]} : vector<2x96xbf16> to vector<2x8xbf16>
    %81 = vector.shape_cast %80 : vector<2x8xbf16> to vector<1x2x8xbf16>
    %82 = vector.extract_strided_slice %33 {offsets = [0, 80], sizes = [2, 8], strides = [1, 1]} : vector<2x96xbf16> to vector<2x8xbf16>
    %83 = vector.shape_cast %82 : vector<2x8xbf16> to vector<1x2x8xbf16>
    "tpu.trace_start"() <{level = 10 : i32, message = "bqd,bkd->bqk"}> : () -> ()
    %cst_25 = arith.constant dense<0.000000e+00> : vector<1x2x2xf32>
    %84 = tpu.matmul %79, %81, %cst_25 {dimension_numbers = #tpu.dot_dimension_numbers<[2], [2], [1], [1], [0, 0, 0, 1, 1, 1], [0], [0]>} : vector<1x2x8xbf16>, vector<1x2x8xbf16>, vector<1x2x2xf32> -> vector<1x2x2xf32>
    "tpu.trace_stop"() : () -> ()
    %cst_26 = arith.constant 0.353553385 : f32
    %85 = vector.broadcast %cst_26 : f32 to vector<1x2x2xf32>
    %86 = arith.mulf %84, %85 : vector<1x2x2xf32>
    %cst_27 = arith.constant dense<0xFF800000> : vector<1x2xf32>
    %87 = vector.multi_reduction <maximumf>, %86, %cst_27 [2] : vector<1x2x2xf32> to vector<1x2xf32>
    %88 = vector.shape_cast %87 : vector<1x2xf32> to vector<1x2x1xf32>
    %89 = vector.broadcast %88 : vector<1x2x1xf32> to vector<1x2x2xf32>
    %90 = arith.subf %86, %89 : vector<1x2x2xf32>
    %91 = math.exp %90 : vector<1x2x2xf32>
    %cst_28 = arith.constant dense<0.000000e+00> : vector<1x2xf32>
    %92 = vector.multi_reduction <add>, %91, %cst_28 [2] : vector<1x2x2xf32> to vector<1x2xf32>
    %93 = vector.shape_cast %92 : vector<1x2xf32> to vector<1x2x1xf32>
    %94 = tpu.reciprocal %93 : vector<1x2x1xf32> -> vector<1x2x1xf32>
    %95 = vector.broadcast %94 : vector<1x2x1xf32> to vector<1x2x2xf32>
    %96 = arith.mulf %91, %95 : vector<1x2x2xf32>
    %97 = arith.truncf %96 : vector<1x2x2xf32> to vector<1x2x2xbf16>
    "tpu.trace_start"() <{level = 10 : i32, message = "bqk,bkd->bqd"}> : () -> ()
    %cst_29 = arith.constant dense<0.000000e+00> : vector<1x2x8xf32>
    %98 = tpu.matmul %97, %83, %cst_29 {dimension_numbers = #tpu.dot_dimension_numbers<[2], [1], [1], [2], [0, 0, 0, 1, 1, 2], [0], [0]>} : vector<1x2x2xbf16>, vector<1x2x8xbf16>, vector<1x2x8xf32> -> vector<1x2x8xf32>
    "tpu.trace_stop"() : () -> ()
    %99 = arith.truncf %98 : vector<1x2x8xf32> to vector<1x2x8xbf16>
    %100 = vector.extract_strided_slice %33 {offsets = [0, 24], sizes = [2, 8], strides = [1, 1]} : vector<2x96xbf16> to vector<2x8xbf16>
    %101 = vector.shape_cast %100 : vector<2x8xbf16> to vector<1x2x8xbf16>
    %102 = vector.extract_strided_slice %33 {offsets = [0, 56], sizes = [2, 8], strides = [1, 1]} : vector<2x96xbf16> to vector<2x8xbf16>
    %103 = vector.shape_cast %102 : vector<2x8xbf16> to vector<1x2x8xbf16>
    %104 = vector.extract_strided_slice %33 {offsets = [0, 88], sizes = [2, 8], strides = [1, 1]} : vector<2x96xbf16> to vector<2x8xbf16>
    %105 = vector.shape_cast %104 : vector<2x8xbf16> to vector<1x2x8xbf16>
    "tpu.trace_start"() <{level = 10 : i32, message = "bqd,bkd->bqk"}> : () -> ()
    %cst_30 = arith.constant dense<0.000000e+00> : vector<1x2x2xf32>
    %106 = tpu.matmul %101, %103, %cst_30 {dimension_numbers = #tpu.dot_dimension_numbers<[2], [2], [1], [1], [0, 0, 0, 1, 1, 1], [0], [0]>} : vector<1x2x8xbf16>, vector<1x2x8xbf16>, vector<1x2x2xf32> -> vector<1x2x2xf32>
    "tpu.trace_stop"() : () -> ()
    %cst_31 = arith.constant 0.353553385 : f32
    %107 = vector.broadcast %cst_31 : f32 to vector<1x2x2xf32>
    %108 = arith.mulf %106, %107 : vector<1x2x2xf32>
    %cst_32 = arith.constant dense<0xFF800000> : vector<1x2xf32>
    %109 = vector.multi_reduction <maximumf>, %108, %cst_32 [2] : vector<1x2x2xf32> to vector<1x2xf32>
    %110 = vector.shape_cast %109 : vector<1x2xf32> to vector<1x2x1xf32>
    %111 = vector.broadcast %110 : vector<1x2x1xf32> to vector<1x2x2xf32>
    %112 = arith.subf %108, %111 : vector<1x2x2xf32>
    %113 = math.exp %112 : vector<1x2x2xf32>
    %cst_33 = arith.constant dense<0.000000e+00> : vector<1x2xf32>
    %114 = vector.multi_reduction <add>, %113, %cst_33 [2] : vector<1x2x2xf32> to vector<1x2xf32>
    %115 = vector.shape_cast %114 : vector<1x2xf32> to vector<1x2x1xf32>
    %116 = tpu.reciprocal %115 : vector<1x2x1xf32> -> vector<1x2x1xf32>
    %117 = vector.broadcast %116 : vector<1x2x1xf32> to vector<1x2x2xf32>
    %118 = arith.mulf %113, %117 : vector<1x2x2xf32>
    %119 = arith.truncf %118 : vector<1x2x2xf32> to vector<1x2x2xbf16>
    "tpu.trace_start"() <{level = 10 : i32, message = "bqk,bkd->bqd"}> : () -> ()
    %cst_34 = arith.constant dense<0.000000e+00> : vector<1x2x8xf32>
    %120 = tpu.matmul %119, %105, %cst_34 {dimension_numbers = #tpu.dot_dimension_numbers<[2], [1], [1], [2], [0, 0, 0, 1, 1, 2], [0], [0]>} : vector<1x2x2xbf16>, vector<1x2x8xbf16>, vector<1x2x8xf32> -> vector<1x2x8xf32>
    "tpu.trace_stop"() : () -> ()
    %121 = arith.truncf %120 : vector<1x2x8xf32> to vector<1x2x8xbf16>
    %122 = tpu.concatenate %55, %77, %99, %121 in 2 : vector<1x2x8xbf16>, vector<1x2x8xbf16>, vector<1x2x8xbf16>, vector<1x2x8xbf16> -> vector<1x2x32xbf16>
    %123 = vector.shape_cast %122 : vector<1x2x32xbf16> to vector<2x32xbf16>
    %c0_35 = arith.constant 0 : index
    %c0_36 = arith.constant 0 : index
    %124 = vector.load %arg6[%c0_35, %c0_36] : memref<32x32xbf16, #tpu.memory_space<vmem>>, vector<32x32xbf16>
    %cst_37 = arith.constant dense<0.000000e+00> : vector<2x32xf32>
    %125 = tpu.matmul %123, %124, %cst_37 {dimension_numbers = #tpu.dot_dimension_numbers<[1], [0], [0], [1], [0, 0, 1, 1], [], []>} : vector<2x32xbf16>, vector<32x32xbf16>, vector<2x32xf32> -> vector<2x32xf32>
    %c0_38 = arith.constant 0 : index
    %c0_39 = arith.constant 0 : index
    %126 = vector.load %arg7[%c0_38, %c0_39] : memref<1x32xf32, #tpu.memory_space<vmem>>, vector<1x32xf32>
    %127 = vector.broadcast %126 : vector<1x32xf32> to vector<2x32xf32>
    %128 = arith.addf %125, %127 : vector<2x32xf32>
    %129 = arith.addf %2, %128 : vector<2x32xf32>
    %c0_40 = arith.constant 0 : index
    %c0_41 = arith.constant 0 : index
    %130 = vector.load %arg8[%c0_40, %c0_41] : memref<1x32xf32, #tpu.memory_space<vmem>>, vector<1x32xf32>
    %c0_42 = arith.constant 0 : index
    %c0_43 = arith.constant 0 : index
    %131 = vector.load %arg9[%c0_42, %c0_43] : memref<1x32xf32, #tpu.memory_space<vmem>>, vector<1x32xf32>
    %cst_44 = arith.constant dense<0.000000e+00> : vector<2xf32>
    %132 = vector.multi_reduction <add>, %129, %cst_44 [1] : vector<2x32xf32> to vector<2xf32>
    %133 = vector.shape_cast %132 : vector<2xf32> to vector<2x1xf32>
    %cst_45 = arith.constant 3.200000e+01 : f32
    %134 = vector.broadcast %cst_45 : f32 to vector<2x1xf32>
    %135 = arith.divf %133, %134 : vector<2x1xf32>
    %136 = vector.broadcast %135 : vector<2x1xf32> to vector<2x32xf32>
    %137 = arith.subf %129, %136 : vector<2x32xf32>
    %138 = arith.mulf %137, %137 : vector<2x32xf32>
    %cst_46 = arith.constant dense<0.000000e+00> : vector<2xf32>
    %139 = vector.multi_reduction <add>, %138, %cst_46 [1] : vector<2x32xf32> to vector<2xf32>
    %140 = vector.shape_cast %139 : vector<2xf32> to vector<2x1xf32>
    %cst_47 = arith.constant 3.200000e+01 : f32
    %141 = vector.broadcast %cst_47 : f32 to vector<2x1xf32>
    %142 = arith.divf %140, %141 : vector<2x1xf32>
    %143 = vector.broadcast %135 : vector<2x1xf32> to vector<2x32xf32>
    %144 = arith.subf %129, %143 : vector<2x32xf32>
    %cst_48 = arith.constant 9.99999974E-6 : f32
    %145 = vector.broadcast %cst_48 : f32 to vector<2x1xf32>
    %146 = arith.addf %142, %145 : vector<2x1xf32>
    %147 = math.rsqrt %146 : vector<2x1xf32>
    %148 = vector.broadcast %147 : vector<2x1xf32> to vector<2x32xf32>
    %149 = arith.mulf %144, %148 : vector<2x32xf32>
    %150 = vector.broadcast %130 : vector<1x32xf32> to vector<2x32xf32>
    %151 = arith.mulf %149, %150 : vector<2x32xf32>
    %152 = vector.broadcast %131 : vector<1x32xf32> to vector<2x32xf32>
    %153 = arith.addf %151, %152 : vector<2x32xf32>
    %154 = arith.truncf %153 : vector<2x32xf32> to vector<2x32xbf16>
    %c0_49 = arith.constant 0 : index
    %c0_50 = arith.constant 0 : index
    %155 = vector.load %arg10[%c0_49, %c0_50] : memref<32x128xbf16, #tpu.memory_space<vmem>>, vector<32x128xbf16>
    %cst_51 = arith.constant dense<0.000000e+00> : vector<2x128xf32>
    %156 = tpu.matmul %154, %155, %cst_51 {dimension_numbers = #tpu.dot_dimension_numbers<[1], [0], [0], [1], [0, 0, 1, 1], [], []>} : vector<2x32xbf16>, vector<32x128xbf16>, vector<2x128xf32> -> vector<2x128xf32>
    %c0_52 = arith.constant 0 : index
    %c0_53 = arith.constant 0 : index
    %157 = vector.load %arg11[%c0_52, %c0_53] : memref<1x128xf32, #tpu.memory_space<vmem>>, vector<1x128xf32>
    %158 = vector.broadcast %157 : vector<1x128xf32> to vector<2x128xf32>
    %159 = arith.addf %156, %158 : vector<2x128xf32>
    %cst_54 = arith.constant 1.702000e+00 : f32
    %160 = vector.broadcast %cst_54 : f32 to vector<2x128xf32>
    %161 = arith.mulf %160, %159 : vector<2x128xf32>
    %162 = arith.negf %161 : vector<2x128xf32>
    %163 = math.exp %162 : vector<2x128xf32>
    %cst_55 = arith.constant 1.000000e+00 : f32
    %164 = vector.broadcast %cst_55 : f32 to vector<2x128xf32>
    %165 = arith.addf %164, %163 : vector<2x128xf32>
    %166 = arith.divf %164, %165 : vector<2x128xf32>
    %167 = arith.mulf %159, %166 : vector<2x128xf32>
    %168 = arith.truncf %167 : vector<2x128xf32> to vector<2x128xbf16>
    %c0_56 = arith.constant 0 : index
    %c0_57 = arith.constant 0 : index
    %169 = vector.load %arg12[%c0_56, %c0_57] : memref<128x32xbf16, #tpu.memory_space<vmem>>, vector<128x32xbf16>
    %cst_58 = arith.constant dense<0.000000e+00> : vector<2x32xf32>
    %170 = tpu.matmul %168, %169, %cst_58 {dimension_numbers = #tpu.dot_dimension_numbers<[1], [0], [0], [1], [0, 0, 1, 1], [], []>} : vector<2x128xbf16>, vector<128x32xbf16>, vector<2x32xf32> -> vector<2x32xf32>
    %c0_59 = arith.constant 0 : index
    %c0_60 = arith.constant 0 : index
    %171 = vector.load %arg13[%c0_59, %c0_60] : memref<1x32xf32, #tpu.memory_space<vmem>>, vector<1x32xf32>
    %172 = vector.broadcast %171 : vector<1x32xf32> to vector<2x32xf32>
    %173 = arith.addf %170, %172 : vector<2x32xf32>
    %174 = arith.addf %129, %173 : vector<2x32xf32>
    %c0_61 = arith.constant 0 : index
    %c0_62 = arith.constant 0 : index
    %175 = vector.load %arg14[%c0_61, %c0_62] : memref<1x32xf32, #tpu.memory_space<vmem>>, vector<1x32xf32>
    %c0_63 = arith.constant 0 : index
    %c0_64 = arith.constant 0 : index
    %176 = vector.load %arg15[%c0_63, %c0_64] : memref<1x32xf32, #tpu.memory_space<vmem>>, vector<1x32xf32>
    %cst_65 = arith.constant dense<0.000000e+00> : vector<2xf32>
    %177 = vector.multi_reduction <add>, %174, %cst_65 [1] : vector<2x32xf32> to vector<2xf32>
    %178 = vector.shape_cast %177 : vector<2xf32> to vector<2x1xf32>
    %cst_66 = arith.constant 3.200000e+01 : f32
    %179 = vector.broadcast %cst_66 : f32 to vector<2x1xf32>
    %180 = arith.divf %178, %179 : vector<2x1xf32>
    %181 = vector.broadcast %180 : vector<2x1xf32> to vector<2x32xf32>
    %182 = arith.subf %174, %181 : vector<2x32xf32>
    %183 = arith.mulf %182, %182 : vector<2x32xf32>
    %cst_67 = arith.constant dense<0.000000e+00> : vector<2xf32>
    %184 = vector.multi_reduction <add>, %183, %cst_67 [1] : vector<2x32xf32> to vector<2xf32>
    %185 = vector.shape_cast %184 : vector<2xf32> to vector<2x1xf32>
    %cst_68 = arith.constant 3.200000e+01 : f32
    %186 = vector.broadcast %cst_68 : f32 to vector<2x1xf32>
    %187 = arith.divf %185, %186 : vector<2x1xf32>
    %188 = vector.broadcast %180 : vector<2x1xf32> to vector<2x32xf32>
    %189 = arith.subf %174, %188 : vector<2x32xf32>
    %cst_69 = arith.constant 9.99999974E-6 : f32
    %190 = vector.broadcast %cst_69 : f32 to vector<2x1xf32>
    %191 = arith.addf %187, %190 : vector<2x1xf32>
    %192 = math.rsqrt %191 : vector<2x1xf32>
    %193 = vector.broadcast %192 : vector<2x1xf32> to vector<2x32xf32>
    %194 = arith.mulf %189, %193 : vector<2x32xf32>
    %195 = vector.broadcast %175 : vector<1x32xf32> to vector<2x32xf32>
    %196 = arith.mulf %194, %195 : vector<2x32xf32>
    %197 = vector.broadcast %176 : vector<1x32xf32> to vector<2x32xf32>
    %198 = arith.addf %196, %197 : vector<2x32xf32>
    %199 = vector.shape_cast %198 : vector<2x32xf32> to vector<1x2x32xf32>
    %c0_70 = arith.constant 0 : index
    %c0_71 = arith.constant 0 : index
    %c0_72 = arith.constant 0 : index
    %200 = vector.load %arg16[%c0_70, %c0_71, %c0_72] : memref<1x2x32xf32, #tpu.memory_space<vmem>>, vector<1x2x32xf32>
    tpu.vector_store %arg16[%c0_70, %c0_71, %c0_72], %199 {strides = array<i32>} : memref<1x2x32xf32, #tpu.memory_space<vmem>>, vector<1x2x32xf32>,
    return
  }
  func.func @transform_0(%arg0: i32) -> (i32, i32, i32) {
    %c0_i32 = arith.constant 0 : i32
    %c0_i32_0 = arith.constant 0 : i32
    %c0_i32_1 = arith.constant 0 : i32
    return %arg0, %c0_i32, %c0_i32_0 : i32, i32, i32
  }
  func.func @transform_1(%arg0: i32) -> (i32, i32) {
    %c0_i32 = arith.constant 0 : i32
    %c0_i32_0 = arith.constant 0 : i32
    %c0_i32_1 = arith.constant 0 : i32
    return %c0_i32, %c0_i32_0 : i32, i32
  }
  func.func @transform_2(%arg0: i32) -> (i32, i32) {
    %c0_i32 = arith.constant 0 : i32
    %c0_i32_0 = arith.constant 0 : i32
    %c0_i32_1 = arith.constant 0 : i32
    return %c0_i32, %c0_i32_0 : i32, i32
  }
  func.func @transform_3(%arg0: i32) -> (i32, i32) {
    %c0_i32 = arith.constant 0 : i32
    %c0_i32_0 = arith.constant 0 : i32
    %c0_i32_1 = arith.constant 0 : i32
    return %c0_i32, %c0_i32_0 : i32, i32
  }
  func.func @transform_4(%arg0: i32) -> (i32, i32) {
    %c0_i32 = arith.constant 0 : i32
    %c0_i32_0 = arith.constant 0 : i32
    %c0_i32_1 = arith.constant 0 : i32
    return %c0_i32, %c0_i32_0 : i32, i32
  }
  func.func @transform_5(%arg0: i32) -> (i32, i32) {
    %c0_i32 = arith.constant 0 : i32
    %c0_i32_0 = arith.constant 0 : i32
    %c0_i32_1 = arith.constant 0 : i32
    return %c0_i32, %c0_i32_0 : i32, i32
  }
  func.func @transform_6(%arg0: i32) -> (i32, i32) {
    %c0_i32 = arith.constant 0 : i32
    %c0_i32_0 = arith.constant 0 : i32
    %c0_i32_1 = arith.constant 0 : i32
    return %c0_i32, %c0_i32_0 : i32, i32
  }
  func.func @transform_7(%arg0: i32) -> (i32, i32) {
    %c0_i32 = arith.constant 0 : i32
    %c0_i32_0 = arith.constant 0 : i32
    %c0_i32_1 = arith.constant 0 : i32
    return %c0_i32, %c0_i32_0 : i32, i32
  }
  func.func @transform_8(%arg0: i32) -> (i32, i32) {
    %c0_i32 = arith.constant 0 : i32
    %c0_i32_0 = arith.constant 0 : i32
    %c0_i32_1 = arith.constant 0 : i32
    return %c0_i32, %c0_i32_0 : i32, i32
  }
  func.func @transform_9(%arg0: i32) -> (i32, i32) {
    %c0_i32 = arith.constant 0 : i32
    %c0_i32_0 = arith.constant 0 : i32
    %c0_i32_1 = arith.constant 0 : i32
    return %c0_i32, %c0_i32_0 : i32, i32
  }
  func.func @transform_10(%arg0: i32) -> (i32, i32) {
    %c0_i32 = arith.constant 0 : i32
    %c0_i32_0 = arith.constant 0 : i32
    %c0_i32_1 = arith.constant 0 : i32
    return %c0_i32, %c0_i32_0 : i32, i32
  }
  func.func @transform_11(%arg0: i32) -> (i32, i32) {
    %c0_i32 = arith.constant 0 : i32
    %c0_i32_0 = arith.constant 0 : i32
    %c0_i32_1 = arith.constant 0 : i32
    return %c0_i32, %c0_i32_0 : i32, i32
  }
  func.func @transform_12(%arg0: i32) -> (i32, i32) {
    %c0_i32 = arith.constant 0 : i32
    %c0_i32_0 = arith.constant 0 : i32
    %c0_i32_1 = arith.constant 0 : i32
    return %c0_i32, %c0_i32_0 : i32, i32
  }
  func.func @transform_13(%arg0: i32) -> (i32, i32) {
    %c0_i32 = arith.constant 0 : i32
    %c0_i32_0 = arith.constant 0 : i32
    %c0_i32_1 = arith.constant 0 : i32
    return %c0_i32, %c0_i32_0 : i32, i32
  }
  func.func @transform_14(%arg0: i32) -> (i32, i32) {
    %c0_i32 = arith.constant 0 : i32
    %c0_i32_0 = arith.constant 0 : i32
    %c0_i32_1 = arith.constant 0 : i32
    return %c0_i32, %c0_i32_0 : i32, i32
  }
  func.func @transform_15(%arg0: i32) -> (i32, i32, i32) {
    %c0_i32 = arith.constant 0 : i32
    %c0_i32_0 = arith.constant 0 : i32
    %c0_i32_1 = arith.constant 0 : i32
    return %arg0, %c0_i32, %c0_i32_0 : i32, i32, i32
  }
}

</mosaic_0001>

<bundles_post_ra>
// kernel: clip_transformer_forward.5
= control target key start
LH: loop header
LB: loop body
LE: loop exit
PB: predicated region body
PF: predicated region fallthrough
CT: control target
= control target key end

     0   :  { %s708_s24 = smov 0   ;;  %s784_s0 = inlined_call_operand.vmem [shape: f32[4,4,192], index: 0, kind: input, shape index: {}]   ;;  %s785_s1 = inlined_call_operand.vmem [shape: bf16[192,32], index: 1, kind: input, shape index: {}]   ;;  %s786_s2 = inlined_call_operand.vmem [shape: f32[1,32], index: 2, kind: input, shape index: {}]   ;;  %s787_s3 = inlined_call_operand.vmem [shape: f32[1,32], index: 3, kind: input, shape index: {}]   ;;  %s788_s4 = inlined_call_operand.vmem [shape: f32[4,32], index: 4, kind: input, shape index: {}]   ;;  %s789_s5 = inlined_call_operand.vmem [shape: f32[1,32], index: 5, kind: input, shape index: {}]   ;;  %s790_s6 = inlined_call_operand.vmem [shape: f32[1,32], index: 6, kind: input, shape index: {}]   ;;  %s791_s7 = inlined_call_operand.vmem [shape: bf16[4,5,32], index: 7, kind: output, shape index: {}]  }
   0x1 LB: > { %s600_s25 = sadd.s32 4294967295, %s664_s24   ;;  %p604_p0 = scmp.ge.s32.totalorder %s664_s24, 1  ;;  %s664_s24 = sphi %s708_s24, %s17_s24  }
   0x2   : > { %p239_p1 = scmp.lt.s32.totalorder %s664_s24, 3 }
   0x4   : > { %p240_p2 = pnand %p604_p0, %p239_p1 }
   0x5   : > { %v640_v0 = vld [vmem:[%s785_s1] sm:$0xff] (!%p240_p2)   ;;  %v666_v1 = vmov (!%p240_p2), 0   ;;  %s605_s28 = sshll.u32 (!%p240_p2), %s600_s25, 1  ;;  %v641_v2 = vld [vmem:[%s785_s1 + $0x8] sm:$0xff] (!%p240_p2)   ;;  %v642_v3 = vld [vmem:[%s785_s1 + $0x10] sm:$0xff] (!%p240_p2)   ;;  %v306_v4 = vlaneseq (!%p240_p2)  ;;  %vm424_vm0 = vcmask (!%p240_p2), 523264  }
   0x6   : > { %243 = sbr.rel (%p240_p2) target bundleno = 592 (0x250), region = 48  ;;  %428 = vmatprep.subr.bf16.mxu0 (!%p240_p2), %v666_v1  ;;  %p273_p3 = scmp.lt.s32.totalorder (!%p240_p2), %s605_s28, 3  ;;  %v643_v5 = vld [vmem:[%s785_s1 + $0x18] sm:$0xff] (!%p240_p2)   ;;  %v667_v10 = vmov (!%p240_p2), 1983009808   ;;  %v644_v13 = vld [vmem:[%s785_s1 + $0x20] sm:$0xff] (!%p240_p2)  }
   0x7   : > { %429 = vmatpush1.bf16.msra.mxu0 (!%p240_p2), %v640_v0  ;;  %v304_v11 = vunpack.c.l.s4 (!%p240_p2), %v667_v10  ;;  %v307_v12 = vshrl.u32 (!%p240_p2), %v306_v4, 7  ;;  %v645_v18 = vld [vmem:[%s785_s1 + $0x28] sm:$0xff] (!%p240_p2)   ;;  %v646_v22 = vld [vmem:[%s785_s1 + $0x30] sm:$0xff] (!%p240_p2)   ;;  %v647_v25 = vld [vmem:[%s785_s1 + $0x38] sm:$0xff] (!%p240_p2)   ;;  %vm484_vm1 = vcmask (!%p240_p2), 1040384   ;;  %vm489_vm2 = vcmask (!%p240_p2), 258048  }
   0x8   : > { %430 = vmatprep.subr.bf16.mxu0 (!%p240_p2), %v666_v1  ;;  %v648_v26 = vld [vmem:[%s785_s1 + $0x40] sm:$0xff] (!%p240_p2)   ;;  %v649_v27 = vld [vmem:[%s785_s1 + $0x48] sm:$0xff] (!%p240_p2)   ;;  %v650_v28 = vld [vmem:[%s785_s1 + $0x50] sm:$0xff] (!%p240_p2)   ;;  %vm535_vm3 = vcmask (!%p240_p2), 256000   ;;  %vm536_vm4 = vsmask.f32 (!%p240_p2), 2304 }
   0x9   : > { %v305_v15 = vunpack.c.0.s8 (!%p240_p2), %v304_v11  ;;  %v651_v29 = vld [vmem:[%s785_s1 + $0x58] sm:$0xff] (!%p240_p2)   ;;  %v471_v30 = vld [vmem:[%s788_s4] sm:$0xf] (!%p240_p2)  ;;  %vm537_vm5 = vmand (!%p240_p2), %vm535_vm3, %vm536_vm4 }
   0xa   : > { %v474_v31 = vld [vmem:[%s786_s2] sm:$0x1] (!%p240_p2) }
   0xb   : > { %431 = vmatpush1.bf16.msra.mxu0 (!%p240_p2), %v641_v2  ;;  %v308_v17 = vsub.s32 (!%p240_p2), %v305_v15, %v307_v12  ;;  %v475_v32 = vld [vmem:[%s787_s3] sm:$0x1] (!%p240_p2) }
   0xc   : > { %432 = vmatprep.subr.bf16.mxu0 (!%p240_p2), %v666_v1  ;;  %v476_v37 = vadd.f32 (!%p240_p2), %v475_v32, %v474_v31  ;;  %v625_v0 = vld [vmem:[%s789_s5] ss:$0 sm:$0xff] (!%p240_p2) }
   0xd   : > { %s793_s28 = smov (!%p273_p3, %s605_s28), 3  ;;  %v626_v2 = vld [vmem:[%s790_s6] ss:$0 sm:$0xff] }
   0xe   : > { %s629_s10 = sshll.u32 %s793_s28, 3  ;;  %s609_s17 = sshll.u32 %s793_s28, 2 }
   0xf   : > { %s277_s13 = scalar_lea.vmem %s784_s0, %s629_s10  ;;  %433 = vmatpush1.bf16.msra.mxu0 %v642_v3  ;;  %s283_s25 = scalar_lea.vmem %s791_s7, %s609_s17 }
  0x10   : > { %434 = vmatprep.subr.bf16.mxu0 %v666_v1  ;;  %v286_v6 = vld [vmem:[%s277_s13] sm:$0xff]  ;;  %v287_v7 = vld [vmem:[%s277_s13 + $0x8] sm:$0xff] }
  0x11   : > { %v290_v8 = vcombine.high %v286_v6, %v286_v6  ;;  %v291_v9 = vcombine.high %v287_v7, %v287_v7 }
  0x13   : > { %435 = vmatpush1.bf16.msra.mxu0 %v643_v5  ;;  %v610_v14 = vpack.c.bf16 %v290_v8, %v286_v6  ;;  %v611_v16 = vpack.c.bf16 %v291_v9, %v287_v7  ;;  %v538_v7 = vld [vmem:[%s283_s25] sm:$0x7] }
  0x14   : > { %436 = vmatprep.subr.bf16.mxu0 %v666_v1 }
  0x15   : > { %v309_v19 = vrot.slane %v610_v14, %v308_v17  ;;  %v317_v20 = vrot.slane %v611_v16, %v308_v17 }
  0x17   : > { %437 = vmatpush1.bf16.msra.mxu0 %v644_v13  ;;  %v342_v21 = vcombine.low %v309_v19, %v317_v20  ;;  %v541_v13 = vld [vmem:[%s283_s25 + $0x4] sm:$0x7] }
  0x18   : > { %438 = vmatprep.subr.bf16.mxu0 %v666_v1 }
  0x19   : > { %v349_v23 = vrot.slane %v342_v21, %v308_v17 }
  0x1b   : > { %439 = vmatpush1.bf16.msra.mxu0 %v645_v18  ;;  %v350_v24 = vcombine.high %v349_v23, %v349_v23 }
  0x1c   : > { %440 = vmatprep.subr.bf16.mxu0 %v666_v1 }
  0x1d   : > { %624 = vmatprep.mubr.msk.bf16.mxu0 %vm424_vm0, %v350_v24 }
  0x1f   : > { %441 = vmatpush1.bf16.msra.mxu0 %v646_v22 }
  0x20   : > { %442 = vmatprep.subr.bf16.mxu0 %v666_v1 }
  0x23   : > { %443 = vmatpush1.bf16.msra.mxu0 %v647_v25 }
  0x24   : > { %444 = vmatprep.subr.bf16.mxu0 %v666_v1 }
  0x27   : > { %445 = vmatpush1.bf16.msra.mxu0 %v648_v26 }
  0x28   : > { %446 = vmatprep.subr.bf16.mxu0 %v666_v1 }
  0x2b   : > { %447 = vmatpush1.bf16.msra.mxu0 %v649_v27 }
  0x2c   : > { %448 = vmatprep.subr.bf16.mxu0 %v666_v1 }
  0x2f   : > { %449 = vmatpush1.bf16.msra.mxu0 %v650_v28 }
  0x30   : > { %450 = vmatprep.subr.bf16.mxu0 %v666_v1 }
  0x33   : > { %451 = vmatpush1.bf16.msra.mxu0 %v651_v29 }
  0x36   : > { %461 = vmatmul.mubr.bf16.vlgmr.msra.gmra.mrb[0].mxu0 %v349_v23 }
 0x109   : > { %v462_v33 = vpop.f32.mrb[0].mxu0 }
 0x10a   : > { %v469_v34 = vcombine.high %v462_v33, %v462_v33  ;;  %v472_v35 = vadd.f32 %v471_v30, %v462_v33  ;;  %v464_v36 = vpop.f32.mrb[1].mxu0 }
 0x10b   : > { %v465_v38 = vpop.f32.mrb[2].mxu0 }
 0x10c   : > { %v473_v39 = vadd.f32 %v471_v30, %v469_v34  ;;  %v480_v40 = vrot.slane %v472_v35, 7  ;;  %v466_v41 = vpop.f32.mrb[3].mxu0 }
 0x10e   : > { %v481_v42 = vrot.slane %v473_v39, 7  ;;  %v485_v43 = vsel %vm484_vm1, %v476_v37, %v480_v40 }
 0x10f   : > { %v490_v44 = vsel %vm489_vm2, %v485_v43, 0.0 }
 0x110   : > { %491 = vadd.xlane.f32.xlu0 %v490_v44  ;;  %v486_v45 = vsel %vm484_vm1, %v476_v37, %v481_v42 }
 0x111   : > { %v493_v46 = vsel %vm489_vm2, %v486_v45, 0.0 }
 0x114   : > { %494 = vadd.xlane.f32.xlu0 %v493_v46 }
 0x19d   : > { %v492_v47 = vpop.xlane.xlu0 %491 }
 0x19e   : > { %v497_v48 = vmul.f32 0.03125, %v492_v47 }
 0x1a0   : > { %v499_v49 = vsub.f32 %v485_v43, %v497_v48 }
 0x1a1   : > { %v495_v50 = vpop.xlane.xlu0 %494 }
 0x1a2   : > { %v498_v51 = vmul.f32 0.03125, %v495_v50  ;;  %v501_v52 = vmul.f32 %v499_v49, %v499_v49 }
 0x1a4   : > { %v500_v53 = vsub.f32 %v486_v45, %v498_v51  ;;  %v503_v54 = vsel %vm489_vm2, %v501_v52, 0.0 }
 0x1a5   : > { %504 = vadd.xlane.f32.xlu1 %v503_v54 }
 0x1a6   : > { %v502_v55 = vmul.f32 %v500_v53, %v500_v53 }
 0x1a8   : > { %v506_v56 = vsel %vm489_vm2, %v502_v55, 0.0 }
 0x1a9   : > { %507 = vadd.xlane.f32.xlu1 %v506_v56 }
 0x232   : > { %v505_v57 = vpop.xlane.xlu1 %504 }
 0x233   : > { %v509_v58 = vmul.f32 0.03125, %v505_v57 }
 0x235   : > { %v511_v59 = vadd.f32 1e-05, %v509_v58 }
 0x236   : > { %v508_v60 = vpop.xlane.xlu1 %507 }
 0x237   : > { %654 = vrsqrt.f32 %v511_v59  ;;  %v510_v61 = vmul.f32 0.03125, %v508_v60 }
 0x239   : > { %v512_v62 = vadd.f32 1e-05, %v510_v61 }
 0x23b   : > { %656 = vrsqrt.f32 %v512_v62 }
 0x241   : > { %v655_v63 = vpop.eup %654 }
 0x242   : > { %v515_v1 = vmul.f32 %v655_v63, %v499_v49 }
 0x244   : > { %v523_v3 = vmul.f32 %v625_v0, %v515_v1 }
 0x245   : > { %v657_v4 = vpop.eup %656 }
 0x246   : > { %v531_v5 = vadd.f32 %v626_v2, %v523_v3  ;;  %v516_v6 = vmul.f32 %v657_v4, %v500_v53 }
 0x248   : > { %v533_v8 = vpack.c.bf16 %v531_v5, %v531_v5  ;;  %v524_v9 = vmul.f32 %v625_v0, %v516_v6 }
 0x24a   : > { %v539_v10 = vsel %vm537_vm5, %v533_v8, %v538_v7  ;;  %v532_v11 = vadd.f32 %v626_v2, %v524_v9 }
 0x24b   : > { %540 = vst [vmem:[%s283_s25] sm:$0x7] %v539_v10 }
 0x24c   : > { %v534_v12 = vpack.c.bf16 %v532_v11, %v532_v11 }
 0x24e   : > { %v542_v14 = vsel %vm537_vm5, %v534_v12, %v541_v13 }
 0x24f   : > { %543 = vst [vmem:[%s283_s25 + $0x4] sm:$0x7] %v542_v14 }
 0x250 PF: > { %s17_s24 = sadd.s32 1, %s664_s24  }
 0x251   : > { %p14_p4 = scmp.ge.s32.totalorder %s17_s24, 4  }
 0x253   :  { %16 = sbr.rel (!%p14_p4) target bundleno = 1 (0x1), region = 78 }

// kernel: clip_transformer_forward.8
= control target key start
LH: loop header
LB: loop body
LE: loop exit
PB: predicated region body
PF: predicated region fallthrough
CT: control target
= control target key end

     0   :  { %vm34_vm0 = vcmask 257024   ;;  %v268_v8 = vmov 0.0   ;;  %vm269_vm1 = vmmov 0   ;;  %vm80_vm2 = vcmask 261120   ;;  %s348_s0 = inlined_call_operand.vmem [shape: bf16[4,32], index: 0, kind: input, shape index: {}]   ;;  %s349_s3 = inlined_call_operand.vmem [shape: bf16[32,16], index: 3, kind: input, shape index: {}]   ;;  %s350_s1 = inlined_call_operand.vmem [shape: f32[1,32], index: 1, kind: input, shape index: {}]   ;;  %s351_s2 = inlined_call_operand.vmem [shape: f32[1,32], index: 2, kind: input, shape index: {}]   ;;  %s352_s6 = inlined_call_operand.vmem [shape: bf16[16,32], index: 6, kind: input, shape index: {}]   ;;  %s353_s4 = inlined_call_operand.vmem [shape: f32[1,16], index: 4, kind: input, shape index: {}]   ;;  %s354_s5 = inlined_call_operand.vmem [shape: f32[1,16], index: 5, kind: input, shape index: {}]   ;;  %s355_s7 = inlined_call_operand.vmem [shape: f32[1,32], index: 7, kind: input, shape index: {}]   ;;  %s356_s8 = inlined_call_operand.vmem [shape: bf16[4,32], index: 8, kind: output, shape index: {}]  }
   0x1   :  { %v30_v0 = vld [vmem:[%s348_s0] sm:$0x3]  ;;  %243 = vmatprep.subr.bf16.mxu0 %v268_v8  ;;  %247 = vmatprep.mubr.msk.bf16.mxu0 %vm269_vm1, %v268_v8  ;;  %v260_v10 = vld [vmem:[%s349_s3 + $0x8] sm:$0xff]   ;;  %vm125_vm3 = vcmask 125952   ;;  %vm177_vm4 = vcmask 130048   ;;  %vm222_vm5 = vcmask 254976  }
   0x2   :  { %v31_v1 = vunpack.c.l.bf16 %v30_v0  ;;  %v259_v9 = vld [vmem:[%s349_s3] sm:$0xff]   ;;  %251 = vmatprep.subr.bf16.mxu1 %v268_v8  ;;  %253 = vmatprep.mubr.msk.bf16.mxu1 %vm269_vm1, %v268_v8 }
   0x3   :  { %244 = vmatpush3.bf16.msra.mxu0 %v259_v9  ;;  %v228_v15 = vld [vmem:[%s350_s1] ss:$0 sm:$0xff] }
   0x4   :  { %v35_v2 = vsel %vm34_vm0, %v31_v1, 0.0  ;;  %245 = vmatprep.subr.bf16.mxu0 %v268_v8  ;;  %v229_v17 = vld [vmem:[%s351_s2] ss:$0 sm:$0xff] }
   0x5   :  { %36 = vadd.xlane.f32.xlu0 %v35_v2  ;;  %v261_v36 = vld [vmem:[%s352_s6] sm:$0xff]  }
   0x6   :  { %252 = vmatpush3.bf16.msra.mxu1 %v261_v36  ;;  %v233_v41 = vld [vmem:[%s353_s4] ss:$0 sm:$0xff] }
   0x7   :  { %246 = vmatpush3.bf16.msra.mxu0 %v260_v10  ;;  %v234_v43 = vld [vmem:[%s354_s5] ss:$0 sm:$0xff] }
   0x8   :  { %v235_v47 = vld [vmem:[%s355_s7] ss:$0 sm:$0xff] }
  0x92   :  { %v37_v3 = vpop.xlane.xlu0 %36 }
  0x93   :  { %v39_v4 = vmul.f32 0.03125, %v37_v3 }
  0x95   :  { %v40_v5 = vsub.f32 %v31_v1, %v39_v4 }
  0x97   :  { %v41_v6 = vmul.f32 %v40_v5, %v40_v5 }
  0x99   :  { %v42_v7 = vsel %vm34_vm0, %v41_v6, 0.0 }
  0x9a   :  { %43 = vadd.xlane.f32.xlu0 %v42_v7 }
 0x127   :  { %v44_v11 = vpop.xlane.xlu0 %43 }
 0x128   :  { %v45_v12 = vmul.f32 0.03125, %v44_v11 }
 0x12a   :  { %v46_v13 = vadd.f32 1e-05, %v45_v12 }
 0x12c   :  { %262 = vrsqrt.f32 %v46_v13 }
 0x136   :  { %v263_v14 = vpop.eup %262 }
 0x137   :  { %v48_v16 = vmul.f32 %v263_v14, %v40_v5 }
 0x139   :  { %v55_v18 = vmul.f32 %v228_v15, %v48_v16 }
 0x13b   :  { %v62_v19 = vadd.f32 %v229_v17, %v55_v18 }
 0x13d   :  { %v63_v20 = vpack.c.bf16 %v62_v19, %v62_v19 }
 0x13f   :  { %248 = vmatmul.mubr.msk.bf16.vlgmr.msra.gmra.mrb[0].mxu0 %vm80_vm2, %v63_v20 }
 0x212   :  { %v118_v21 = vpop.f32.mrb[0].mxu0 }
 0x213   :  { %v249_v22 = vpop.f32.mrb[1].mxu0  ;;  %v124_v23 = vmul.f32 %v118_v21, %v118_v21 }
 0x214   :  { %v121_v24 = vpop.f32.mrb[2].mxu0 }
 0x215   :  { %v250_v25 = vpop.f32.mrb[3].mxu0  ;;  %v126_v26 = vsel %vm125_vm3, %v124_v23, 0.0 }
 0x216   :  { %127 = vadd.xlane.f32.xlu1 %v126_v26 }
 0x2a3   :  { %v128_v27 = vpop.xlane.xlu1 %127 }
 0x2a4   :  { %264 = vrsqrt.f32 %v128_v27 }
 0x2ae   :  { %v265_v28 = vpop.eup %264 }
 0x2af   :  { %v130_v29 = vmul.f32 %v265_v28, %v118_v21 }
 0x2b1   :  { %v133_v30 = vsel %vm125_vm3, %v130_v29, 0.0 }
 0x2b2   :  { %134 = vadd.xlane.f32.xlu1 %v133_v30 }
 0x33f   :  { %v135_v31 = vpop.xlane.xlu1 %134 }
 0x340   :  { %v137_v32 = vmul.f32 0.0625, %v135_v31 }
 0x342   :  { %v138_v33 = vsub.f32 %v130_v29, %v137_v32 }
 0x344   :  { %v139_v34 = vmul.f32 %v138_v33, %v138_v33 }
 0x346   :  { %v140_v35 = vsel %vm125_vm3, %v139_v34, 0.0 }
 0x347   :  { %141 = vadd.xlane.f32.xlu0 %v140_v35 }
 0x3d4   :  { %v142_v37 = vpop.xlane.xlu0 %141 }
 0x3d5   :  { %v143_v38 = vmul.f32 0.0625, %v142_v37 }
 0x3d7   :  { %v144_v39 = vadd.f32 1e-05, %v143_v38 }
 0x3d9   :  { %266 = vrsqrt.f32 %v144_v39 }
 0x3e3   :  { %v267_v40 = vpop.eup %266 }
 0x3e4   :  { %v146_v42 = vmul.f32 %v267_v40, %v138_v33 }
 0x3e6   :  { %v153_v44 = vmul.f32 %v233_v41, %v146_v42 }
 0x3e8   :  { %v160_v45 = vadd.f32 %v234_v43, %v153_v44 }
 0x3ea   :  { %v161_v46 = vpack.c.bf16 %v160_v45, %v160_v45 }
 0x3ec   :  { %254 = vmatmul.mubr.msk.bf16.vlgmr.msra.gmra.mrb[0].mxu1 %vm177_vm4, %v161_v46 }
 0x4bf   :  { %v215_v48 = vpop.f32.mrb[0].mxu1 }
 0x4c0   :  { %v216_v49 = vadd.f32 %v235_v47, %v215_v48  ;;  %v255_v50 = vpop.f32.mrb[1].mxu1 }
 0x4c1   :  { %v218_v51 = vpop.f32.mrb[2].mxu1 }
 0x4c2   :  { %v221_v52 = vpack.c.bf16 %v216_v49, %v216_v49  ;;  %v256_v53 = vpop.f32.mrb[3].mxu1 }
 0x4c4   :  { %223 = vst.msk [vmem:[%s356_s8] sm:$0x3] %vm222_vm5, %v221_v52 }

// kernel: clip_transformer_forward.9
= control target key start
LH: loop header
LB: loop body
LE: loop exit
PB: predicated region body
PF: predicated region fallthrough
CT: control target
= control target key end

     0   :  { %s2146_s0 = inlined_call_operand.vmem [shape: bf16[2,2,32], index: 0, kind: input, shape index: {}]   ;;  %s2147_s1 = inlined_call_operand.vmem [shape: f32[1,32], index: 1, kind: input, shape index: {}]   ;;  %s2148_s2 = inlined_call_operand.vmem [shape: f32[1,32], index: 2, kind: input, shape index: {}]   ;;  %s2149_s3 = inlined_call_operand.vmem [shape: bf16[32,96], index: 3, kind: input, shape index: {}]   ;;  %s2150_s4 = inlined_call_operand.vmem [shape: f32[1,96], index: 4, kind: input, shape index: {}]   ;;  %s2151_s5 = inlined_call_operand.vmem [shape: bf16[32,32], index: 5, kind: input, shape index: {}]   ;;  %s2152_s6 = inlined_call_operand.vmem [shape: f32[1,32], index: 6, kind: input, shape index: {}]   ;;  %s2153_s7 = inlined_call_operand.vmem [shape: f32[1,32], index: 7, kind: input, shape index: {}]   ;;  %s2154_s8 = inlined_call_operand.vmem [shape: f32[1,32], index: 8, kind: input, shape index: {}]   ;;  %s2155_s9 = inlined_call_operand.vmem [shape: bf16[32,128], index: 9, kind: input, shape index: {}]   ;;  %s2156_s10 = inlined_call_operand.vmem [shape: f32[1,128], index: 10, kind: input, shape index: {}]   ;;  %s2157_s11 = inlined_call_operand.vmem [shape: bf16[128,32], index: 11, kind: input, shape index: {}]   ;;  %s2158_s12 = inlined_call_operand.vmem [shape: f32[1,32], index: 12, kind: input, shape index: {}]   ;;  %s2159_s13 = inlined_call_operand.vmem [shape: f32[1,32], index: 13, kind: input, shape index: {}]   ;;  %s2160_s14 = inlined_call_operand.vmem [shape: f32[1,32], index: 14, kind: input, shape index: {}]   ;;  %s2161_s15 = inlined_call_operand.hbm [shape: f32[2,2,32], index: 15, kind: output, shape index: {}]  }
   0x1   :  { %2162 = sst [smem:[#allocation5_spill]] %s2146_s0 }
   0x2   :  { %2163 = sst [smem:[#allocation6_spill]] %s2147_s1 }
   0x3   :  { %2164 = sst [smem:[#allocation7_spill]] %s2148_s2 }
   0x4   :  { %2165 = sst [smem:[#allocation8_spill]] %s2149_s3 }
   0x5   :  { %2166 = sst [smem:[#allocation9_spill]] %s2150_s4 }
   0x6   :  { %2167 = sst [smem:[#allocation10_spill]] %s2151_s5 }
   0x7   :  { %20 = vsyncpa [#allocation3], 0 }
   0x8   :  { %22 = vsyncpa [#allocation3 + $0x1], 0  ;;  %s1869_s18 = smov 0   ;;  %s1871_s19 = smov 0  }
   0x9   :  { %s1873_s20 = smov 0   ;;  %s1875_s21 = smov 0  }
   0xa LB: > { %s1890_s22 = sadd.s32 4294967295, %s1770_s21   ;;  %s1442_s23 = sadd.s32 4294967294, %s1770_s21   ;;  %s1770_s21 = sphi %s1875_s21, %s2179_s21   ;;  %s1766_s20 = sphi %s1873_s20, %s2178_s20   ;;  %s1762_s19 = sphi %s1871_s19, %s2177_s19   ;;  %s1758_s18 = sphi %s1869_s18, %s2176_s18  }
   0xb   : > { %s1894_s24 = sadd.s32 1, %s1770_s21   ;;  %s355_s25 = sadd.s32 1, %s1766_s20 }
   0xc   : > { %s352_s26 = ssub.s32 %s1770_s21, %s1894_s24  ;;  %p365_p0 = scmp.ne.s32.totalorder %s1766_s20, %s1762_s19 }
   0xd   : > { %p353_p1 = scmp.eq.s32.totalorder %s352_s26, 0  ;;  %p366_p2 = scmp.eq.s32.totalorder %s1890_s22, 1 }
   0xe   : > { %p371_p3 = scmp.ne.s32.totalorder %s1762_s19, %s1758_s18  ;;  %p372_p4 = scmp.eq.s32.totalorder %s1442_s23, 1 }
   0xf   : > { %s1905_s27 = scalar_select %p353_p1, %s1766_s20, %s355_s25  }
  0x10   : > { %p1907_p5 = por %p366_p2, %p365_p0  ;;  %p1911_p6 = por %p372_p4, %p371_p3 }
  0x11   : > { %p1445_p7 = scmp.ge.s32.totalorder %s1770_s21, 1  ;;  %p438_p8 = scmp.lt.s32.totalorder %s1770_s21, 3 }
  0x13   : > { %p439_p9 = pnand %p1445_p7, %p438_p8 }
  0x14   : > { %p484_p10 = scmp.lt.s32.totalorder (!%p439_p9), %s1890_s22, 1  ;;  %vm492_vm0 = vcmask (!%p439_p9), 254976   ;;  %s2170_s0 = sld [smem:[#allocation5_spill]] (!%p439_p9)  ;;  %v1772_v9 = vmov (!%p439_p9), 0.0   ;;  %vm1773_vm1 = vmmov (!%p439_p9), 0   ;;  %vm545_vm2 = vcmask (!%p439_p9), 261120  }
  0x15   : > { %442 = sbr.rel (%p439_p9) target bundleno = 2929 (0xb71), region = 80  ;;  %s2171_s3 = sld [smem:[#allocation8_spill]] (!%p439_p9)  ;;  %1521 = vmatprep.subr.bf16.mxu0 (!%p439_p9), %v1772_v9  ;;  %1525 = vmatprep.mubr.msk.bf16.mxu0 (!%p439_p9), %vm1773_vm1, %v1772_v9  ;;  %vm593_vm3 = vcmask (!%p439_p9), 64512   ;;  %vm641_vm4 = vcmask (!%p439_p9), 9216   ;;  %vm660_vm5 = vcmask (!%p439_p9), 1040384   ;;  %vm656_vm6 = vcmask (!%p439_p9), 15360  }
  0x16   : > { %1541 = vmatprep.subr.bf16.mxu1 (!%p439_p9), %v1772_v9  ;;  %1543 = vmatprep.mubr.msk.bf16.mxu1 (!%p439_p9), %vm1773_vm1, %v1772_v9  ;;  %s2172_s1 = sld [smem:[#allocation6_spill]] (!%p439_p9)  ;;  %s2173_s2 = sld [smem:[#allocation7_spill]] (!%p439_p9)  ;;  %vm1053_vm7 = vcmask (!%p439_p9), 130048   ;;  %vm1056_vm8 = vcmask (!%p439_p9), 195584  }
  0x17   : > { %s2174_s4 = sld [smem:[#allocation9_spill]] (!%p439_p9)  ;;  %s1774_s17 = smov (!%p439_p9), 120  }
  0x18   : > { %s1776_s25 = smov (!%p439_p9), 88   ;;  %s1777_s26 = smov (!%p439_p9), 80  }
  0x19   : > { %s1779_s16 = smov (!%p439_p9), 72   ;;  %s2175_s5 = sld [smem:[#allocation10_spill]] (!%p439_p9) }
  0x1b   : > { %v1668_v8 = vld [vmem:[%s2171_s3] sm:$0xff] (!%p439_p9)   ;;  %v1669_v10 = vld [vmem:[%s2171_s3 + $0x8] sm:$0xff] (!%p439_p9)  }
  0x1c   : > { %s485_s30 = scalar_select %p484_p10, %s1890_s22, 1  ;;  %1522 = vmatpush3.bf16.msra.mxu0 %v1668_v8  ;;  %v1447_v15 = vld [vmem:[%s2172_s1] ss:$0 sm:$0xff] }
  0x1d   : > { %1523 = vmatprep.subr.bf16.mxu0 %v1772_v9  ;;  %v1448_v17 = vld [vmem:[%s2173_s2] ss:$0 sm:$0xff]  ;;  %s481_s1 = sand.u32 1, %s1762_s19  }
  0x1e   : > { %s486_s23 = scalar_lea.vmem %s2170_s0, %s485_s30  ;;  %v1449_v21 = vld [vmem:[%s2174_s4] ss:$0 sm:$0xff]  ;;  %s1778_s30 = smov 112  }
  0x1f   : > { %v488_v0 = vld [vmem:[%s486_s23] sm:$0x1]  ;;  %s1775_s23 = smov 96   ;;  %s1780_s0 = smov 104  }
  0x20   : > { %v1922_v1 = vunpack.c.l.bf16 %v488_v0  ;;  %1524 = vmatpush3.bf16.msra.mxu0 %v1669_v10 }
  0x21   : > { %1529 = vmatprep.subr.bf16.mxu0 %v1772_v9 }
  0x22   : > { %v493_v2 = vsel %vm492_vm0, %v1922_v1, 0.0 }
  0x23   : > { %494 = vadd.xlane.f32.xlu0 %v493_v2 }
  0xb0   : > { %v495_v3 = vpop.xlane.xlu0 %494 }
  0xb1   : > { %v497_v4 = vmul.f32 0.03125, %v495_v3 }
  0xb3   : > { %v498_v5 = vsub.f32 %v1922_v1, %v497_v4 }
  0xb5   : > { %v499_v6 = vmul.f32 %v498_v5, %v498_v5 }
  0xb7   : > { %v500_v7 = vsel %vm492_vm0, %v499_v6, 0.0 }
  0xb8   : > { %501 = vadd.xlane.f32.xlu0 %v500_v7 }
 0x145   : > { %v502_v11 = vpop.xlane.xlu0 %501 }
 0x146   : > { %v503_v12 = vmul.f32 0.03125, %v502_v11 }
 0x148   : > { %v504_v13 = vadd.f32 1e-05, %v503_v12 }
 0x14a   : > { %1682 = vrsqrt.f32 %v504_v13 }
 0x154   : > { %v1683_v14 = vpop.eup %1682 }
 0x155   : > { %v506_v16 = vmul.f32 %v1683_v14, %v498_v5 }
 0x157   : > { %v513_v18 = vmul.f32 %v1447_v15, %v506_v16 }
 0x159   : > { %v520_v19 = vadd.f32 %v1448_v17, %v513_v18 }
 0x15b   : > { %v521_v20 = vpack.c.bf16 %v520_v19, %v520_v19 }
 0x15d   : > { %1526 = vmatmul.mubr.msk.bf16.vlgmr.msra.gmra.mrb[0].mxu0 %vm545_vm2, %v521_v20 }
 0x15e   : > { %1531 = vmatprep.mubr.msk.bf16.mxu0 %vm1773_vm1, %v1772_v9 }
 0x230   : > { %v583_v22 = vpop.f32.mrb[0].mxu0 }
 0x231   : > { %v584_v23 = vadd.f32 %v1449_v21, %v583_v22  ;;  %v1527_v24 = vpop.f32.mrb[1].mxu0 }
 0x232   : > { %v586_v25 = vpop.f32.mrb[2].mxu0 }
 0x233   : > { %v1954_v26 = vpack.c.bf16 %v584_v23, %v584_v23  ;;  %v1528_v27 = vpop.f32.mrb[3].mxu0 }
 0x235   : > { %705 = vrot.lane.b32.xlu0 %v1954_v26, %s1774_s17  ;;  %591 = vrot.lane.b32.xlu1 %v1954_v26, %s1775_s23  ;;  %s1782_s17 = smov 56   ;;  %s1783_s23 = smov 48  }
 0x239   : > { %707 = vrot.lane.b32.xlu1 %v1954_v26, %s1776_s25  ;;  %s1784_s25 = smov 40  }
 0x23d   : > { %819 = vrot.lane.b32.xlu1 %v1954_v26, %s1777_s26  ;;  %s1785_s26 = smov 8  }
 0x241   : > { %817 = vrot.lane.b32.xlu1 %v1954_v26, %s1778_s30  ;;  %s1446_s30 = sshll.u32 %s481_s1, 1 }
 0x245   : > { %931 = vrot.lane.b32.xlu1 %v1954_v26, %s1779_s16  ;;  %s1373_s16 = scalar_lea.sflag [#allocation3], %s481_s1 }
 0x249   : > { %929 = vrot.lane.b32.xlu1 %v1954_v26, %s1780_s0  ;;  %s1781_s0 = smov 64  }
 0x2a7   : > { %v592_v28 = vpop.permute.xlu1 %591  ;;  %v706_v33 = vpop.permute.xlu0 %705 }
 0x2a8   : > { %v598_v29 = vsel %vm593_vm3, %v592_v28, 0 }
 0x2a9   : > { %1530 = vmatpush3.bf16.xpose.msra.mxu0 %v598_v29 }
 0x2aa   : > { %1535 = vmatprep.subr.bf16.mxu0 %v1772_v9 }
 0x2ab   : > { %v708_v30 = vpop.permute.xlu1 %707 }
 0x2ac   : > { %v713_v31 = vsel %vm593_vm3, %v708_v30, 0 }
 0x2ad   : > { %1542 = vmatpush3.bf16.xpose.msra.mxu1 %v713_v31 }
 0x2ae   : > { %1553 = vmatprep.subr.bf16.mxu1 %v1772_v9 }
 0x2af   : > { %v820_v32 = vpop.permute.xlu1 %819 }
 0x2b0   : > { %1532 = vmatmul.mubr.msk.bf16.vlgmr.msra.gmra.mrb[4].mxu0 %vm593_vm3, %v1954_v26  ;;  %v825_v35 = vsel %vm593_vm3, %v820_v32, 0 }
 0x2b1   : > { %1537 = vmatprep.mubr.msk.bf16.mxu0 %vm1773_vm1, %v1772_v9 }
 0x2b3   : > { %v818_v34 = vpop.permute.xlu1 %817 }
 0x2b4   : > { %1544 = vmatmul.mubr.msk.bf16.vlgmr.msra.gmra.mrb[0].mxu1 %vm593_vm3, %v706_v33 }
 0x2b5   : > { %1554 = vmatpush3.bf16.xpose.msra.mxu1 %v825_v35  ;;  %1555 = vmatprep.mubr.msk.bf16.mxu1 %vm1773_vm1, %v1772_v9 }
 0x2b6   : > { %1565 = vmatprep.subr.bf16.mxu1 %v1772_v9 }
 0x2b7   : > { %v932_v36 = vpop.permute.xlu1 %931 }
 0x2b8   : > { %v937_v37 = vsel %vm593_vm3, %v932_v36, 0 }
 0x2bb   : > { %v930_v38 = vpop.permute.xlu1 %929 }
 0x2bc   : > { %1556 = vmatmul.mubr.msk.bf16.vlgmr.msra.gmra.mrb[4].mxu1 %vm593_vm3, %v818_v34 }
 0x2bd   : > { %1566 = vmatpush3.bf16.xpose.msra.mxu1 %v937_v37  ;;  %1567 = vmatprep.mubr.msk.bf16.mxu1 %vm1773_vm1, %v1772_v9 }
 0x2be   : > { %1577 = vmatprep.subr.bf16.mxu1 %v1772_v9 }
 0x2c4   : > { %1568 = vmatmul.mubr.msk.bf16.vlgmr.msra.gmra.mrb[8].mxu1 %vm593_vm3, %v930_v38 }
 0x2c5   : > { %1581 = vmatprep.mubr.msk.bf16.mxu1 %vm1773_vm1, %v1772_v9 }
 0x383   : > { %v634_v39 = vpop.f32.mrb[4].mxu0 }
 0x384   : > { %v640_v40 = vmul.f32 0.35355338, %v634_v39  ;;  %v1533_v41 = vpop.f32.mrb[5].mxu0 }
 0x385   : > { %v637_v42 = vpop.f32.mrb[6].mxu0 }
 0x386   : > { %v1534_v43 = vpop.f32.mrb[7].mxu0  ;;  %v642_v44 = vsel %vm641_vm4, %v640_v40, -inf }
 0x387   : > { %v749_v45 = vpop.f32.mrb[0].mxu1  ;;  %643 = vmax.xlane.f32.xlu1 %v642_v44 }
 0x388   : > { %v755_v46 = vmul.f32 0.35355338, %v749_v45  ;;  %v1545_v47 = vpop.f32.mrb[1].mxu1 }
 0x389   : > { %v752_v48 = vpop.f32.mrb[2].mxu1 }
 0x38a   : > { %v1546_v49 = vpop.f32.mrb[3].mxu1  ;;  %v756_v50 = vsel %vm641_vm4, %v755_v46, -inf }
 0x38b   : > { %757 = vmax.xlane.f32.xlu0 %v756_v50 }
 0x38f   : > { %v861_v51 = vpop.f32.mrb[4].mxu1 }
 0x390   : > { %v867_v52 = vmul.f32 0.35355338, %v861_v51  ;;  %v1557_v53 = vpop.f32.mrb[5].mxu1 }
 0x391   : > { %v864_v54 = vpop.f32.mrb[6].mxu1 }
 0x392   : > { %v1558_v55 = vpop.f32.mrb[7].mxu1  ;;  %v868_v56 = vsel %vm641_vm4, %v867_v52, -inf  ;;  %v1670_v54 = vld [vmem:[%s2175_s5] sm:$0xff]  }
 0x393   : > { %869 = vmax.xlane.f32.xlu1 %v868_v56  ;;  %1578 = vmatpush3.bf16.msra.mxu1 %v1670_v54  ;;  %v1671_v55 = vld [vmem:[%s2175_s5 + $0x8] sm:$0xff]  }
 0x394   : > { %1579 = vmatprep.subr.bf16.mxu1 %v1772_v9 }
 0x397   : > { %v973_v57 = vpop.f32.mrb[8].mxu1  ;;  %1580 = vmatpush3.bf16.msra.mxu1 %v1671_v55  ;;  %v1472_v55 = vld [vmem:[%s2158_s12] ss:$0 sm:$0xff] }
 0x398   : > { %v979_v58 = vmul.f32 0.35355338, %v973_v57  ;;  %v1569_v59 = vpop.f32.mrb[9].mxu1  ;;  %1593 = vmatprep.subr.bf16.mxu1 %v1772_v9 }
 0x399   : > { %v976_v60 = vpop.f32.mrb[10].mxu1 }
 0x39a   : > { %v1570_v61 = vpop.f32.mrb[11].mxu1  ;;  %v980_v62 = vsel %vm641_vm4, %v979_v58, -inf }
 0x39b   : > { %981 = vmax.xlane.f32.xlu0 %v980_v62 }
 0x414   : > { %v644_v63 = vpop.xlane.xlu1 %643 }
 0x415   : > { %v645_v0 = vsub.f32 %v640_v40, %v644_v63 }
 0x417   : > { %v646_v2 = vmul.f32 1.442695, %v645_v0 }
 0x418   : > { %v758_v3 = vpop.xlane.xlu0 %757 }
 0x419   : > { %1684 = vpow2.f32 %v646_v2  ;;  %v759_v4 = vsub.f32 %v755_v46, %v758_v3 }
 0x41b   : > { %v760_v5 = vmul.f32 1.442695, %v759_v4 }
 0x41d   : > { %1686 = vpow2.f32 %v760_v5 }
 0x420   : > { %v870_v16 = vpop.xlane.xlu1 %869 }
 0x421   : > { %v871_v17 = vsub.f32 %v867_v52, %v870_v16 }
 0x423   : > { %v1685_v6 = vpop.eup %1684  ;;  %v872_v18 = vmul.f32 1.442695, %v871_v17 }
 0x424   : > { %v648_v7 = vsel %vm641_vm4, %v1685_v6, 0.0 }
 0x425   : > { %649 = vadd.xlane.f32.xlu1 %v648_v7 }
 0x427   : > { %v1687_v8 = vpop.eup %1686 }
 0x428   : > { %v982_v10 = vpop.xlane.xlu0 %981  ;;  %v762_v11 = vsel %vm641_vm4, %v1687_v8, 0.0 }
 0x429   : > { %v983_v12 = vsub.f32 %v979_v58, %v982_v10  ;;  %763 = vadd.xlane.f32.xlu0 %v762_v11  ;;  %v1461_v11 = vld [vmem:[%s2152_s6] ss:$0 sm:$0xff] }
 0x42b   : > { %v984_v13 = vmul.f32 1.442695, %v983_v12 }
 0x42d   : > { %1688 = vpow2.f32 %v984_v13 }
 0x42e   : > { %1690 = vpow2.f32 %v872_v18 }
 0x436   : > { %654 = vrot.lane.b32.xlu1 %v1954_v26, %s1781_s0 }
 0x437   : > { %v1689_v14 = vpop.eup %1688 }
 0x438   : > { %v986_v15 = vsel %vm641_vm4, %v1689_v14, 0.0  ;;  %v1691_v19 = vpop.eup %1690 }
 0x439   : > { %987 = vadd.xlane.f32.xlu0 %v986_v15  ;;  %v874_v20 = vsel %vm641_vm4, %v1691_v19, 0.0 }
 0x44f   : > { %768 = vrot.lane.b32.xlu0 %v1954_v26, %s1782_s17 }
 0x45a   : > { %875 = vadd.xlane.f32.xlu1 %v874_v20 }
 0x46b   : > { %880 = vrot.lane.b32.xlu1 %v1954_v26, %s1783_s23  ;;  %s1786_s23 = smov 16  }
 0x46f   : > { %992 = vrot.lane.b32.xlu1 %v1954_v26, %s1784_s25  ;;  %s1787_s25 = smov 24  }
 0x4b2   : > { %v650_v21 = vpop.xlane.xlu1 %649 }
 0x4b3   : > { %1692 = vrcp.f32 %v650_v21 }
 0x4b6   : > { %v655_v22 = vpop.permute.xlu1 %654  ;;  %v764_v24 = vpop.xlane.xlu0 %763 }
 0x4b7   : > { %v662_v23 = vsel %vm660_vm5, %v655_v22, 0  ;;  %1694 = vrcp.f32 %v764_v24  ;;  %v1672_v24 = vld [vmem:[%s2155_s9] sm:$0xff]  }
 0x4b8   : > { %1536 = vmatpush3.bf16.msra.mxu0 %v662_v23 }
 0x4b9   : > { %1547 = vmatprep.subr.bf16.mxu0 %v1772_v9 }
 0x4bd   : > { %v1693_v25 = vpop.eup %1692 }
 0x4be   : > { %v652_v27 = vmul.f32 %v1693_v25, %v1685_v6 }
 0x4c0   : > { %v653_v28 = vpack.c.bf16 %v652_v27, %v652_v27 }
 0x4c1   : > { %v1695_v26 = vpop.eup %1694 }
 0x4c2   : > { %1538 = vmatmul.mubr.msk.bf16.vlgmr.msra.gmra.mrb[8].mxu0 %vm656_vm6, %v653_v28  ;;  %v766_v30 = vmul.f32 %v1695_v26, %v1687_v8 }
 0x4c3   : > { %1549 = vmatprep.mubr.msk.bf16.mxu0 %vm1773_vm1, %v1772_v9 }
 0x4c4   : > { %v767_v33 = vpack.c.bf16 %v766_v30, %v766_v30 }
 0x4c6   : > { %v988_v29 = vpop.xlane.xlu0 %987 }
 0x4ca   : > { %v769_v31 = vpop.permute.xlu0 %768 }
 0x4cb   : > { %v774_v32 = vsel %vm660_vm5, %v769_v31, 0  ;;  %v1466_v31 = vld [vmem:[%s2154_s8] ss:$0 sm:$0xff] }
 0x4cc   : > { %1548 = vmatpush3.bf16.msra.mxu0 %v774_v32 }
 0x4cd   : > { %1559 = vmatprep.subr.bf16.mxu0 %v1772_v9 }
 0x4cf   : > { %1550 = vmatmul.mubr.msk.bf16.vlgmr.msra.gmra.mrb[12].mxu0 %vm656_vm6, %v767_v33 }
 0x4d0   : > { %1561 = vmatprep.mubr.msk.bf16.mxu0 %vm1773_vm1, %v1772_v9 }
 0x4e7   : > { %v876_v34 = vpop.xlane.xlu1 %875 }
 0x4e8   : > { %1696 = vrcp.f32 %v876_v34 }
 0x4e9   : > { %1698 = vrcp.f32 %v988_v29  ;;  %v1465_v29 = vld [vmem:[%s2153_s7] ss:$0 sm:$0xff] }
 0x4eb   : > { %v881_v35 = vpop.permute.xlu1 %880 }
 0x4ec   : > { %v886_v36 = vsel %vm660_vm5, %v881_v35, 0  ;;  %v1674_v35 = vld [vmem:[%s2157_s11] sm:$0xff]  }
 0x4ed   : > { %1560 = vmatpush3.bf16.msra.mxu0 %v886_v36  ;;  %v1675_v36 = vld [vmem:[%s2157_s11 + $0x8] sm:$0xff]  }
 0x4ee   : > { %1571 = vmatprep.subr.bf16.mxu0 %v1772_v9 }
 0x4ef   : > { %v993_v39 = vpop.permute.xlu1 %992 }
 0x4f0   : > { %v998_v42 = vsel %vm660_vm5, %v993_v39, 0  ;;  %v1678_v39 = vld [vmem:[%s2157_s11 + $0x20] sm:$0xff]  }
 0x4f2   : > { %v1697_v37 = vpop.eup %1696 }
 0x4f3   : > { %v878_v38 = vmul.f32 %v1697_v37, %v1691_v19  ;;  %v1699_v41 = vpop.eup %1698  ;;  %v1676_v37 = vld [vmem:[%s2157_s11 + $0x10] sm:$0xff]  }
 0x4f4   : > { %v990_v43 = vmul.f32 %v1699_v41, %v1689_v14  ;;  %v1680_v41 = vld [vmem:[%s2157_s11 + $0x30] sm:$0xff]  }
 0x4f5   : > { %v879_v40 = vpack.c.bf16 %v878_v38, %v878_v38  ;;  %v1677_v38 = vld [vmem:[%s2157_s11 + $0x18] sm:$0xff]  }
 0x4f6   : > { %v991_v44 = vpack.c.bf16 %v990_v43, %v990_v43  ;;  %v1467_v43 = vld [vmem:[%s2156_s10] ss:$0 sm:$0xff] }
 0x4f7   : > { %1562 = vmatmul.mubr.msk.bf16.vlgmr.msra.gmra.mrb[16].mxu0 %vm656_vm6, %v879_v40  ;;  %v1679_v40 = vld [vmem:[%s2157_s11 + $0x28] sm:$0xff]  }
 0x4f8   : > { %1572 = vmatpush3.bf16.msra.mxu0 %v998_v42  ;;  %1573 = vmatprep.mubr.msk.bf16.mxu0 %vm1773_vm1, %v1772_v9  ;;  %v1681_v42 = vld [vmem:[%s2157_s11 + $0x38] sm:$0xff]  }
 0x4f9   : > { %1585 = vmatprep.subr.bf16.mxu0 %v1772_v9 }
 0x4ff   : > { %1574 = vmatmul.mubr.msk.bf16.vlgmr.msra.gmra.mrb[20].mxu0 %vm656_vm6, %v991_v44 }
 0x500   : > { %1589 = vmatprep.mubr.msk.bf16.mxu0 %vm1773_vm1, %v1772_v9  ;;  %1586 = vmatpush3.bf16.msra.mxu0 %v1672_v24 }
 0x501   : > { %1587 = vmatprep.subr.bf16.mxu0 %v1772_v9 }
 0x595   : > { %v698_v45 = vpop.f32.mrb[8].mxu0 }
 0x596   : > { %v1539_v46 = vpop.f32.mrb[9].mxu0  ;;  %v704_v4 = vpack.c.bf16 %v698_v45, %v698_v45 }
 0x597   : > { %v701_v47 = vpop.f32.mrb[10].mxu0 }
 0x598   : > { %v1540_v48 = vpop.f32.mrb[11].mxu0 }
 0x5a2   : > { %v810_v49 = vpop.f32.mrb[12].mxu0 }
 0x5a3   : > { %v816_v50 = vpack.c.bf16 %v810_v49, %v810_v49  ;;  %v1551_v51 = vpop.f32.mrb[13].mxu0 }
 0x5a4   : > { %v813_v52 = vpop.f32.mrb[14].mxu0 }
 0x5a5   : > { %1042 = vrot.lane.b32.xlu0 %v816_v50, %s1785_s26  ;;  %v1552_v53 = vpop.f32.mrb[15].mxu0  ;;  %s483_s26 = scalar_lea.vmem [#allocation2], %s1446_s30 }
 0x5a6   : > { %s1386_s2 = sshll.u32 %s483_s26, 4  ;;  %s2105_s2 = int_to_ptr.vmem [resolvable:$true] %s1386_s2 }
 0x5a7   : > { %s1708_s0 = scalar_lea.vmem %s2105_s2, 32 }
 0x5a8   : > { %p1709_p11 = scmp.ne.s32.totalorder %s2105_s2, %s1708_s0 }
 0x5aa   : > { %p1710_p12 = pnand %p1709_p11, %p1907_p5 }
 0x5ac   : > { %p1711_p13 = pneg %p1710_p12 }
 0x5ca   : > { %v922_v56 = vpop.f32.mrb[16].mxu0 }
 0x5cb   : > { %v928_v57 = vpack.c.bf16 %v922_v56, %v922_v56  ;;  %v1563_v58 = vpop.f32.mrb[17].mxu0 }
 0x5cc   : > { %v925_v59 = vpop.f32.mrb[18].mxu0 }
 0x5cd   : > { %1045 = vrot.lane.b32.xlu1 %v928_v57, %s1786_s23  ;;  %v1564_v60 = vpop.f32.mrb[19].mxu0 }
 0x5d2   : > { %v1034_v61 = vpop.f32.mrb[20].mxu0 }
 0x5d3   : > { %v1040_v62 = vpack.c.bf16 %v1034_v61, %v1034_v61  ;;  %v1575_v63 = vpop.f32.mrb[21].mxu0 }
 0x5d4   : > { %v1037_v0 = vpop.f32.mrb[22].mxu0 }
 0x5d5   : > { %1048 = vrot.lane.b32.xlu0 %v1040_v62, %s1787_s25  ;;  %v1576_v2 = vpop.f32.mrb[23].mxu0  ;;  %s1484_s25 = sshll.u32 %s1890_s22, 5  ;;  %s1788_s22 = smov [#allocation2]  }
 0x5d6   : > { %s2103_s5 = scalar_lea.hbm %s2161_s15, %s1484_s25  ;;  %s1712_s30 = sshll.u32 %s1788_s22, 4  ;;  %s1713_s30 = int_to_ptr.vmem [resolvable:$false] %s1712_s30 }
 0x5d7   : > { %s1714_s17 = scalar_lea.vmem %s1713_s30, 64  ;;  %p1715_p0 = scmp.lt.s32.totalorder %s2105_s2, %s1713_s30 }
 0x5d8   : > { %p1716_p1 = scmp.lt.s32.totalorder %s1714_s17, %s1708_s0 }
 0x5da   : > { %p1717_p2 = por %p1716_p1, %p1715_p0 }
 0x5dc   : > { %p1718_p3 = pnand %p1717_p2, %p1711_p13 }
 0x617   : > { %v1043_v3 = vpop.permute.xlu0 %1042 }
 0x618   : > { %v1052_v6 = vsel %vm593_vm3, %v704_v4, %v1043_v3 }
 0x63f   : > { %v1046_v5 = vpop.permute.xlu1 %1045 }
 0x640   : > { %v1055_v7 = vsel %vm1053_vm7, %v1052_v6, %v1046_v5 }
 0x647   : > { %v1049_v8 = vpop.permute.xlu0 %1048 }
 0x648   : > { %v1058_v10 = vsel %vm1056_vm8, %v1055_v7, %v1049_v8 }
 0x649   : > { %1582 = vmatmul.mubr.msk.bf16.vlgmr.msra.gmra.mrb[12].mxu1 %vm545_vm2, %v1058_v10  ;;  %v1481_v10 = vld [vmem:[%s2159_s13] ss:$0 sm:$0xff] }
 0x64a   : > { %1609 = vmatprep.mubr.msk.bf16.mxu1 %vm1773_vm1, %v1772_v9  ;;  %1594 = vmatpush3.bf16.msra.mxu1 %v1674_v35 }
 0x64b   : > { %1595 = vmatprep.subr.bf16.mxu1 %v1772_v9 }
 0x64e   : > { %1596 = vmatpush3.bf16.msra.mxu1 %v1675_v36 }
 0x64f   : > { %1597 = vmatprep.subr.bf16.mxu1 %v1772_v9 }
 0x652   : > { %1598 = vmatpush3.bf16.msra.mxu1 %v1676_v37 }
 0x653   : > { %1599 = vmatprep.subr.bf16.mxu1 %v1772_v9 }
 0x656   : > { %1600 = vmatpush3.bf16.msra.mxu1 %v1677_v38 }
 0x657   : > { %1601 = vmatprep.subr.bf16.mxu1 %v1772_v9 }
 0x65a   : > { %1602 = vmatpush3.bf16.msra.mxu1 %v1678_v39 }
 0x65b   : > { %1603 = vmatprep.subr.bf16.mxu1 %v1772_v9 }
 0x65e   : > { %1604 = vmatpush3.bf16.msra.mxu1 %v1679_v40 }
 0x65f   : > { %1605 = vmatprep.subr.bf16.mxu1 %v1772_v9 }
 0x662   : > { %1606 = vmatpush3.bf16.msra.mxu1 %v1680_v41 }
 0x663   : > { %1607 = vmatprep.subr.bf16.mxu1 %v1772_v9 }
 0x666   : > { %1608 = vmatpush3.bf16.msra.mxu1 %v1681_v42 }
 0x71c   : > { %v1118_v12 = vpop.f32.mrb[12].mxu1 }
 0x71d   : > { %v1119_v13 = vadd.f32 %v1461_v11, %v1118_v12  ;;  %v1583_v14 = vpop.f32.mrb[13].mxu1  ;;  %v1482_v12 = vld [vmem:[%s2160_s14] ss:$0 sm:$0xff] }
 0x71e   : > { %v1121_v15 = vpop.f32.mrb[14].mxu1 }
 0x71f   : > { %v2032_v16 = vadd.f32 %v1119_v13, %v1922_v1  ;;  %v1584_v17 = vpop.f32.mrb[15].mxu1  ;;  %v1673_v1 = vld [vmem:[%s2155_s9 + $0x8] sm:$0xff]  }
 0x720   : > { %1588 = vmatpush3.bf16.msra.mxu0 %v1673_v1 }
 0x721   : > { %v1127_v18 = vsel %vm492_vm0, %v2032_v16, 0.0 }
 0x722   : > { %1128 = vadd.xlane.f32.xlu1 %v1127_v18 }
 0x7af   : > { %v1129_v19 = vpop.xlane.xlu1 %1128 }
 0x7b0   : > { %v1130_v20 = vmul.f32 0.03125, %v1129_v19 }
 0x7b2   : > { %v1131_v21 = vsub.f32 %v2032_v16, %v1130_v20 }
 0x7b4   : > { %v1132_v22 = vmul.f32 %v1131_v21, %v1131_v21 }
 0x7b6   : > { %v1133_v23 = vsel %vm492_vm0, %v1132_v22, 0.0 }
 0x7b7   : > { %1134 = vadd.xlane.f32.xlu0 %v1133_v23 }
 0x844   : > { %v1135_v25 = vpop.xlane.xlu0 %1134 }
 0x845   : > { %v1136_v27 = vmul.f32 0.03125, %v1135_v25 }
 0x847   : > { %v1137_v28 = vadd.f32 1e-05, %v1136_v27 }
 0x849   : > { %1700 = vrsqrt.f32 %v1137_v28 }
 0x853   : > { %v1701_v26 = vpop.eup %1700 }
 0x854   : > { %v1139_v30 = vmul.f32 %v1701_v26, %v1131_v21 }
 0x856   : > { %v1146_v32 = vmul.f32 %v1465_v29, %v1139_v30 }
 0x858   : > { %v1153_v33 = vadd.f32 %v1466_v31, %v1146_v32 }
 0x85a   : > { %v1154_v34 = vpack.c.bf16 %v1153_v33, %v1153_v33 }
 0x85c   : > { %1590 = vmatmul.mubr.msk.bf16.vlgmr.msra.gmra.mrb[24].mxu0 %vm545_vm2, %v1154_v34 }
 0x92f   : > { %v1215_v44 = vpop.f32.mrb[24].mxu0 }
 0x930   : > { %v1216_v45 = vadd.f32 %v1467_v43, %v1215_v44  ;;  %v1591_v46 = vpop.f32.mrb[25].mxu0 }
 0x931   : > { %v1218_v47 = vpop.f32.mrb[26].mxu0 }
 0x932   : > { %v1471_v48 = vmul.f32 -1.702, %v1216_v45  ;;  %v1592_v49 = vpop.f32.mrb[27].mxu0 }
 0x934   : > { %v1223_v50 = vmul.f32 1.442695, %v1471_v48 }
 0x936   : > { %1702 = vpow2.f32 %v1223_v50 }
 0x940   : > { %v1703_v51 = vpop.eup %1702 }
 0x941   : > { %v1225_v52 = vadd.f32 1.0, %v1703_v51 }
 0x943   : > { %1704 = vrcp.f32 %v1225_v52 }
 0x94d   : > { %v1705_v9 = vpop.eup %1704 }
 0x94e   : > { %v1228_v53 = vmul.f32 %v1705_v9, %v1216_v45 }
 0x950   : > { %v1229_v54 = vpack.c.bf16 %v1228_v53, %v1228_v53 }
 0x952   : > { %1610 = vmatmul.mubr.bf16.vlgmr.msra.gmra.mrb[16].mxu1 %v1229_v54 }
 0xa25   : > { %v1335_v56 = vpop.f32.mrb[16].mxu1 }
 0xa26   : > { %v1336_v57 = vadd.f32 %v1472_v55, %v1335_v56  ;;  %v1611_v58 = vpop.f32.mrb[17].mxu1 }
 0xa27   : > { %v1338_v59 = vpop.f32.mrb[18].mxu1 }
 0xa28   : > { %v1612_v60 = vpop.f32.mrb[19].mxu1  ;;  %v1341_v61 = vadd.f32 %v1336_v57, %v2032_v16 }
 0xa2a   : > { %v1344_v62 = vsel %vm492_vm0, %v1341_v61, 0.0 }
 0xa2b   : > { %1345 = vadd.xlane.f32.xlu0 %v1344_v62 }
 0xab8   : > { %v1346_v63 = vpop.xlane.xlu0 %1345 }
 0xab9   : > { %v1347_v0 = vmul.f32 0.03125, %v1346_v63 }
 0xabb   : > { %v1348_v2 = vsub.f32 %v1341_v61, %v1347_v0 }
 0xabd   : > { %v1349_v3 = vmul.f32 %v1348_v2, %v1348_v2 }
 0xabf   : > { %v1350_v4 = vsel %vm492_vm0, %v1349_v3, 0.0 }
 0xac0   : > { %1351 = vadd.xlane.f32.xlu1 %v1350_v4 }
 0xb4d   : > { %v1352_v5 = vpop.xlane.xlu1 %1351 }
 0xb4e   : > { %v1353_v6 = vmul.f32 0.03125, %v1352_v5 }
 0xb50   : > { %v1354_v7 = vadd.f32 1e-05, %v1353_v6 }
 0xb52   : > { %1706 = vrsqrt.f32 %v1354_v7 }
 0xb5c   : > { %v1707_v8 = vpop.eup %1706 }
 0xb5d   : > { %v1356_v11 = vmul.f32 %v1707_v8, %v1348_v2 }
 0xb5f   : > { %v1363_v13 = vmul.f32 %v1481_v10, %v1356_v11 }
 0xb61   : > { %v1370_v14 = vadd.f32 %v1482_v12, %v1363_v13 }
 0xb63   : > { %1371 = vst.msk [vmem:[%s483_s26] sm:$0x3] %vm492_vm0, %v1370_v14 }
 0xb64   : > { %1721 = shalt.err (!%p1718_p3)
}
 0xb65   : > { %s1722_s3 = scalar_lea.hbm %s2103_s5, 32  ;;  %s1726_s23 = scalar_lea.hbm %s2161_s15, 64 }
 0xb66   : > { %p1723_p4 = scmp.ne.s32.totalorder %s2103_s5, %s1722_s3  ;;  %p1727_p9 = scmp.lt.u32.totalorder %s2103_s5, %s2161_s15 }
 0xb67   : > { %p1728_p10 = scmp.lt.u32.totalorder %s1726_s23, %s1722_s3  ;;  %p1730_p12 = scmp.lt.u32.totalorder %s1722_s3, %s2103_s5 }
 0xb68   : > { %p1724_p7 = pnand %p1723_p4, %p1907_p5 }
 0xb69   : > { %p1729_p11 = por %p1728_p10, %p1727_p9 }
 0xb6a   : > { %p1725_p8 = pneg %p1724_p7 }
 0xb6b   : > { %p1731_p13 = por %p1730_p12, %p1729_p11 }
 0xb6d   : > { %p1732_p0 = pnand %p1731_p13, %p1725_p8 }
 0xb6f   : > { %1735 = shalt.err (!%p1732_p0)
}
 0xb70   : > { %1613 = dma.vmem_to_hbm [thread:$0]  (%p1907_p5), %s2105_s2, 32, %s2103_s5, %s1373_s16  }
 0xb71 PF: > { %p1619_p1 = scmp.ge.s32.totalorder %s1770_s21, 2  ;;  %s1398_s0 = sand.u32 1, %s1758_s18  }
 0xb72   : > { %s1399_s22 = scalar_lea.sflag [#allocation3], %s1398_s0 }
 0xb73   : > { %p1616_p2 = pnand %p1619_p1, %p1911_p6 }
 0xb75   : > { %1753 = dma.done.wait (!%p1616_p2), %s1399_s22, 32  }
 0xb76   : > { %1755 = vsyncadd (!%p1616_p2), %s1399_s22, 4294967264  ;;  %p25_p3 = scmp.ge.s32.totalorder %s1894_s24, 4   ;;  %s2176_s18 = smov %s1762_s19 }
 0xb77   : > { %s2177_s19 = smov %s1766_s20  ;;  %s2178_s20 = smov %s1905_s27 }
 0xb78   : > { %s2179_s21 = smov %s1894_s24  ;;  %27 = sbr.rel (!%p25_p3) target bundleno = 10 (0xa), region = 115 }
 0xb7f   :  { %1404 = vsyncpa [#allocation3], 1 }
 0xb80   :  { %1406 = vsyncpa [#allocation3 + $0x1], 1 }

// kernel: clip_transformer_forward.6
= control target key start
LH: loop header
LB: loop body
LE: loop exit
PB: predicated region body
PF: predicated region fallthrough
CT: control target
= control target key end

     0   :  { %s3836_s25 = smov 0   ;;  %s4501_s0 = inlined_call_operand.vmem [shape: bf16[4,5,32], index: 0, kind: input, shape index: {}]   ;;  %s4502_s1 = inlined_call_operand.vmem [shape: f32[1,32], index: 1, kind: input, shape index: {}]   ;;  %s4503_s2 = inlined_call_operand.vmem [shape: f32[1,32], index: 2, kind: input, shape index: {}]   ;;  %s4504_s3 = inlined_call_operand.vmem [shape: bf16[32,96], index: 3, kind: input, shape index: {}]   ;;  %s4505_s4 = inlined_call_operand.vmem [shape: f32[1,96], index: 4, kind: input, shape index: {}]   ;;  %s4506_s5 = inlined_call_operand.vmem [shape: bf16[32,32], index: 5, kind: input, shape index: {}]   ;;  %s4507_s6 = inlined_call_operand.vmem [shape: f32[1,32], index: 6, kind: input, shape index: {}]   ;;  %s4508_s7 = inlined_call_operand.vmem [shape: f32[1,32], index: 7, kind: input, shape index: {}]   ;;  %s4509_s8 = inlined_call_operand.vmem [shape: f32[1,32], index: 8, kind: input, shape index: {}]   ;;  %s4510_s9 = inlined_call_operand.vmem [shape: bf16[32,128], index: 9, kind: input, shape index: {}]   ;;  %s4511_s10 = inlined_call_operand.vmem [shape: f32[1,128], index: 10, kind: input, shape index: {}]   ;;  %s4512_s11 = inlined_call_operand.vmem [shape: bf16[128,32], index: 11, kind: input, shape index: {}]   ;;  %s4513_s12 = inlined_call_operand.vmem [shape: f32[1,32], index: 12, kind: input, shape index: {}]   ;;  %s4514_s13 = inlined_call_operand.vmem [shape: bf16[4,5,32], index: 13, kind: output, shape index: {}]  }
   0x1 LB: > { %s3401_s26 = sadd.s32 4294967295, %s3746_s25   ;;  %p3405_p0 = scmp.ge.s32.totalorder %s3746_s25, 1  ;;  %s3746_s25 = sphi %s3836_s25, %s23_s25  }
   0x2   : > { %p388_p1 = scmp.lt.s32.totalorder %s3746_s25, 3 }
   0x4   : > { %p389_p2 = pnand %p3405_p0, %p388_p1 }
   0x6   : > { %392 = sbr.rel (%p389_p2) target bundleno = 4312 (0x10d8), region = 72 }
   0xd   : > { %s3406_s27 = sshll.u32 %s3401_s26, 1  ;;  %v455_v0 = vlaneseq  ;;  %v3748_v1 = vmov 1966171168   ;;  %vm607_vm0 = vcmask 261120   ;;  %vm611_vm1 = vcmask 254976   ;;  %s3751_s26 = smov 96  }
   0xe   : > { %p433_p3 = scmp.lt.s32.totalorder %s3406_s27, 3  ;;  %v453_v2 = vunpack.c.l.s4 %v3748_v1  ;;  %vm3750_vm2 = vmmov 0   ;;  %vm1207_vm3 = vcmask 64512   ;;  %vm1330_vm4 = vcmask 36864   ;;  %s3752_s29 = smov 64  }
   0xf   : > { %v456_v3 = vshrl.u32 %v455_v0, 7  ;;  %s3753_s30 = smov 88   ;;  %vm1361_vm5 = vcmask 1041408   ;;  %vm1362_vm6 = vcmask 1042432   ;;  %vm1357_vm7 = vcmask 39936   ;;  %s3756_s15 = smov 56  }
  0x10   : > { %s4523_s27 = smov (!%p433_p3, %s3406_s27), 3  ;;  %v454_v4 = vunpack.c.0.s8 %v453_v2  ;;  %s3757_s16 = smov 80   ;;  %vm2159_vm8 = vcmask 195584   ;;  %vm2154_vm9 = vcmask 130048   ;;  %vm3336_vm10 = vcmask 256000  }
  0x11   : > { %s3407_s28 = sshll.u32 %s4523_s27, 2  ;;  %v3904_v44 = vsub.s32 0, %v456_v3  ;;  %v3906_v45 = vsub.s32 1, %v456_v3  ;;  %v3908_v46 = vsub.s32 2, %v456_v3  ;;  %v3910_v47 = vsub.s32 3, %v456_v3  ;;  %s3758_s17 = smov 112  }
  0x12   : > { %s436_s14 = scalar_lea.vmem %s4501_s0, %s3407_s28  ;;  %v3852_v5 = vsub.s32 %v454_v4, %v456_v3  ;;  %v3912_v49 = vsub.s32 4, %v456_v3  ;;  %v3914_v50 = vsub.s32 5, %v456_v3  ;;  %v3916_v51 = vsub.s32 6, %v456_v3  ;;  %s3759_s18 = smov 48  }
  0x13   : > { %v445_v6 = vld [vmem:[%s436_s14] sm:$0x7]  ;;  %v446_v7 = vld [vmem:[%s436_s14 + $0x4] sm:$0x7]  ;;  %v3918_v52 = vsub.s32 7, %v456_v3  ;;  %s3755_s14 = smov 120  }
  0x14   : > { %v447_v8 = vunpack.c.l.bf16 %v445_v6  ;;  %v448_v9 = vunpack.c.l.bf16 %v446_v7  ;;  %s3760_s19 = smov 72   ;;  %s3761_s20 = smov 104   ;;  %vm3337_vm11 = vsmask.f32 2304 }
  0x15   : > { %4519 = vst [vmem:[#allocation2_spill] sm:$0xff] %v3918_v52  ;;  %s3762_s21 = smov 40   ;;  %s3763_s22 = smov 8   ;;  %vm3338_vm12 = vmand %vm3336_vm10, %vm3337_vm11 }
  0x16   : > { %v451_v10 = vcombine.high %v447_v8, %v447_v8  ;;  %v458_v11 = vrot.slane %v447_v8, %v3852_v5  ;;  %v497_v12 = vrot.slane %v448_v9, %v3852_v5  ;;  %v490_v13 = vcombine.high %v448_v9, %v448_v9  ;;  %s3764_s23 = smov 16   ;;  %s3765_s24 = smov 24  }
  0x18   : > { %v465_v14 = vrot.slane %v451_v10, %v3852_v5  ;;  %v466_v15 = vcombine.high %v458_v11, %v458_v11  ;;  %v3858_v16 = vrot.slane %v458_v11, %v3852_v5  ;;  %v505_v17 = vcombine.high %v497_v12, %v497_v12 }
  0x19   : > { %v3861_v18 = vrot.slane %v497_v12, %v3852_v5  ;;  %v504_v19 = vrot.slane %v490_v13, %v3852_v5 }
  0x1a   : > { %v3865_v20 = vrot.slane %v465_v14, %v3852_v5  ;;  %v3868_v21 = vrot.slane %v466_v15, %v3852_v5  ;;  %v3871_v22 = vrot.slane %v505_v17, %v3852_v5  ;;  %v3922_v54 = vcombine.high %v3858_v16, %v3858_v16 }
  0x1b   : > { %v3875_v23 = vcombine.high %v3861_v18, %v3861_v18  ;;  %v3878_v24 = vrot.slane %v504_v19, %v3852_v5 }
  0x1c   : > { %v541_v25 = vcombine.low %v3858_v16, %v3868_v21  ;;  %v3410_v26 = vcombine.high %v3858_v16, %v3868_v21  ;;  %v543_v27 = vcombine.low %v3865_v20, %v3861_v18  ;;  %v3888_v28 = vcombine.high %v3871_v22, %v3871_v22 }
  0x1d   : > { %v544_v29 = vcombine.low %v3871_v22, %v3875_v23  ;;  %v3926_v55 = vcombine.high %v3868_v21, %v3868_v21 }
  0x1e   : > { %v551_v30 = vrot.slane %v541_v25, %v3852_v5  ;;  %v558_v31 = vrot.slane %v3410_v26, %v3852_v5  ;;  %v565_v32 = vrot.slane %v543_v27, %v3852_v5  ;;  %v590_v33 = vcombine.low %v3888_v28, %v3878_v24 }
  0x1f   : > { %v572_v34 = vrot.slane %v544_v29, %v3852_v5 }
  0x20   : > { %v573_v35 = vcombine.low %v551_v30, %v558_v31  ;;  %v597_v37 = vrot.slane %v590_v33, %v3852_v5 }
  0x21   : > { %v574_v36 = vcombine.low %v565_v32, %v572_v34 }
  0x22   : > { %v581_v38 = vrot.slane %v573_v35, %v3852_v5  ;;  %v604_v41 = vrot.slane %v597_v37, %v3852_v5 }
  0x23   : > { %v588_v39 = vrot.slane %v574_v36, %v3852_v5 }
  0x24   : > { %v612_v43 = vsel %vm611_vm1, %v604_v41, 0.0 }
  0x25   : > { %v589_v40 = vcombine.low %v581_v38, %v588_v39 }
  0x27   : > { %v608_v42 = vsel %vm607_vm0, %v589_v40, 0.0 }
  0x28   : > { %609 = vadd.xlane.f32.xlu0 %v608_v42 }
  0x2c   : > { %613 = vadd.xlane.f32.xlu0 %v612_v43 }
  0xb5   : > { %v610_v48 = vpop.xlane.xlu0 %609 }
  0xb6   : > { %v616_v53 = vmul.f32 0.03125, %v610_v48 }
  0xb8   : > { %v623_v56 = vrot.slane %v616_v53, %v3904_v44  ;;  %v627_v57 = vrot.slane %v616_v53, %v3906_v45  ;;  %v631_v58 = vrot.slane %v616_v53, %v3908_v46  ;;  %v635_v59 = vrot.slane %v616_v53, %v3910_v47 }
  0xb9   : > { %v614_v60 = vpop.xlane.xlu0 %613  ;;  %v639_v61 = vrot.slane %v616_v53, %v3912_v49  ;;  %v643_v62 = vrot.slane %v616_v53, %v3914_v50  ;;  %v647_v63 = vrot.slane %v616_v53, %v3916_v51  ;;  %v651_v0 = vrot.slane %v616_v53, %v3918_v52 }
  0xba   : > { %v617_v1 = vmul.f32 0.03125, %v614_v60  ;;  %v3937_v2 = vsub.f32 %v3858_v16, %v623_v56  ;;  %v3940_v3 = vsub.f32 %v3868_v21, %v627_v57  ;;  %v3943_v4 = vsub.f32 %v3922_v54, %v631_v58 }
  0xbb   : > { %v3946_v6 = vsub.f32 %v3926_v55, %v635_v59  ;;  %v3949_v7 = vsub.f32 %v3865_v20, %v639_v61  ;;  %v3952_v8 = vsub.f32 %v3861_v18, %v643_v62  ;;  %v3955_v9 = vsub.f32 %v3871_v22, %v647_v63  ;;  %v3678_v61 = vld [vmem:[%s4504_s3] sm:$0xff]   ;;  %v3679_v63 = vld [vmem:[%s4504_s3 + $0x8] sm:$0xff]  }
  0xbc   : > { %v655_v10 = vrot.slane %v617_v1, %v3904_v44  ;;  %v659_v11 = vrot.slane %v617_v1, %v3906_v45  ;;  %v3960_v12 = vsub.f32 %v3875_v23, %v651_v0  ;;  %v680_v13 = vmul.f32 %v3937_v2, %v3937_v2  ;;  %v3411_v0 = vld [vmem:[%s4502_s1] ss:$0 sm:$0xff] }
  0xbd   : > { %v681_v14 = vmul.f32 %v3940_v3, %v3940_v3  ;;  %v682_v15 = vmul.f32 %v3943_v4, %v3943_v4  ;;  %v683_v17 = vmul.f32 %v3946_v6, %v3946_v6  ;;  %v684_v19 = vmul.f32 %v3949_v7, %v3949_v7  ;;  %v3412_v1 = vld [vmem:[%s4503_s2] ss:$0 sm:$0xff] }
  0xbe   : > { %v3973_v25 = vsub.f32 %v3888_v28, %v655_v10  ;;  %v3976_v26 = vsub.f32 %v3878_v24, %v659_v11  ;;  %v685_v27 = vmul.f32 %v3952_v8, %v3952_v8  ;;  %v686_v29 = vmul.f32 %v3955_v9, %v3955_v9 }
  0xbf   : > { %v687_v30 = vmul.f32 %v3960_v12, %v3960_v12  ;;  %v700_v31 = vcombine.low %v680_v13, %v681_v14  ;;  %v701_v32 = vcombine.low %v682_v15, %v683_v17  ;;  %v4515_v62 = vmov 0.0  }
  0xc0   : > { %v688_v33 = vmul.f32 %v3973_v25, %v3973_v25  ;;  %v689_v34 = vmul.f32 %v3976_v26, %v3976_v26  ;;  %v702_v35 = vcombine.low %v684_v19, %v685_v27  ;;  %3512 = vmatprep.subr.bf16.mxu0 %v4515_v62  ;;  %3516 = vmatprep.mubr.msk.bf16.mxu0 %vm3750_vm2, %v4515_v62 }
  0xc1   : > { %v703_v36 = vcombine.low %v686_v29, %v687_v30  ;;  %v710_v37 = vrot.slane %v700_v31, %v3852_v5  ;;  %v717_v38 = vrot.slane %v701_v32, %v3852_v5  ;;  %3513 = vmatpush3.bf16.msra.mxu0 %v3678_v61  ;;  %3532 = vmatprep.subr.bf16.mxu1 %v4515_v62 }
  0xc2   : > { %v724_v39 = vrot.slane %v702_v35, %v3852_v5  ;;  %v749_v40 = vcombine.low %v688_v33, %v689_v34  ;;  %3514 = vmatprep.subr.bf16.mxu0 %v4515_v62  ;;  %3534 = vmatprep.mubr.msk.bf16.mxu1 %vm3750_vm2, %v4515_v62  ;;  %v845_v10 = vcombine.high %v3411_v0, %v3411_v0 }
  0xc3   : > { %v731_v41 = vrot.slane %v703_v36, %v3852_v5  ;;  %v732_v42 = vcombine.low %v710_v37, %v717_v38  ;;  %v917_v11 = vcombine.high %v3412_v1, %v3412_v1  ;;  %v852_v15 = vrot.slane %v3411_v0, %v3852_v5 }
  0xc4   : > { %v756_v53 = vrot.slane %v749_v40, %v3852_v5  ;;  %v859_v17 = vrot.slane %v845_v10, %v3852_v5  ;;  %v924_v27 = vrot.slane %v3412_v1, %v3852_v5 }
  0xc5   : > { %v733_v43 = vcombine.low %v724_v39, %v731_v41  ;;  %v740_v48 = vrot.slane %v732_v42, %v3852_v5  ;;  %3515 = vmatpush3.bf16.msra.mxu0 %v3679_v63  ;;  %v931_v29 = vrot.slane %v917_v11, %v3852_v5  ;;  %v860_v32 = vcombine.high %v852_v15, %v852_v15 }
  0xc6   : > { %v763_v58 = vrot.slane %v756_v53, %v3852_v5  ;;  %3520 = vmatprep.subr.bf16.mxu0 %v4515_v62  ;;  %v861_v33 = vcombine.high %v859_v17, %v859_v17  ;;  %v932_v35 = vcombine.high %v924_v27, %v924_v27  ;;  %v868_v37 = vrot.slane %v852_v15, %v3852_v5 }
  0xc7   : > { %v747_v56 = vrot.slane %v733_v43, %v3852_v5  ;;  %v933_v36 = vcombine.high %v931_v29, %v931_v29  ;;  %v882_v38 = vrot.slane %v860_v32, %v3852_v5  ;;  %v875_v39 = vrot.slane %v859_v17, %v3852_v5 }
  0xc8   : > { %v769_v60 = vsel %vm611_vm1, %v763_v58, 0.0  ;;  %v889_v40 = vrot.slane %v861_v33, %v3852_v5  ;;  %v940_v41 = vrot.slane %v924_v27, %v3852_v5  ;;  %v947_v42 = vrot.slane %v931_v29, %v3852_v5 }
  0xc9   : > { %v748_v57 = vcombine.low %v740_v48, %v747_v56  ;;  %v954_v43 = vrot.slane %v932_v35, %v3852_v5  ;;  %v961_v48 = vrot.slane %v933_v36, %v3852_v5  ;;  %v890_v53 = vcombine.high %v868_v37, %v868_v37 }
  0xca   : > { %v891_v56 = vcombine.high %v875_v39, %v875_v39  ;;  %v893_v58 = vcombine.high %v889_v40, %v889_v40  ;;  %v963_v61 = vcombine.high %v947_v42, %v947_v42 }
  0xcb   : > { %v766_v59 = vsel %vm607_vm0, %v748_v57, 0.0  ;;  %v892_v57 = vcombine.high %v882_v38, %v882_v38  ;;  %v964_v63 = vcombine.high %v954_v43, %v954_v43  ;;  %v965_v0 = vcombine.high %v961_v48, %v961_v48 }
  0xcc   : > { %767 = vadd.xlane.f32.xlu1 %v766_v59 }
  0xd0   : > { %770 = vadd.xlane.f32.xlu1 %v769_v60  ;;  %v962_v60 = vcombine.high %v940_v41, %v940_v41 }
 0x159   : > { %v768_v13 = vpop.xlane.xlu1 %767 }
 0x15a   : > { %v772_v14 = vmul.f32 0.03125, %v768_v13 }
 0x15c   : > { %v774_v19 = vadd.f32 1e-05, %v772_v14 }
 0x15d   : > { %v771_v30 = vpop.xlane.xlu1 %770 }
 0x15e   : > { %3692 = vrsqrt.f32 %v774_v19  ;;  %v773_v31 = vmul.f32 0.03125, %v771_v30 }
 0x160   : > { %v775_v34 = vadd.f32 1e-05, %v773_v31 }
 0x162   : > { %3694 = vrsqrt.f32 %v775_v34 }
 0x168   : > { %v3693_v59 = vpop.eup %3692 }
 0x169   : > { %v783_v1 = vrot.slane %v3693_v59, %v3904_v44  ;;  %v787_v10 = vrot.slane %v3693_v59, %v3906_v45  ;;  %v791_v11 = vrot.slane %v3693_v59, %v3908_v46  ;;  %v795_v13 = vrot.slane %v3693_v59, %v3910_v47 }
 0x16a   : > { %v799_v14 = vrot.slane %v3693_v59, %v3912_v49  ;;  %v803_v15 = vrot.slane %v3693_v59, %v3914_v50  ;;  %v807_v17 = vrot.slane %v3693_v59, %v3916_v51  ;;  %v811_v19 = vrot.slane %v3693_v59, %v3918_v52 }
 0x16b   : > { %v830_v27 = vmul.f32 %v783_v1, %v3937_v2  ;;  %v831_v29 = vmul.f32 %v787_v10, %v3940_v3  ;;  %v832_v30 = vmul.f32 %v791_v11, %v3943_v4  ;;  %v833_v31 = vmul.f32 %v795_v13, %v3946_v6 }
 0x16c   : > { %v3695_v32 = vpop.eup %3694  ;;  %v834_v33 = vmul.f32 %v799_v14, %v3949_v7  ;;  %v835_v34 = vmul.f32 %v803_v15, %v3952_v8  ;;  %v836_v35 = vmul.f32 %v807_v17, %v3955_v9  ;;  %v837_v36 = vmul.f32 %v811_v19, %v3960_v12 }
 0x16d   : > { %v815_v62 = vrot.slane %v3695_v32, %v3904_v44  ;;  %v819_v59 = vrot.slane %v3695_v32, %v3906_v45  ;;  %v902_v2 = vmul.f32 %v868_v37, %v830_v27  ;;  %v903_v1 = vmul.f32 %v882_v38, %v831_v29 }
 0x16e   : > { %v904_v3 = vmul.f32 %v890_v53, %v832_v30  ;;  %v905_v10 = vmul.f32 %v892_v57, %v833_v31  ;;  %v906_v4 = vmul.f32 %v875_v39, %v834_v33  ;;  %v907_v11 = vmul.f32 %v889_v40, %v835_v34 }
 0x16f   : > { %v838_v6 = vmul.f32 %v815_v62, %v3973_v25  ;;  %v839_v7 = vmul.f32 %v819_v59, %v3976_v26  ;;  %v908_v13 = vmul.f32 %v891_v56, %v836_v35  ;;  %v909_v8 = vmul.f32 %v893_v58, %v837_v36 }
 0x170   : > { %v974_v14 = vadd.f32 %v940_v41, %v902_v2  ;;  %v975_v9 = vadd.f32 %v954_v43, %v903_v1  ;;  %v976_v15 = vadd.f32 %v962_v60, %v904_v3  ;;  %v977_v12 = vadd.f32 %v964_v63, %v905_v10 }
 0x171   : > { %v910_v17 = vmul.f32 %v868_v37, %v838_v6  ;;  %v911_v19 = vmul.f32 %v882_v38, %v839_v7  ;;  %v978_v52 = vadd.f32 %v947_v42, %v906_v4  ;;  %v979_v32 = vadd.f32 %v961_v48, %v907_v11 }
 0x172   : > { %v980_v27 = vadd.f32 %v963_v61, %v908_v13  ;;  %v981_v29 = vadd.f32 %v965_v0, %v909_v8  ;;  %v994_v53 = vcombine.low %v974_v14, %v975_v9  ;;  %v995_v57 = vcombine.low %v976_v15, %v977_v12  ;;  %v3413_v0 = vld [vmem:[%s4505_s4] ss:$0 sm:$0xff] }
 0x173   : > { %v982_v39 = vadd.f32 %v940_v41, %v910_v17  ;;  %v983_v40 = vadd.f32 %v954_v43, %v911_v19  ;;  %v996_v30 = vcombine.low %v978_v52, %v979_v32  ;;  %v4520_v63 = vmov 0.0  }
 0x174   : > { %v997_v25 = vcombine.low %v980_v27, %v981_v29  ;;  %v1004_v26 = vrot.slane %v994_v53, %v3852_v5  ;;  %v1011_v62 = vrot.slane %v995_v57, %v3852_v5 }
 0x175   : > { %v1018_v56 = vrot.slane %v996_v30, %v3852_v5  ;;  %v1043_v58 = vcombine.low %v982_v39, %v983_v40 }
 0x176   : > { %v1025_v37 = vrot.slane %v997_v25, %v3852_v5  ;;  %v1026_v38 = vcombine.low %v1004_v26, %v1011_v62 }
 0x177   : > { %v1050_v42 = vrot.slane %v1043_v58, %v3852_v5 }
 0x178   : > { %v1027_v48 = vcombine.low %v1018_v56, %v1025_v37  ;;  %v1034_v60 = vrot.slane %v1026_v38, %v3852_v5 }
 0x179   : > { %v1057_v52 = vrot.slane %v1050_v42, %v3852_v5 }
 0x17a   : > { %v1041_v41 = vrot.slane %v1027_v48, %v3852_v5 }
 0x17c   : > { %v1042_v43 = vcombine.low %v1034_v60, %v1041_v41 }
 0x17e   : > { %v1060_v61 = vpack.c.bf16 %v1057_v52, %v1042_v43 }
 0x180   : > { %3517 = vmatmul.mubr.msk.bf16.vlgmr.msra.gmra.mrb[0].mxu0 %vm607_vm0, %v1060_v61 }
 0x181   : > { %3522 = vmatprep.mubr.msk.bf16.mxu0 %vm3750_vm2, %v4520_v63 }
 0x253   : > { %v1121_v31 = vpop.f32.mrb[0].mxu0 }
 0x254   : > { %v3518_v33 = vpop.f32.mrb[1].mxu0  ;;  %v1122_v35 = vadd.f32 %v3413_v0, %v1121_v31 }
 0x255   : > { %v1124_v34 = vpop.f32.mrb[2].mxu0 }
 0x256   : > { %v1125_v36 = vadd.f32 %v3413_v0, %v1124_v34  ;;  %v3519_v59 = vpop.f32.mrb[3].mxu0 }
 0x258   : > { %v1128_v2 = vpack.c.bf16 %v1125_v36, %v1122_v35  ;;  %v3417_v1 = vpack.c.bf16 %v1125_v36, %v1125_v36  ;;  %v3754_v35 = vmov 65535  }
 0x259   : > { %v1363_v36 = vsel %vm1361_vm5, 4294967295, %v3754_v35 }
 0x25a   : > { %v1137_v3 = vrot.slane %v1128_v2, %v3852_v5  ;;  %v1144_v10 = vrot.slane %v3417_v1, %v3852_v5  ;;  %v4097_v1 = vsel %vm1362_vm6, %v1363_v36, 0 }
 0x25c   : > { %v1145_v4 = vcombine.high %v1137_v3, %v1137_v3  ;;  %v1152_v11 = vrot.slane %v1137_v3, %v3852_v5  ;;  %v1159_v13 = vrot.slane %v1144_v10, %v3852_v5 }
 0x25e   : > { %v1166_v6 = vrot.slane %v1145_v4, %v3852_v5  ;;  %v1167_v7 = vcombine.high %v1152_v11, %v1152_v11  ;;  %v1178_v32 = vunpack.i.h.s16 %v1159_v13 }
 0x260   : > { %v1168_v8 = vcombine.high %v1166_v6, %v1166_v6  ;;  %v1173_v14 = vunpack.i.l.s16 %v1167_v7  ;;  %v1174_v9 = vunpack.i.h.s16 %v1167_v7  ;;  %v1182_v15 = vcombine.low %v1152_v11, %v1166_v6 }
 0x261   : > { %v1271_v30 = vrot.slane %v1178_v32, %v3852_v5 }
 0x262   : > { %v1176_v12 = vunpack.i.h.s16 %v1168_v8  ;;  %v1189_v17 = vrot.slane %v1182_v15, %v3852_v5  ;;  %v1196_v19 = vrot.slane %v1173_v14, %v3852_v5  ;;  %v3419_v29 = vpack.i.b16 %v1168_v8, %v1174_v9 }
 0x264   : > { %v1197_v27 = vcombine.low %v1189_v17, %v1196_v19  ;;  %v3420_v53 = vpack.i.b16 %v1159_v13, %v1176_v12 }
 0x266   : > { %v4072_v57 = vrot.slane %v1197_v27, %v3852_v5  ;;  %v1257_v39 = vcombine.low %v3419_v29, %v3420_v53 }
 0x268   : > { %v1264_v40 = vrot.slane %v1257_v39, %v3852_v5  ;;  %1205 = vrot.lane.b32.xlu0 %v4072_v57, %s3751_s26 }
 0x26a   : > { %v1272_v25 = vcombine.low %v1264_v40, %v1271_v30 }
 0x26c   : > { %v4078_v26 = vrot.slane %v1272_v25, %v3852_v5 }
 0x26e   : > { %1280 = vrot.lane.b32.xlu1 %v4078_v26, %s3751_s26 }
 0x2da   : > { %v1206_v62 = vpop.permute.xlu0 %1205 }
 0x2db   : > { %v1212_v56 = vsel %vm1207_vm3, %v1206_v62, 0 }
 0x2dc   : > { %3521 = vmatpush3.bf16.xpose.msra.mxu0 %v1212_v56 }
 0x2dd   : > { %3526 = vmatprep.subr.bf16.mxu0 %v4520_v63 }
 0x2e0   : > { %v1281_v58 = vpop.permute.xlu1 %1280 }
 0x2e1   : > { %v1286_v37 = vsel %vm1207_vm3, %v1281_v58, 0 }
 0x2e3   : > { %3523 = vmatmul.mubr.msk.bf16.vlgmr.msra.gmra.mrb[4].mxu0 %vm1207_vm3, %v4072_v57 }
 0x2e4   : > { %3527 = vmatpush3.bf16.xpose.msra.mxu0 %v1286_v37  ;;  %3528 = vmatprep.mubr.msk.bf16.mxu0 %vm3750_vm2, %v4520_v63 }
 0x2e5   : > { %3538 = vmatprep.subr.bf16.mxu0 %v4520_v63 }
 0x2eb   : > { %3529 = vmatmul.mubr.msk.bf16.vlgmr.msra.gmra.mrb[8].mxu0 %vm1207_vm3, %v4078_v26 }
 0x2ec   : > { %3540 = vmatprep.mubr.msk.bf16.mxu0 %vm3750_vm2, %v4520_v63 }
 0x3b6   : > { %v1248_v38 = vpop.f32.mrb[4].mxu0 }
 0x3b7   : > { %v1328_v42 = vmul.f32 0.35355338, %v1248_v38  ;;  %v3524_v48 = vpop.f32.mrb[5].mxu0 }
 0x3b8   : > { %v1251_v60 = vpop.f32.mrb[6].mxu0 }
 0x3b9   : > { %v3525_v41 = vpop.f32.mrb[7].mxu0  ;;  %v1331_v52 = vsel %vm1330_vm4, %v1328_v42, -inf }
 0x3ba   : > { %1332 = vmax.xlane.f32.xlu1 %v1331_v52 }
 0x3be   : > { %v1322_v43 = vpop.f32.mrb[8].mxu0 }
 0x3bf   : > { %v1329_v61 = vmul.f32 0.35355338, %v1322_v43  ;;  %v3530_v0 = vpop.f32.mrb[9].mxu0 }
 0x3c0   : > { %v1325_v31 = vpop.f32.mrb[10].mxu0 }
 0x3c1   : > { %v3531_v33 = vpop.f32.mrb[11].mxu0  ;;  %v1334_v34 = vsel %vm1330_vm4, %v1329_v61, -inf }
 0x3c2   : > { %1335 = vmax.xlane.f32.xlu0 %v1334_v34 }
 0x3cb   : > { %1408 = vrot.lane.b32.xlu1 %v4078_v26, %s3752_s29 }
 0x3cf   : > { %1460 = vrot.lane.b32.xlu1 %v4072_v57, %s3753_s30 }
 0x447   : > { %v1333_v59 = vpop.xlane.xlu1 %1332 }
 0x448   : > { %v1337_v2 = vsub.f32 %v1328_v42, %v1333_v59 }
 0x44a   : > { %v1339_v3 = vmul.f32 1.442695, %v1337_v2 }
 0x44b   : > { %v1409_v10 = vpop.permute.xlu1 %1408 }
 0x44c   : > { %3696 = vpow2.f32 %v1339_v3  ;;  %v1414_v4 = vand.u32 %v1409_v10, %v4097_v1 }
 0x44e   : > { %3539 = vmatpush3.bf16.msra.mxu0 %v1414_v4 }
 0x44f   : > { %v1336_v11 = vpop.xlane.xlu0 %1335  ;;  %3550 = vmatprep.subr.bf16.mxu0 %v4520_v63  ;;  %v1461_v12 = vpop.permute.xlu1 %1460 }
 0x450   : > { %v1338_v6 = vsub.f32 %v1329_v61, %v1336_v11  ;;  %v1466_v39 = vsel %vm1207_vm3, %v1461_v12, 0 }
 0x452   : > { %v1341_v7 = vmul.f32 1.442695, %v1338_v6 }
 0x454   : > { %3698 = vpow2.f32 %v1341_v7 }
 0x456   : > { %v3697_v13 = vpop.eup %3696 }
 0x457   : > { %v1343_v8 = vsel %vm1330_vm4, %v3697_v13, 0.0 }
 0x458   : > { %1344 = vadd.xlane.f32.xlu0 %v1343_v8 }
 0x45e   : > { %v3699_v14 = vpop.eup %3698 }
 0x45f   : > { %v1346_v9 = vsel %vm1330_vm4, %v3699_v14, 0.0 }
 0x460   : > { %1347 = vadd.xlane.f32.xlu1 %v1346_v9 }
 0x46e   : > { %1355 = vrot.lane.b32.xlu0 %v4072_v57, %s3752_s29 }
 0x471   : > { %1510 = vrot.lane.b32.xlu1 %v4078_v26, %s3753_s30 }
 0x472   : > { %1458 = vrot.lane.b32.xlu0 %v4072_v57, %s3755_s14 }
 0x475   : > { %1508 = vrot.lane.b32.xlu1 %v4078_v26, %s3755_s14 }
 0x4e5   : > { %v1345_v15 = vpop.xlane.xlu0 %1344 }
 0x4e6   : > { %3700 = vrcp.f32 %v1345_v15 }
 0x4e9   : > { %v1356_v17 = vpop.permute.xlu0 %1355 }
 0x4ea   : > { %v1366_v19 = vand.u32 %v4097_v1, %v1356_v17 }
 0x4ec   : > { %3533 = vmatpush3.bf16.msra.mxu1 %v1366_v19 }
 0x4ed   : > { %v1348_v32 = vpop.xlane.xlu1 %1347  ;;  %3544 = vmatprep.subr.bf16.mxu1 %v4520_v63  ;;  %v1459_v56 = vpop.permute.xlu0 %1458 }
 0x4ee   : > { %3702 = vrcp.f32 %v1348_v32 }
 0x4f0   : > { %v3701_v27 = vpop.eup %3700 }
 0x4f1   : > { %v1351_v29 = vmul.f32 %v3701_v27, %v3697_v13  ;;  %v1511_v25 = vpop.permute.xlu1 %1510 }
 0x4f2   : > { %v1516_v58 = vsel %vm1207_vm3, %v1511_v25, 0 }
 0x4f3   : > { %v1353_v53 = vpack.c.bf16 %v1351_v29, %v1351_v29 }
 0x4f5   : > { %3535 = vmatmul.mubr.msk.bf16.vlgmr.msra.gmra.mrb[0].mxu1 %vm1357_vm7, %v1353_v53  ;;  %v1509_v37 = vpop.permute.xlu1 %1508 }
 0x4f6   : > { %3545 = vmatpush3.bf16.xpose.msra.mxu1 %v1466_v39  ;;  %3546 = vmatprep.mubr.msk.bf16.mxu1 %vm3750_vm2, %v4520_v63 }
 0x4f7   : > { %3556 = vmatprep.subr.bf16.mxu1 %v4520_v63 }
 0x4f8   : > { %v3703_v40 = vpop.eup %3702 }
 0x4f9   : > { %v1352_v30 = vmul.f32 %v3703_v40, %v3699_v14 }
 0x4fb   : > { %v1354_v62 = vpack.c.bf16 %v1352_v30, %v1352_v30 }
 0x4fd   : > { %3541 = vmatmul.mubr.msk.bf16.vlgmr.msra.gmra.mrb[12].mxu0 %vm1357_vm7, %v1354_v62  ;;  %3547 = vmatmul.mubr.msk.bf16.vlgmr.msra.gmra.mrb[4].mxu1 %vm1207_vm3, %v1459_v56 }
 0x4fe   : > { %3551 = vmatpush3.bf16.xpose.msra.mxu0 %v1516_v58  ;;  %3552 = vmatprep.mubr.msk.bf16.mxu0 %vm3750_vm2, %v4520_v63 }
 0x4ff   : > { %3562 = vmatprep.subr.bf16.mxu0 %v4520_v63  ;;  %3558 = vmatprep.mubr.msk.bf16.mxu1 %vm3750_vm2, %v4520_v63 }
 0x505   : > { %3553 = vmatmul.mubr.msk.bf16.vlgmr.msra.gmra.mrb[16].mxu0 %vm1207_vm3, %v1509_v37 }
 0x506   : > { %3564 = vmatprep.mubr.msk.bf16.mxu0 %vm3750_vm2, %v4520_v63 }
 0x5c8   : > { %v4125_v38 = vpop.f32.mrb[0].mxu1 }
 0x5c9   : > { %v3536_v42 = vpop.f32.mrb[1].mxu1 }
 0x5ca   : > { %v1405_v48 = vpop.f32.mrb[2].mxu1 }
 0x5cb   : > { %v3537_v60 = vpop.f32.mrb[3].mxu1 }
 0x5d0   : > { %v4127_v41 = vpop.f32.mrb[12].mxu0  ;;  %v1502_v52 = vpop.f32.mrb[4].mxu1 }
 0x5d1   : > { %v1558_v43 = vmul.f32 0.35355338, %v1502_v52  ;;  %v3542_v61 = vpop.f32.mrb[13].mxu0  ;;  %v3548_v0 = vpop.f32.mrb[5].mxu1 }
 0x5d2   : > { %v1453_v31 = vpop.f32.mrb[14].mxu0  ;;  %v1505_v33 = vpop.f32.mrb[6].mxu1 }
 0x5d3   : > { %v3543_v34 = vpop.f32.mrb[15].mxu0  ;;  %v3549_v35 = vpop.f32.mrb[7].mxu1  ;;  %v1560_v36 = vsel %vm1330_vm4, %v1558_v43, -inf }
 0x5d4   : > { %1561 = vmax.xlane.f32.xlu0 %v1560_v36 }
 0x5d8   : > { %v1552_v59 = vpop.f32.mrb[16].mxu0 }
 0x5d9   : > { %v1559_v2 = vmul.f32 0.35355338, %v1552_v59  ;;  %v3554_v3 = vpop.f32.mrb[17].mxu0 }
 0x5da   : > { %v1555_v10 = vpop.f32.mrb[18].mxu0 }
 0x5db   : > { %v3555_v4 = vpop.f32.mrb[19].mxu0  ;;  %v1563_v11 = vsel %vm1330_vm4, %v1559_v2, -inf }
 0x5dc   : > { %1564 = vmax.xlane.f32.xlu1 %v1563_v11 }
 0x5ed   : > { %1632 = vrot.lane.b32.xlu1 %v4078_v26, %s3756_s15 }
 0x5f1   : > { %1684 = vrot.lane.b32.xlu1 %v4072_v57, %s3757_s16 }
 0x5f5   : > { %1734 = vrot.lane.b32.xlu1 %v4078_v26, %s3757_s16 }
 0x5f9   : > { %1732 = vrot.lane.b32.xlu1 %v4078_v26, %s3758_s17 }
 0x661   : > { %v1562_v6 = vpop.xlane.xlu0 %1561 }
 0x662   : > { %v1566_v7 = vsub.f32 %v1558_v43, %v1562_v6 }
 0x664   : > { %v1568_v13 = vmul.f32 1.442695, %v1566_v7 }
 0x666   : > { %3704 = vpow2.f32 %v1568_v13 }
 0x669   : > { %v1565_v8 = vpop.xlane.xlu1 %1564 }
 0x66a   : > { %v1567_v14 = vsub.f32 %v1559_v2, %v1565_v8 }
 0x66c   : > { %v1570_v9 = vmul.f32 1.442695, %v1567_v14 }
 0x66d   : > { %v1633_v15 = vpop.permute.xlu1 %1632 }
 0x66e   : > { %3706 = vpow2.f32 %v1570_v9  ;;  %v1638_v12 = vand.u32 %v1633_v15, %v4097_v1 }
 0x670   : > { %v3705_v17 = vpop.eup %3704  ;;  %3563 = vmatpush3.bf16.msra.mxu0 %v1638_v12 }
 0x671   : > { %v1572_v19 = vsel %vm1330_vm4, %v3705_v17, 0.0  ;;  %3574 = vmatprep.subr.bf16.mxu0 %v4520_v63  ;;  %v1685_v62 = vpop.permute.xlu1 %1684 }
 0x672   : > { %1573 = vadd.xlane.f32.xlu0 %v1572_v19  ;;  %v1690_v60 = vsel %vm1207_vm3, %v1685_v62, 0 }
 0x675   : > { %v1735_v42 = vpop.permute.xlu1 %1734 }
 0x676   : > { %v1740_v52 = vsel %vm1207_vm3, %v1735_v42, 0 }
 0x678   : > { %v3707_v32 = vpop.eup %3706 }
 0x679   : > { %v1575_v27 = vsel %vm1330_vm4, %v3707_v32, 0.0  ;;  %v1733_v61 = vpop.permute.xlu1 %1732 }
 0x67a   : > { %1576 = vadd.xlane.f32.xlu0 %v1575_v27 }
 0x690   : > { %1584 = vrot.lane.b32.xlu0 %v4072_v57, %s3756_s15 }
 0x694   : > { %1682 = vrot.lane.b32.xlu0 %v4072_v57, %s3758_s17 }
 0x6ff   : > { %v1574_v29 = vpop.xlane.xlu0 %1573 }
 0x700   : > { %3708 = vrcp.f32 %v1574_v29 }
 0x707   : > { %v1577_v53 = vpop.xlane.xlu0 %1576 }
 0x708   : > { %3710 = vrcp.f32 %v1577_v53 }
 0x70a   : > { %v3709_v39 = vpop.eup %3708 }
 0x70b   : > { %v1580_v40 = vmul.f32 %v3709_v39, %v3705_v17  ;;  %v1585_v30 = vpop.permute.xlu0 %1584 }
 0x70c   : > { %v1590_v25 = vand.u32 %v1585_v30, %v4097_v1 }
 0x70d   : > { %v1582_v56 = vpack.c.bf16 %v1580_v40, %v1580_v40 }
 0x70e   : > { %3557 = vmatpush3.bf16.msra.mxu1 %v1590_v25 }
 0x70f   : > { %3568 = vmatprep.subr.bf16.mxu1 %v4520_v63  ;;  %v1683_v43 = vpop.permute.xlu0 %1682 }
 0x711   : > { %3559 = vmatmul.mubr.msk.bf16.vlgmr.msra.gmra.mrb[8].mxu1 %vm1357_vm7, %v1582_v56 }
 0x712   : > { %v3711_v58 = vpop.eup %3710  ;;  %3570 = vmatprep.mubr.msk.bf16.mxu1 %vm3750_vm2, %v4520_v63 }
 0x713   : > { %v1581_v37 = vmul.f32 %v3711_v58, %v3707_v32 }
 0x715   : > { %v1583_v48 = vpack.c.bf16 %v1581_v37, %v1581_v37 }
 0x717   : > { %3565 = vmatmul.mubr.msk.bf16.vlgmr.msra.gmra.mrb[20].mxu0 %vm1357_vm7, %v1583_v48  ;;  %3569 = vmatpush3.bf16.xpose.msra.mxu1 %v1690_v60 }
 0x718   : > { %3575 = vmatpush3.bf16.xpose.msra.mxu0 %v1740_v52  ;;  %3576 = vmatprep.mubr.msk.bf16.mxu0 %vm3750_vm2, %v4520_v63 }
 0x719   : > { %3586 = vmatprep.subr.bf16.mxu0 %v4520_v63  ;;  %3580 = vmatprep.subr.bf16.mxu1 %v4520_v63 }
 0x71e   : > { %3571 = vmatmul.mubr.msk.bf16.vlgmr.msra.gmra.mrb[12].mxu1 %vm1207_vm3, %v1683_v43 }
 0x71f   : > { %3577 = vmatmul.mubr.msk.bf16.vlgmr.msra.gmra.mrb[24].mxu0 %vm1207_vm3, %v1733_v61  ;;  %3582 = vmatprep.mubr.msk.bf16.mxu1 %vm3750_vm2, %v4520_v63 }
 0x720   : > { %3588 = vmatprep.mubr.msk.bf16.mxu0 %vm3750_vm2, %v4520_v63 }
 0x7e4   : > { %v4159_v0 = vpop.f32.mrb[8].mxu1 }
 0x7e5   : > { %v3560_v31 = vpop.f32.mrb[9].mxu1 }
 0x7e6   : > { %v1629_v33 = vpop.f32.mrb[10].mxu1 }
 0x7e7   : > { %v3561_v34 = vpop.f32.mrb[11].mxu1 }
 0x7ea   : > { %v4161_v35 = vpop.f32.mrb[20].mxu0 }
 0x7eb   : > { %v3566_v36 = vpop.f32.mrb[21].mxu0 }
 0x7ec   : > { %v1677_v59 = vpop.f32.mrb[22].mxu0 }
 0x7ed   : > { %v3567_v2 = vpop.f32.mrb[23].mxu0 }
 0x7f1   : > { %v1726_v3 = vpop.f32.mrb[12].mxu1 }
 0x7f2   : > { %v1782_v10 = vmul.f32 0.35355338, %v1726_v3  ;;  %v3572_v4 = vpop.f32.mrb[13].mxu1  ;;  %v1776_v11 = vpop.f32.mrb[24].mxu0 }
 0x7f3   : > { %v1783_v6 = vmul.f32 0.35355338, %v1776_v11  ;;  %v1729_v7 = vpop.f32.mrb[14].mxu1  ;;  %v3578_v13 = vpop.f32.mrb[25].mxu0 }
 0x7f4   : > { %v3573_v8 = vpop.f32.mrb[15].mxu1  ;;  %v1779_v14 = vpop.f32.mrb[26].mxu0  ;;  %v1784_v9 = vsel %vm1330_vm4, %v1782_v10, -inf }
 0x7f5   : > { %1785 = vmax.xlane.f32.xlu0 %v1784_v9  ;;  %v3579_v15 = vpop.f32.mrb[27].mxu0  ;;  %v1787_v12 = vsel %vm1330_vm4, %v1783_v6, -inf }
 0x7f6   : > { %1788 = vmax.xlane.f32.xlu1 %v1787_v12 }
 0x807   : > { %1856 = vrot.lane.b32.xlu1 %v4078_v26, %s3759_s18 }
 0x80b   : > { %1908 = vrot.lane.b32.xlu1 %v4072_v57, %s3760_s19 }
 0x80f   : > { %1958 = vrot.lane.b32.xlu1 %v4078_v26, %s3760_s19  ;;  %s442_s19 = scalar_lea.vmem %s4514_s13, %s3407_s28 }
 0x813   : > { %1956 = vrot.lane.b32.xlu1 %v4078_v26, %s3761_s20 }
 0x882   : > { %v1786_v17 = vpop.xlane.xlu0 %1785 }
 0x883   : > { %v1790_v19 = vsub.f32 %v1782_v10, %v1786_v17  ;;  %v1789_v32 = vpop.xlane.xlu1 %1788 }
 0x884   : > { %v1791_v27 = vsub.f32 %v1783_v6, %v1789_v32 }
 0x885   : > { %v1792_v29 = vmul.f32 1.442695, %v1790_v19 }
 0x886   : > { %v1794_v53 = vmul.f32 1.442695, %v1791_v27 }
 0x887   : > { %3712 = vpow2.f32 %v1792_v29  ;;  %v1857_v39 = vpop.permute.xlu1 %1856 }
 0x888   : > { %v1862_v40 = vand.u32 %v1857_v39, %v4097_v1  ;;  %3714 = vpow2.f32 %v1794_v53 }
 0x88a   : > { %3587 = vmatpush3.bf16.msra.mxu0 %v1862_v40 }
 0x88b   : > { %3598 = vmatprep.subr.bf16.mxu0 %v4520_v63  ;;  %v1909_v52 = vpop.permute.xlu1 %1908 }
 0x88c   : > { %v1914_v59 = vsel %vm1207_vm3, %v1909_v52, 0 }
 0x88f   : > { %v1959_v34 = vpop.permute.xlu1 %1958 }
 0x890   : > { %v1964_v2 = vsel %vm1207_vm3, %v1959_v34, 0 }
 0x891   : > { %v3713_v30 = vpop.eup %3712 }
 0x892   : > { %v1796_v25 = vsel %vm1330_vm4, %v3713_v30, 0.0  ;;  %v3715_v62 = vpop.eup %3714 }
 0x893   : > { %1797 = vadd.xlane.f32.xlu0 %v1796_v25  ;;  %v1799_v56 = vsel %vm1330_vm4, %v3715_v62, 0.0  ;;  %v1957_v10 = vpop.permute.xlu1 %1956 }
 0x897   : > { %1800 = vadd.xlane.f32.xlu0 %v1799_v56  ;;  %v1681_v56 = vpack.c.bf16 %v4161_v35, %v4161_v35 }
 0x8ad   : > { %1808 = vrot.lane.b32.xlu0 %v4072_v57, %s3759_s18 }
 0x8b1   : > { %1906 = vrot.lane.b32.xlu0 %v4072_v57, %s3761_s20 }
 0x920   : > { %v1798_v58 = vpop.xlane.xlu0 %1797 }
 0x921   : > { %3716 = vrcp.f32 %v1798_v58 }
 0x924   : > { %v1801_v37 = vpop.xlane.xlu0 %1800 }
 0x925   : > { %3718 = vrcp.f32 %v1801_v37 }
 0x928   : > { %v1809_v42 = vpop.permute.xlu0 %1808 }
 0x929   : > { %v1814_v48 = vand.u32 %v1809_v42, %v4097_v1 }
 0x92b   : > { %v3717_v60 = vpop.eup %3716  ;;  %3581 = vmatpush3.bf16.msra.mxu1 %v1814_v48 }
 0x92c   : > { %v1804_v43 = vmul.f32 %v3717_v60, %v3713_v30  ;;  %3592 = vmatprep.subr.bf16.mxu1 %v4520_v63  ;;  %v1907_v3 = vpop.permute.xlu0 %1906 }
 0x92e   : > { %v1806_v61 = vpack.c.bf16 %v1804_v43, %v1804_v43 }
 0x92f   : > { %v3719_v31 = vpop.eup %3718 }
 0x930   : > { %v1805_v33 = vmul.f32 %v3719_v31, %v3715_v62  ;;  %3583 = vmatmul.mubr.msk.bf16.vlgmr.msra.gmra.mrb[16].mxu1 %vm1357_vm7, %v1806_v61  ;;  %v1680_v62 = vpack.c.bf16 %v4159_v0, %v4159_v0 }
 0x931   : > { %3594 = vmatprep.mubr.msk.bf16.mxu1 %vm3750_vm2, %v4520_v63 }
 0x932   : > { %v1807_v36 = vpack.c.bf16 %v1805_v33, %v1805_v33 }
 0x934   : > { %3589 = vmatmul.mubr.msk.bf16.vlgmr.msra.gmra.mrb[28].mxu0 %vm1357_vm7, %v1807_v36  ;;  %3593 = vmatpush3.bf16.xpose.msra.mxu1 %v1914_v59 }
 0x935   : > { %3599 = vmatpush3.bf16.xpose.msra.mxu0 %v1964_v2  ;;  %3600 = vmatprep.mubr.msk.bf16.mxu0 %vm3750_vm2, %v4520_v63 }
 0x936   : > { %3610 = vmatprep.subr.bf16.mxu0 %v4520_v63  ;;  %3604 = vmatprep.subr.bf16.mxu1 %v4520_v63 }
 0x93b   : > { %3595 = vmatmul.mubr.msk.bf16.vlgmr.msra.gmra.mrb[20].mxu1 %vm1207_vm3, %v1907_v3 }
 0x93c   : > { %3601 = vmatmul.mubr.msk.bf16.vlgmr.msra.gmra.mrb[32].mxu0 %vm1207_vm3, %v1957_v10  ;;  %3606 = vmatprep.mubr.msk.bf16.mxu1 %vm3750_vm2, %v4520_v63 }
 0x93d   : > { %3612 = vmatprep.mubr.msk.bf16.mxu0 %vm3750_vm2, %v4520_v63 }
 0xa03   : > { %v1850_v4 = vpop.f32.mrb[16].mxu1 }
 0xa04   : > { %v3584_v11 = vpop.f32.mrb[17].mxu1  ;;  %v1904_v34 = vpack.c.bf16 %v1850_v4, %v1850_v4 }
 0xa05   : > { %v1853_v6 = vpop.f32.mrb[18].mxu1 }
 0xa06   : > { %v3585_v7 = vpop.f32.mrb[19].mxu1 }
 0xa07   : > { %v1898_v13 = vpop.f32.mrb[28].mxu0 }
 0xa08   : > { %v3590_v8 = vpop.f32.mrb[29].mxu0  ;;  %v1905_v58 = vpack.c.bf16 %v1898_v13, %v1898_v13 }
 0xa09   : > { %v1901_v14 = vpop.f32.mrb[30].mxu0 }
 0xa0a   : > { %v3591_v9 = vpop.f32.mrb[31].mxu0 }
 0xa0e   : > { %v1950_v15 = vpop.f32.mrb[20].mxu1 }
 0xa0f   : > { %v2006_v12 = vmul.f32 0.35355338, %v1950_v15  ;;  %v3596_v17 = vpop.f32.mrb[21].mxu1  ;;  %v2000_v19 = vpop.f32.mrb[32].mxu0 }
 0xa10   : > { %v2007_v32 = vmul.f32 0.35355338, %v2000_v19  ;;  %v1953_v27 = vpop.f32.mrb[22].mxu1  ;;  %v3602_v29 = vpop.f32.mrb[33].mxu0  ;;  %v3680_v19 = vld [vmem:[%s4506_s5] sm:$0xff]  }
 0xa11   : > { %v3597_v53 = vpop.f32.mrb[23].mxu1  ;;  %v2003_v39 = vpop.f32.mrb[34].mxu0  ;;  %v2008_v40 = vsel %vm1330_vm4, %v2006_v12, -inf  ;;  %v3681_v29 = vld [vmem:[%s4506_s5 + $0x8] sm:$0xff]  }
 0xa12   : > { %2009 = vmax.xlane.f32.xlu0 %v2008_v40  ;;  %v3603_v30 = vpop.f32.mrb[35].mxu0  ;;  %v2011_v25 = vsel %vm1330_vm4, %v2007_v32, -inf }
 0xa13   : > { %2012 = vmax.xlane.f32.xlu1 %v2011_v25  ;;  %v1456_v30 = vpack.c.bf16 %v4125_v38, %v4125_v38 }
 0xa24   : > { %2080 = vrot.lane.b32.xlu1 %v4078_v26, %s3762_s21 }
 0xa28   : > { %2132 = vrot.lane.b32.xlu1 %v1680_v62, %s3763_s22 }
 0xa2c   : > { %2134 = vrot.lane.b32.xlu1 %v1681_v56, %s3763_s22 }
 0xa30   : > { %2140 = vrot.lane.b32.xlu1 %v1905_v58, %s3764_s23 }
 0xa9f   : > { %v2010_v37 = vpop.xlane.xlu0 %2009 }
 0xaa0   : > { %v2014_v42 = vsub.f32 %v2006_v12, %v2010_v37  ;;  %v2013_v48 = vpop.xlane.xlu1 %2012  ;;  %v1457_v37 = vpack.c.bf16 %v4127_v41, %v4127_v41 }
 0xaa1   : > { %v2015_v60 = vsub.f32 %v2007_v32, %v2013_v48 }
 0xaa2   : > { %v2016_v52 = vmul.f32 1.442695, %v2014_v42 }
 0xaa3   : > { %v2018_v43 = vmul.f32 1.442695, %v2015_v60 }
 0xaa4   : > { %3720 = vpow2.f32 %v2016_v52  ;;  %v2081_v26 = vpop.permute.xlu1 %2080 }
 0xaa5   : > { %v2086_v61 = vand.u32 %v2081_v26, %v4097_v1  ;;  %3722 = vpow2.f32 %v2018_v43 }
 0xaa7   : > { %3611 = vmatpush3.bf16.msra.mxu0 %v2086_v61 }
 0xaa8   : > { %3624 = vmatprep.subr.bf16.mxu0 %v4520_v63  ;;  %v2133_v53 = vpop.permute.xlu1 %2132 }
 0xaa9   : > { %v2150_v25 = vsel %vm1207_vm3, %v1456_v30, %v2133_v53 }
 0xaac   : > { %v2135_v39 = vpop.permute.xlu1 %2134 }
 0xaad   : > { %v2153_v60 = vsel %vm1207_vm3, %v1457_v37, %v2135_v39 }
 0xaae   : > { %v3721_v0 = vpop.eup %3720 }
 0xaaf   : > { %v2020_v35 = vsel %vm1330_vm4, %v3721_v0, 0.0  ;;  %v3723_v31 = vpop.eup %3722 }
 0xab0   : > { %2021 = vadd.xlane.f32.xlu0 %v2020_v35  ;;  %v2023_v33 = vsel %vm1330_vm4, %v3723_v31, 0.0  ;;  %v2141_v62 = vpop.permute.xlu1 %2140 }
 0xab1   : > { %v2158_v52 = vsel %vm2154_vm9, %v2153_v60, %v2141_v62 }
 0xab4   : > { %2024 = vadd.xlane.f32.xlu0 %v2023_v33 }
 0xaca   : > { %2032 = vrot.lane.b32.xlu0 %v4072_v57, %s3762_s21 }
 0xace   : > { %2138 = vrot.lane.b32.xlu0 %v1904_v34, %s3764_s23 }
 0xb3d   : > { %v2022_v36 = vpop.xlane.xlu0 %2021 }
 0xb3e   : > { %3724 = vrcp.f32 %v2022_v36 }
 0xb41   : > { %v2025_v59 = vpop.xlane.xlu0 %2024 }
 0xb42   : > { %3726 = vrcp.f32 %v2025_v59 }
 0xb45   : > { %v2033_v2 = vpop.permute.xlu0 %2032 }
 0xb46   : > { %v2038_v3 = vand.u32 %v2033_v2, %v4097_v1 }
 0xb48   : > { %v3725_v10 = vpop.eup %3724  ;;  %3605 = vmatpush3.bf16.msra.mxu1 %v2038_v3 }
 0xb49   : > { %v2028_v11 = vmul.f32 %v3725_v10, %v3721_v0  ;;  %3616 = vmatprep.subr.bf16.mxu1 %v4520_v63  ;;  %v2139_v40 = vpop.permute.xlu0 %2138 }
 0xb4a   : > { %v2156_v56 = vsel %vm2154_vm9, %v2150_v25, %v2139_v40 }
 0xb4b   : > { %v2030_v6 = vpack.c.bf16 %v2028_v11, %v2028_v11 }
 0xb4c   : > { %v3727_v7 = vpop.eup %3726 }
 0xb4d   : > { %v2029_v13 = vmul.f32 %v3727_v7, %v3723_v31  ;;  %3607 = vmatmul.mubr.msk.bf16.vlgmr.msra.gmra.mrb[24].mxu1 %vm1357_vm7, %v2030_v6 }
 0xb4e   : > { %3620 = vmatprep.mubr.msk.bf16.mxu1 %vm3750_vm2, %v4520_v63  ;;  %3617 = vmatpush3.bf16.msra.mxu1 %v3680_v19 }
 0xb4f   : > { %v2031_v57 = vpack.c.bf16 %v2029_v13, %v2029_v13  ;;  %3618 = vmatprep.subr.bf16.mxu1 %v4520_v63 }
 0xb51   : > { %3613 = vmatmul.mubr.msk.bf16.vlgmr.msra.gmra.mrb[36].mxu0 %vm1357_vm7, %v2031_v57 }
 0xb52   : > { %3628 = vmatprep.mubr.msk.bf16.mxu0 %vm3750_vm2, %v4520_v63  ;;  %3619 = vmatpush3.bf16.msra.mxu1 %v3681_v29 }
 0xb53   : > { %3632 = vmatprep.subr.bf16.mxu1 %v4520_v63 }
 0xc20   : > { %v2074_v1 = vpop.f32.mrb[24].mxu1 }
 0xc21   : > { %v2128_v4 = vpack.c.bf16 %v2074_v1, %v2074_v1  ;;  %v3608_v8 = vpop.f32.mrb[25].mxu1 }
 0xc22   : > { %v2077_v14 = vpop.f32.mrb[26].mxu1 }
 0xc23   : > { %2144 = vrot.lane.b32.xlu0 %v2128_v4, %s3765_s24  ;;  %v3609_v9 = vpop.f32.mrb[27].mxu1 }
 0xc24   : > { %v2122_v15 = vpop.f32.mrb[36].mxu0 }
 0xc25   : > { %v2129_v12 = vpack.c.bf16 %v2122_v15, %v2122_v15  ;;  %v3614_v17 = vpop.f32.mrb[37].mxu0  ;;  %v3436_v15 = vld [vmem:[%s4507_s6] ss:$0 sm:$0xff] }
 0xc26   : > { %v2125_v32 = vpop.f32.mrb[38].mxu0 }
 0xc27   : > { %2146 = vrot.lane.b32.xlu1 %v2129_v12, %s3765_s24  ;;  %v3615_v27 = vpop.f32.mrb[39].mxu0 }
 0xc95   : > { %v2145_v58 = vpop.permute.xlu0 %2144 }
 0xc96   : > { %v2161_v42 = vsel %vm2159_vm8, %v2156_v56, %v2145_v58 }
 0xc97   : > { %v2172_v48 = vrot.slane %v2161_v42, %v3852_v5 }
 0xc99   : > { %v2173_v43 = vcombine.high %v2172_v48, %v2172_v48  ;;  %v2147_v26 = vpop.permute.xlu1 %2146  ;;  %v2180_v38 = vrot.slane %v2172_v48, %v3852_v5 }
 0xc9a   : > { %v2163_v61 = vsel %vm2159_vm8, %v2158_v52, %v2147_v26 }
 0xc9b   : > { %v2195_v0 = vrot.slane %v2163_v61, %v3852_v5  ;;  %v2187_v35 = vrot.slane %v2173_v43, %v3852_v5  ;;  %v2188_v34 = vcombine.high %v2180_v38, %v2180_v38 }
 0xc9d   : > { %v2196_v31 = vcombine.high %v2195_v0, %v2195_v0  ;;  %v2203_v33 = vrot.slane %v2195_v0, %v3852_v5  ;;  %v2238_v2 = vcombine.low %v2180_v38, %v2187_v35 }
 0xc9f   : > { %v2210_v41 = vrot.slane %v2196_v31, %v3852_v5  ;;  %v2218_v36 = vunpack.i.h.s16 %v2203_v33  ;;  %v3437_v59 = vpack.i.b16 %v2203_v33, %v2188_v34  ;;  %v2211_v3 = vcombine.high %v2203_v33, %v2203_v33 }
 0xca0   : > { %v2246_v13 = vrot.slane %v2238_v2, %v3852_v5 }
 0xca1   : > { %v2220_v10 = vunpack.i.h.s16 %v2210_v41  ;;  %v3438_v11 = vpack.i.b16 %v2210_v41, %v2218_v36 }
 0xca3   : > { %v3439_v6 = vpack.i.b16 %v2211_v3, %v2220_v10  ;;  %v2239_v7 = vcombine.low %v3437_v59, %v3438_v11 }
 0xca5   : > { %v2253_v57 = vrot.slane %v2239_v7, %v3852_v5  ;;  %v2260_v1 = vrot.slane %v3439_v6, %v3852_v5 }
 0xca7   : > { %v2261_v4 = vcombine.low %v2246_v13, %v2253_v57  ;;  %v2275_v14 = vrot.slane %v2260_v1, %v3852_v5 }
 0xca9   : > { %v2268_v8 = vrot.slane %v2261_v4, %v3852_v5 }
 0xcab   : > { %v2276_v9 = vcombine.low %v2268_v8, %v2275_v14 }
 0xcad   : > { %3621 = vmatmul.mubr.msk.bf16.vlgmr.msra.gmra.mrb[28].mxu1 %vm607_vm0, %v2276_v9 }
 0xcae   : > { %3648 = vmatprep.mubr.msk.bf16.mxu1 %vm3750_vm2, %v4520_v63 }
 0xd80   : > { %v2326_v12 = vpop.f32.mrb[28].mxu1 }
 0xd81   : > { %v2327_v17 = vadd.f32 %v3436_v15, %v2326_v12  ;;  %v3622_v19 = vpop.f32.mrb[29].mxu1 }
 0xd82   : > { %v2329_v32 = vpop.f32.mrb[30].mxu1 }
 0xd83   : > { %v2335_v27 = vcombine.high %v2327_v17, %v2327_v17  ;;  %v2342_v29 = vrot.slane %v2327_v17, %v3852_v5  ;;  %v2330_v53 = vadd.f32 %v3436_v15, %v2329_v32  ;;  %v3623_v39 = vpop.f32.mrb[31].mxu1 }
 0xd85   : > { %v2349_v40 = vrot.slane %v2335_v27, %v3852_v5  ;;  %v2350_v30 = vcombine.high %v2342_v29, %v2342_v29  ;;  %v2358_v25 = vrot.slane %v2342_v29, %v3852_v5  ;;  %v2390_v62 = vrot.slane %v2330_v53, %v3852_v5 }
 0xd87   : > { %v2351_v56 = vcombine.high %v2349_v40, %v2349_v40  ;;  %v2365_v58 = vrot.slane %v2349_v40, %v3852_v5  ;;  %v2372_v37 = vrot.slane %v2350_v30, %v3852_v5  ;;  %v2380_v42 = vcombine.high %v2358_v25, %v2358_v25 }
 0xd88   : > { %v2391_v48 = vcombine.high %v2390_v62, %v2390_v62  ;;  %v2398_v60 = vrot.slane %v2390_v62, %v3852_v5  ;;  %v4256_v61 = vadd.f32 %v2358_v25, %v3858_v16 }
 0xd89   : > { %v2379_v52 = vrot.slane %v2351_v56, %v3852_v5  ;;  %v2381_v43 = vcombine.high %v2365_v58, %v2365_v58  ;;  %v2382_v26 = vcombine.high %v2372_v37, %v2372_v37  ;;  %v4253_v38 = vadd.f32 %v2372_v37, %v3868_v21 }
 0xd8a   : > { %v4259_v0 = vadd.f32 %v2380_v42, %v3922_v54  ;;  %v2405_v35 = vrot.slane %v2391_v48, %v3852_v5  ;;  %v4266_v34 = vadd.f32 %v2365_v58, %v3865_v20  ;;  %v4272_v21 = vadd.f32 %v2398_v60, %v3888_v28  ;;  %v4521_v58 = vld [vmem:[#allocation2_spill] sm:$0xff] }
 0xd8b   : > { %v2383_v31 = vcombine.high %v2379_v52, %v2379_v52  ;;  %v4263_v33 = vadd.f32 %v2382_v26, %v3926_v55  ;;  %v4269_v41 = vadd.f32 %v2379_v52, %v3861_v18  ;;  %v2438_v54 = vcombine.low %v4256_v61, %v4253_v38 }
 0xd8c   : > { %v4275_v16 = vadd.f32 %v2405_v35, %v3878_v24  ;;  %v4280_v36 = vadd.f32 %v2381_v43, %v3871_v22 }
 0xd8d   : > { %v4283_v55 = vadd.f32 %v2383_v31, %v3875_v23  ;;  %v2439_v20 = vcombine.low %v4259_v0, %v4263_v33  ;;  %v2440_v18 = vcombine.low %v4266_v34, %v4269_v41  ;;  %v2448_v59 = vrot.slane %v2438_v54, %v3852_v5 }
 0xd8e   : > { %v2487_v28 = vcombine.low %v4272_v21, %v4275_v16 }
 0xd8f   : > { %v2441_v24 = vcombine.low %v4280_v36, %v4283_v55  ;;  %v2455_v22 = vrot.slane %v2439_v20, %v3852_v5  ;;  %v2462_v23 = vrot.slane %v2440_v18, %v3852_v5 }
 0xd90   : > { %v2494_v2 = vrot.slane %v2487_v28, %v3852_v5 }
 0xd91   : > { %v2469_v3 = vrot.slane %v2441_v24, %v3852_v5  ;;  %v2470_v10 = vcombine.low %v2448_v59, %v2455_v22 }
 0xd92   : > { %v2501_v11 = vrot.slane %v2494_v2, %v3852_v5 }
 0xd93   : > { %v2471_v6 = vcombine.low %v2462_v23, %v2469_v3  ;;  %v2478_v13 = vrot.slane %v2470_v10, %v3852_v5 }
 0xd94   : > { %v2507_v7 = vsel %vm611_vm1, %v2501_v11, 0.0 }
 0xd95   : > { %2508 = vadd.xlane.f32.xlu1 %v2507_v7  ;;  %v2485_v57 = vrot.slane %v2471_v6, %v3852_v5 }
 0xd97   : > { %v2486_v1 = vcombine.low %v2478_v13, %v2485_v57 }
 0xd99   : > { %v2504_v4 = vsel %vm607_vm0, %v2486_v1, 0.0 }
 0xd9a   : > { %2505 = vadd.xlane.f32.xlu0 %v2504_v4 }
 0xe22   : > { %v2509_v8 = vpop.xlane.xlu1 %2508 }
 0xe23   : > { %v2511_v14 = vmul.f32 0.03125, %v2509_v8 }
 0xe25   : > { %v2549_v9 = vrot.slane %v2511_v14, %v3904_v44  ;;  %v2553_v15 = vrot.slane %v2511_v14, %v3906_v45 }
 0xe27   : > { %v4306_v12 = vsub.f32 %v4272_v21, %v2549_v9  ;;  %v4309_v17 = vsub.f32 %v4275_v16, %v2553_v15  ;;  %v2506_v19 = vpop.xlane.xlu0 %2505 }
 0xe28   : > { %v2510_v32 = vmul.f32 0.03125, %v2506_v19 }
 0xe29   : > { %v2582_v27 = vmul.f32 %v4306_v12, %v4306_v12  ;;  %v2583_v29 = vmul.f32 %v4309_v17, %v4309_v17 }
 0xe2a   : > { %v2517_v53 = vrot.slane %v2510_v32, %v3904_v44  ;;  %v2521_v39 = vrot.slane %v2510_v32, %v3906_v45  ;;  %v2525_v40 = vrot.slane %v2510_v32, %v3908_v46  ;;  %v2529_v30 = vrot.slane %v2510_v32, %v3910_v47 }
 0xe2b   : > { %v2533_v25 = vrot.slane %v2510_v32, %v3912_v49  ;;  %v2537_v62 = vrot.slane %v2510_v32, %v3914_v50  ;;  %v2541_v56 = vrot.slane %v2510_v32, %v3916_v51  ;;  %v2545_v37 = vrot.slane %v2510_v32, %v4521_v58 }
 0xe2c   : > { %v4324_v42 = vsub.f32 %v4256_v61, %v2517_v53  ;;  %v4327_v48 = vsub.f32 %v4253_v38, %v2521_v39  ;;  %v4330_v60 = vsub.f32 %v4259_v0, %v2525_v40  ;;  %v4333_v52 = vsub.f32 %v4263_v33, %v2529_v30  ;;  %v3443_v40 = vld [vmem:[%s4508_s7] ss:$0 sm:$0xff] }
 0xe2d   : > { %v4336_v43 = vsub.f32 %v4266_v34, %v2533_v25  ;;  %v4339_v26 = vsub.f32 %v4269_v41, %v2537_v62  ;;  %v4342_v35 = vsub.f32 %v4280_v36, %v2541_v56  ;;  %v4345_v31 = vsub.f32 %v4283_v55, %v2545_v37  ;;  %v3444_v30 = vld [vmem:[%s4509_s8] ss:$0 sm:$0xff] }
 0xe2e   : > { %v2574_v54 = vmul.f32 %v4324_v42, %v4324_v42  ;;  %v2575_v20 = vmul.f32 %v4327_v48, %v4327_v48  ;;  %v2576_v18 = vmul.f32 %v4330_v60, %v4330_v60  ;;  %v2577_v28 = vmul.f32 %v4333_v52, %v4333_v52 }
 0xe2f   : > { %v2578_v24 = vmul.f32 %v4336_v43, %v4336_v43  ;;  %v2579_v59 = vmul.f32 %v4339_v26, %v4339_v26  ;;  %v2580_v22 = vmul.f32 %v4342_v35, %v4342_v35  ;;  %v2581_v2 = vmul.f32 %v4345_v31, %v4345_v31 }
 0xe30   : > { %v2594_v23 = vcombine.low %v2574_v54, %v2575_v20  ;;  %v2595_v3 = vcombine.low %v2576_v18, %v2577_v28  ;;  %v2643_v1 = vcombine.low %v2582_v27, %v2583_v29  ;;  %v3682_v27 = vld [vmem:[%s4510_s9] sm:$0xff]   ;;  %v3683_v29 = vld [vmem:[%s4510_s9 + $0x8] sm:$0xff]   ;;  %v2739_v25 = vcombine.high %v3443_v40, %v3443_v40 }
 0xe31   : > { %v2596_v10 = vcombine.low %v2578_v24, %v2579_v59  ;;  %v2597_v11 = vcombine.low %v2580_v22, %v2581_v2  ;;  %3625 = vmatpush3.bf16.msra.mxu0 %v3682_v27  ;;  %v2811_v62 = vcombine.high %v3444_v30, %v3444_v30  ;;  %v2746_v54 = vrot.slane %v3443_v40, %v3852_v5 }
 0xe32   : > { %v2604_v6 = vrot.slane %v2594_v23, %v3852_v5  ;;  %v2611_v7 = vrot.slane %v2595_v3, %v3852_v5  ;;  %v2650_v15 = vrot.slane %v2643_v1, %v3852_v5  ;;  %3626 = vmatprep.subr.bf16.mxu0 %v4520_v63  ;;  %v2753_v20 = vrot.slane %v2739_v25, %v3852_v5 }
 0xe33   : > { %v2618_v13 = vrot.slane %v2596_v10, %v3852_v5  ;;  %v2625_v57 = vrot.slane %v2597_v11, %v3852_v5  ;;  %v2818_v28 = vrot.slane %v3444_v30, %v3852_v5  ;;  %v2825_v24 = vrot.slane %v2811_v62, %v3852_v5 }
 0xe34   : > { %v2626_v4 = vcombine.low %v2604_v6, %v2611_v7  ;;  %v2657_v53 = vrot.slane %v2650_v15, %v3852_v5  ;;  %v2754_v2 = vcombine.high %v2746_v54, %v2746_v54  ;;  %v2755_v23 = vcombine.high %v2753_v20, %v2753_v20 }
 0xe35   : > { %v2627_v8 = vcombine.low %v2618_v13, %v2625_v57  ;;  %3627 = vmatpush3.bf16.msra.mxu0 %v3683_v29  ;;  %v2826_v3 = vcombine.high %v2818_v28, %v2818_v28  ;;  %v2827_v11 = vcombine.high %v2825_v24, %v2825_v24  ;;  %v2762_v6 = vrot.slane %v2746_v54, %v3852_v5 }
 0xe36   : > { %v2634_v14 = vrot.slane %v2626_v4, %v3852_v5  ;;  %v2663_v39 = vsel %vm611_vm1, %v2657_v53, 0.0  ;;  %v2776_v7 = vrot.slane %v2754_v2, %v3852_v5  ;;  %v2769_v13 = vrot.slane %v2753_v20, %v3852_v5 }
 0xe37   : > { %v2641_v9 = vrot.slane %v2627_v8, %v3852_v5  ;;  %v2783_v57 = vrot.slane %v2755_v23, %v3852_v5  ;;  %v2834_v1 = vrot.slane %v2818_v28, %v3852_v5  ;;  %v2848_v4 = vrot.slane %v2826_v3, %v3852_v5 }
 0xe38   : > { %v2841_v8 = vrot.slane %v2825_v24, %v3852_v5  ;;  %v2786_v15 = vcombine.high %v2776_v7, %v2776_v7 }
 0xe39   : > { %v2642_v19 = vcombine.low %v2634_v14, %v2641_v9  ;;  %v2855_v14 = vrot.slane %v2827_v11, %v3852_v5  ;;  %v2784_v9 = vcombine.high %v2762_v6, %v2762_v6  ;;  %v2858_v29 = vcombine.high %v2848_v4, %v2848_v4 }
 0xe3a   : > { %v2857_v27 = vcombine.high %v2841_v8, %v2841_v8 }
 0xe3b   : > { %v2660_v32 = vsel %vm607_vm0, %v2642_v19, 0.0  ;;  %v2785_v19 = vcombine.high %v2769_v13, %v2769_v13  ;;  %v2859_v40 = vcombine.high %v2855_v14, %v2855_v14 }
 0xe3c   : > { %2661 = vadd.xlane.f32.xlu0 %v2660_v32  ;;  %v2787_v32 = vcombine.high %v2783_v57, %v2783_v57 }
 0xe40   : > { %2664 = vadd.xlane.f32.xlu0 %v2663_v39  ;;  %v2856_v39 = vcombine.high %v2834_v1, %v2834_v1 }
 0xec9   : > { %v2662_v56 = vpop.xlane.xlu0 %2661 }
 0xeca   : > { %v2666_v37 = vmul.f32 0.03125, %v2662_v56 }
 0xecc   : > { %v2668_v18 = vadd.f32 1e-05, %v2666_v37 }
 0xecd   : > { %v2665_v59 = vpop.xlane.xlu0 %2664 }
 0xece   : > { %3728 = vrsqrt.f32 %v2668_v18  ;;  %v2667_v22 = vmul.f32 0.03125, %v2665_v59 }
 0xed0   : > { %v2669_v10 = vadd.f32 1e-05, %v2667_v22 }
 0xed2   : > { %3730 = vrsqrt.f32 %v2669_v10 }
 0xed8   : > { %v3729_v53 = vpop.eup %3728 }
 0xed9   : > { %v2677_v30 = vrot.slane %v3729_v53, %v3904_v44  ;;  %v2681_v25 = vrot.slane %v3729_v53, %v3906_v45  ;;  %v2685_v62 = vrot.slane %v3729_v53, %v3908_v46  ;;  %v2689_v56 = vrot.slane %v3729_v53, %v3910_v47 }
 0xeda   : > { %v2693_v37 = vrot.slane %v3729_v53, %v3912_v49  ;;  %v2697_v54 = vrot.slane %v3729_v53, %v3914_v50  ;;  %v2701_v20 = vrot.slane %v3729_v53, %v3916_v51  ;;  %v2705_v18 = vrot.slane %v3729_v53, %v4521_v58 }
 0xedb   : > { %v2724_v28 = vmul.f32 %v2677_v30, %v4324_v42  ;;  %v2725_v24 = vmul.f32 %v2681_v25, %v4327_v48  ;;  %v2726_v59 = vmul.f32 %v2685_v62, %v4330_v60  ;;  %v2727_v22 = vmul.f32 %v2689_v56, %v4333_v52 }
 0xedc   : > { %v3731_v2 = vpop.eup %3730  ;;  %v2728_v46 = vmul.f32 %v2693_v37, %v4336_v43  ;;  %v2729_v47 = vmul.f32 %v2697_v54, %v4339_v26  ;;  %v2730_v49 = vmul.f32 %v2701_v20, %v4342_v35  ;;  %v2731_v50 = vmul.f32 %v2705_v18, %v4345_v31  ;;  %v3684_v20 = vld [vmem:[%s4512_s11] sm:$0xff]   ;;  %v3685_v18 = vld [vmem:[%s4512_s11 + $0x8] sm:$0xff]  }
 0xedd   : > { %v2796_v51 = vmul.f32 %v2762_v6, %v2724_v28  ;;  %v2797_v23 = vmul.f32 %v2776_v7, %v2725_v24  ;;  %v2709_v58 = vrot.slane %v3731_v2, %v3904_v44  ;;  %v2713_v42 = vrot.slane %v3731_v2, %v3906_v45  ;;  %3633 = vmatpush3.bf16.msra.mxu1 %v3684_v20  ;;  %v3686_v28 = vld [vmem:[%s4512_s11 + $0x10] sm:$0xff]   ;;  %v3687_v24 = vld [vmem:[%s4512_s11 + $0x18] sm:$0xff]  }
 0xede   : > { %v2798_v48 = vmul.f32 %v2784_v9, %v2726_v59  ;;  %v2799_v3 = vmul.f32 %v2786_v15, %v2727_v22  ;;  %v2800_v60 = vmul.f32 %v2769_v13, %v2728_v46  ;;  %v2801_v10 = vmul.f32 %v2783_v57, %v2729_v47  ;;  %3634 = vmatprep.subr.bf16.mxu1 %v4520_v63  ;;  %v3688_v59 = vld [vmem:[%s4512_s11 + $0x20] sm:$0xff]   ;;  %v3689_v22 = vld [vmem:[%s4512_s11 + $0x28] sm:$0xff]   ;;  %v3690_v2 = vld [vmem:[%s4512_s11 + $0x30] sm:$0xff]  }
 0xedf   : > { %v2732_v52 = vmul.f32 %v2709_v58, %v4306_v12  ;;  %v2733_v43 = vmul.f32 %v2713_v42, %v4309_v17  ;;  %v2802_v11 = vmul.f32 %v2785_v19, %v2730_v49  ;;  %v2803_v26 = vmul.f32 %v2787_v32, %v2731_v50  ;;  %v3691_v46 = vld [vmem:[%s4512_s11 + $0x38] sm:$0xff]   ;;  %v3445_v47 = vld [vmem:[%s4511_s10] ss:$0 sm:$0xff] }
 0xee0   : > { %v2868_v53 = vadd.f32 %v2834_v1, %v2796_v51  ;;  %v2869_v35 = vadd.f32 %v2848_v4, %v2797_v23  ;;  %v2870_v30 = vadd.f32 %v2856_v39, %v2798_v48  ;;  %v2871_v31 = vadd.f32 %v2858_v29, %v2799_v3 }
 0xee1   : > { %v2804_v25 = vmul.f32 %v2762_v6, %v2732_v52  ;;  %v2805_v62 = vmul.f32 %v2776_v7, %v2733_v43  ;;  %v2872_v56 = vadd.f32 %v2841_v8, %v2800_v60  ;;  %v2873_v44 = vadd.f32 %v2855_v14, %v2801_v10  ;;  %3635 = vmatpush3.bf16.msra.mxu1 %v3685_v18 }
 0xee2   : > { %v2874_v37 = vadd.f32 %v2857_v27, %v2802_v11  ;;  %v2875_v45 = vadd.f32 %v2859_v40, %v2803_v26  ;;  %v2888_v9 = vcombine.low %v2868_v53, %v2869_v35  ;;  %v2889_v15 = vcombine.low %v2870_v30, %v2871_v31  ;;  %3636 = vmatprep.subr.bf16.mxu1 %v4520_v63 }
 0xee3   : > { %v2876_v13 = vadd.f32 %v2834_v1, %v2804_v25  ;;  %v2877_v57 = vadd.f32 %v2848_v4, %v2805_v62  ;;  %v2890_v54 = vcombine.low %v2872_v56, %v2873_v44  ;;  %v3451_v25 = vld [vmem:[%s4513_s12] ss:$0 sm:$0xff] }
 0xee4   : > { %v2891_v12 = vcombine.low %v2874_v37, %v2875_v45  ;;  %v2898_v17 = vrot.slane %v2888_v9, %v3852_v5  ;;  %v2905_v19 = vrot.slane %v2889_v15, %v3852_v5 }
 0xee5   : > { %v2912_v32 = vrot.slane %v2890_v54, %v3852_v5  ;;  %v2937_v39 = vcombine.low %v2876_v13, %v2877_v57  ;;  %3637 = vmatpush3.bf16.msra.mxu1 %v3686_v28 }
 0xee6   : > { %v2919_v6 = vrot.slane %v2891_v12, %v3852_v5  ;;  %v2920_v7 = vcombine.low %v2898_v17, %v2905_v19  ;;  %3638 = vmatprep.subr.bf16.mxu1 %v4520_v63 }
 0xee7   : > { %v2944_v8 = vrot.slane %v2937_v39, %v3852_v5 }
 0xee8   : > { %v2921_v14 = vcombine.low %v2912_v32, %v2919_v6  ;;  %v2928_v27 = vrot.slane %v2920_v7, %v3852_v5 }
 0xee9   : > { %v2951_v4 = vrot.slane %v2944_v8, %v3852_v5  ;;  %3639 = vmatpush3.bf16.msra.mxu1 %v3687_v24 }
 0xeea   : > { %v2935_v1 = vrot.slane %v2921_v14, %v3852_v5  ;;  %3640 = vmatprep.subr.bf16.mxu1 %v4520_v63 }
 0xeec   : > { %v2936_v29 = vcombine.low %v2928_v27, %v2935_v1 }
 0xeed   : > { %3641 = vmatpush3.bf16.msra.mxu1 %v3688_v59 }
 0xeee   : > { %v2954_v40 = vpack.c.bf16 %v2951_v4, %v2936_v29  ;;  %3642 = vmatprep.subr.bf16.mxu1 %v4520_v63 }
 0xef0   : > { %3629 = vmatmul.mubr.msk.bf16.vlgmr.msra.gmra.mrb[40].mxu0 %vm607_vm0, %v2954_v40 }
 0xef1   : > { %3643 = vmatpush3.bf16.msra.mxu1 %v3689_v22 }
 0xef2   : > { %3644 = vmatprep.subr.bf16.mxu1 %v4520_v63 }
 0xef5   : > { %3645 = vmatpush3.bf16.msra.mxu1 %v3690_v2 }
 0xef6   : > { %3646 = vmatprep.subr.bf16.mxu1 %v4520_v63 }
 0xef9   : > { %3647 = vmatpush3.bf16.msra.mxu1 %v3691_v46 }
 0xfc3   : > { %v3015_v49 = vpop.f32.mrb[40].mxu0 }
 0xfc4   : > { %v3016_v50 = vadd.f32 %v3445_v47, %v3015_v49  ;;  %v3630_v51 = vpop.f32.mrb[41].mxu0 }
 0xfc5   : > { %v3018_v23 = vpop.f32.mrb[42].mxu0 }
 0xfc6   : > { %v3449_v58 = vmul.f32 -1.702, %v3016_v50  ;;  %v3019_v42 = vadd.f32 %v3445_v47, %v3018_v23  ;;  %v3631_v48 = vpop.f32.mrb[43].mxu0 }
 0xfc8   : > { %v3026_v3 = vmul.f32 1.442695, %v3449_v58  ;;  %v3450_v60 = vmul.f32 -1.702, %v3019_v42 }
 0xfca   : > { %3732 = vpow2.f32 %v3026_v3  ;;  %v3028_v63 = vmul.f32 1.442695, %v3450_v60  ;;  %v3339_v3 = vld [vmem:[%s442_s19] sm:$0x7] }
 0xfcc   : > { %3734 = vpow2.f32 %v3028_v63 }
 0xfd4   : > { %v3733_v10 = vpop.eup %3732 }
 0xfd5   : > { %v3030_v52 = vadd.f32 1.0, %v3733_v10 }
 0xfd6   : > { %v3735_v43 = vpop.eup %3734 }
 0xfd7   : > { %3736 = vrcp.f32 %v3030_v52  ;;  %v3031_v11 = vadd.f32 1.0, %v3735_v43  ;;  %v3342_v43 = vld [vmem:[%s442_s19 + $0x4] sm:$0x7] }
 0xfd9   : > { %3738 = vrcp.f32 %v3031_v11 }
 0xfe1   : > { %v3737_v26 = vpop.eup %3736 }
 0xfe2   : > { %v3036_v35 = vmul.f32 %v3737_v26, %v3016_v50 }
 0xfe3   : > { %v3739_v53 = vpop.eup %3738 }
 0xfe4   : > { %v3037_v30 = vmul.f32 %v3739_v53, %v3019_v42 }
 0xfe6   : > { %v3038_v31 = vpack.c.bf16 %v3037_v30, %v3036_v35 }
 0xfe8   : > { %3649 = vmatmul.mubr.bf16.vlgmr.msra.gmra.mrb[32].mxu1 %v3038_v31 }
0x10bb   : > { %v3144_v62 = vpop.f32.mrb[32].mxu1 }
0x10bc   : > { %v3145_v56 = vadd.f32 %v3451_v25, %v3144_v62  ;;  %v3650_v44 = vpop.f32.mrb[33].mxu1 }
0x10bd   : > { %v3147_v37 = vpop.f32.mrb[34].mxu1 }
0x10be   : > { %v3153_v45 = vcombine.high %v3145_v56, %v3145_v56  ;;  %v3160_v9 = vrot.slane %v3145_v56, %v3852_v5  ;;  %v3148_v15 = vadd.f32 %v3451_v25, %v3147_v37  ;;  %v3651_v13 = vpop.f32.mrb[35].mxu1 }
0x10c0   : > { %v3167_v57 = vrot.slane %v3153_v45, %v3852_v5  ;;  %v3168_v54 = vcombine.high %v3160_v9, %v3160_v9  ;;  %v3176_v12 = vrot.slane %v3160_v9, %v3852_v5  ;;  %v3208_v17 = vrot.slane %v3148_v15, %v3852_v5 }
0x10c2   : > { %v3169_v19 = vcombine.high %v3167_v57, %v3167_v57  ;;  %v3183_v32 = vrot.slane %v3167_v57, %v3852_v5  ;;  %v3190_v39 = vrot.slane %v3168_v54, %v3852_v5  ;;  %v3198_v6 = vcombine.high %v3176_v12, %v3176_v12 }
0x10c3   : > { %v3209_v7 = vcombine.high %v3208_v17, %v3208_v17  ;;  %v3216_v8 = vrot.slane %v3208_v17, %v3852_v5  ;;  %v3234_v29 = vadd.f32 %v3176_v12, %v4256_v61 }
0x10c4   : > { %v3197_v14 = vrot.slane %v3169_v19, %v3852_v5  ;;  %v3199_v27 = vcombine.high %v3183_v32, %v3183_v32  ;;  %v3200_v1 = vcombine.high %v3190_v39, %v3190_v39  ;;  %v3235_v4 = vadd.f32 %v3190_v39, %v4253_v38 }
0x10c5   : > { %v3236_v40 = vadd.f32 %v3198_v6, %v4259_v0  ;;  %v3238_v20 = vadd.f32 %v3183_v32, %v4266_v34  ;;  %v3223_v18 = vrot.slane %v3209_v7, %v3852_v5  ;;  %v3242_v46 = vadd.f32 %v3216_v8, %v4272_v21 }
0x10c6   : > { %v3201_v28 = vcombine.high %v3197_v14, %v3197_v14  ;;  %v3237_v24 = vadd.f32 %v3200_v1, %v4263_v33  ;;  %v3239_v59 = vadd.f32 %v3197_v14, %v4269_v41  ;;  %v3240_v22 = vadd.f32 %v3199_v27, %v4280_v36 }
0x10c7   : > { %v3254_v2 = vcombine.low %v3234_v29, %v3235_v4  ;;  %v3243_v0 = vadd.f32 %v3223_v18, %v4275_v16  ;;  %v3276_v33 = vrot.slane %v3238_v20, %v3852_v5 }
0x10c8   : > { %v3255_v38 = vcombine.low %v3236_v40, %v3237_v24  ;;  %v3293_v47 = vcombine.low %v3239_v59, %v3240_v22  ;;  %v3241_v61 = vadd.f32 %v3201_v28, %v4283_v55 }
0x10c9   : > { %v3262_v34 = vrot.slane %v3254_v2, %v3852_v5  ;;  %v3315_v21 = vrot.slane %v3243_v0, %v3852_v5  ;;  %v3291_v55 = vrot.slane %v3276_v33, %v3852_v5 }
0x10ca   : > { %v3269_v49 = vrot.slane %v3255_v38, %v3852_v5  ;;  %v3294_v50 = vcombine.low %v3241_v61, %v3242_v46  ;;  %v3301_v36 = vrot.slane %v3293_v47, %v3852_v5 }
0x10cb   : > { %v3330_v48 = vrot.slane %v3315_v21, %v3852_v5 }
0x10cc   : > { %v3277_v41 = vcombine.low %v3262_v34, %v3269_v49  ;;  %v3308_v51 = vrot.slane %v3294_v50, %v3852_v5 }
0x10ce   : > { %v3284_v16 = vrot.slane %v3277_v41, %v3852_v5  ;;  %v3316_v23 = vcombine.low %v3301_v36, %v3308_v51 }
0x10d0   : > { %v3292_v58 = vcombine.low %v3284_v16, %v3291_v55  ;;  %v3323_v42 = vrot.slane %v3316_v23, %v3852_v5 }
0x10d2   : > { %v3334_v60 = vpack.c.bf16 %v3292_v58, %v3292_v58  ;;  %v3331_v63 = vcombine.low %v3323_v42, %v3330_v48 }
0x10d4   : > { %v3340_v10 = vsel %vm3338_vm12, %v3334_v60, %v3339_v3  ;;  %v3335_v52 = vpack.c.bf16 %v3331_v63, %v3331_v63 }
0x10d5   : > { %3341 = vst [vmem:[%s442_s19] sm:$0x7] %v3340_v10 }
0x10d6   : > { %v3343_v11 = vsel %vm3338_vm12, %v3335_v52, %v3342_v43 }
0x10d7   : > { %3344 = vst [vmem:[%s442_s19 + $0x4] sm:$0x7] %v3343_v11 }
0x10d8 PF: > { %s23_s25 = sadd.s32 1, %s3746_s25  }
0x10d9   : > { %p20_p4 = scmp.ge.s32.totalorder %s23_s25, 4  }
0x10db   :  { %22 = sbr.rel (!%p20_p4) target bundleno = 1 (0x1), region = 102 }

</bundles_post_ra>
